<compile_context>
chip_gen: v6e
topology: v6e:2x2x1
jax: 0.10.0
libtpu: 0.0.40
codegen_flags: <defaults>
</compile_context>

<pallas_src>
import jax
import jax.numpy as jnp
from jax.experimental import pallas as pl
from jax.experimental.pallas import tpu as pltpu

_NUM_DMA_SEMS = 8  # copies share semaphores round-robin (all copies are equal-sized)


def _shuffle_perm(C: int, g: int):
    """out[:, c] = in[:, perm[c]] for nn.ChannelShuffle(g) (static Python list)."""
    return [(c % g) * (C // g) + c // g for c in range(C)]


def _composed_perm(C: int, g1: int, g2: int):
    """Permutation for shuffle(g1) followed by shuffle(g2): out[c] = in[p1[p2[c]]]."""
    p1 = _shuffle_perm(C, g1)
    p2 = _shuffle_perm(C, g2)
    return [p1[p2[c]] for c in range(C)]


def _pick_blocks(N: int, C: int, HW: int, itemsize: int,
                 target_buf_bytes: int = 2 << 20):
    """Pick (n_blk, hw_blk) such that
       - hw_blk divides HW (manual DMA needs exact tiles) and is lane-dense when split,
       - n_blk divides N,
       - one output buffer (n_blk*C*hw_blk*itemsize) stays near ~2 MiB,
       - the grid keeps >= 2 steps whenever N allows (v7x megacore)."""
    # --- spatial block -------------------------------------------------------
    if C * HW * itemsize <= target_buf_bytes:
        hw_blk = HW                                   # whole spatial slab
    else:
        max_hw = max(128, target_buf_bytes // (C * itemsize))
        hw_blk = 0
        k = (max_hw // 128) * 128
        while k >= 128:                               # largest 128-multiple divisor
            if HW % k == 0:
                hw_blk = k
                break
            k -= 128
        if hw_blk == 0:
            # No lane-dense divisor of HW: fall back to the full slab (no ragged
            # tail allowed with manual DMA); vmem_limit below is sized from this.
            hw_blk = HW
    s_steps = HW // hw_blk

    # --- batch folding -------------------------------------------------------
    buf_bytes = C * hw_blk * itemsize
    max_n = max(1, target_buf_bytes // buf_bytes)
    if s_steps == 1 and N >= 2:
        max_n = min(max_n, N // 2)                    # keep >= 2 grid steps
    max_n = min(max_n, N)
    n_blk = 1
    for d in range(int(max_n), 0, -1):                # largest divisor of N <= max_n
        if N % d == 0:
            n_blk = d
            break
    return n_blk, hw_blk


def _make_gather_kernel(perm, n_blk: int, hw_blk: int):
    C = len(perm)

    def kernel(x_hbm, o_ref, sems):
        # Absolute HBM offsets for this grid step (input is un-tiled / ANY space).
        n0 = pl.multiple_of(pl.program_id(0) * n_blk, n_blk)
        s0 = pl.multiple_of(pl.program_id(1) * hw_blk, hw_blk)
        copies = []
        for c in range(C):  # static unroll; perm[c] is a compile-time constant
            cp = pltpu.make_async_copy(
                x_hbm.at[pl.ds(n0, n_blk), pl.ds(perm[c], 1), pl.ds(s0, hw_blk)],
                o_ref.at[:, c:c + 1, :],
                sems.at[c % _NUM_DMA_SEMS])
            cp.start()
            copies.append(cp)
        for cp in copies:
            cp.wait()

    return kernel


def double_channel_shuffle(x: jnp.ndarray, g1: int = 2, g2: int = 16) -> jnp.ndarray:
    """Applies nn.ChannelShuffle(g1) followed by nn.ChannelShuffle(g2)."""
    N, C, H, W = x.shape
    assert C % g1 == 0 and C % g2 == 0, "channels must divide both group counts"
    HW = H * W

    perm = _composed_perm(C, g1, g2)                  # trace-time static
    if perm == list(range(C)):
        return x                                      # shuffle(g2) inverted shuffle(g1)

    itemsize = jnp.dtype(x.dtype).itemsize
    n_blk, hw_blk = _pick_blocks(N, C, HW, itemsize)
    grid = (N // n_blk, HW // hw_blk)

    buf_bytes = n_blk * C * hw_blk * itemsize
    vmem_limit = max(2 * buf_bytes + (2 << 20), 4 << 20)   # double-buffered out + headroom

    x_flat = x.reshape(N, C, HW)                      # free reshape: H*W is the lane dim

    out_flat = pl.pallas_call(
        _make_gather_kernel(perm, n_blk, hw_blk),
        out_shape=jax.ShapeDtypeStruct((N, C, HW), x.dtype),
        grid=grid,
        in_specs=[pl.BlockSpec(memory_space=pl.ANY)],            # stay in HBM; DMA gather
        out_specs=pl.BlockSpec((n_blk, C, hw_blk), lambda n, s: (n, 0, s)),
        scratch_shapes=[pltpu.SemaphoreType.DMA((_NUM_DMA_SEMS,))],
        compiler_params=pltpu.CompilerParams(
            dimension_semantics=("parallel", "parallel"),
            vmem_limit_bytes=int(vmem_limit)),
    )(x_flat)

    return out_flat.reshape(N, C, H, W)


def model_forward(x: jnp.ndarray, y: jnp.ndarray):
    """Equivalent of Model.forward: shuffle(2) then shuffle(16) on both inputs."""
    x = double_channel_shuffle(x, 2, 16)
    y = double_channel_shuffle(y, 2, 16)
    return x, y


def _reference_channel_shuffle(x, g):
    N, C, H, W = x.shape
    return (
        x.reshape(N, g, C // g, H, W)
        .transpose(0, 2, 1, 3, 4)
        .reshape(N, C, H, W)
    )


if __name__ == "__main__":
    key = jax.random.PRNGKey(0)
    kx, ky = jax.random.split(key)

    # Channels divisible by both 2 and 16; chosen so the composed permutation is
    # non-trivial (exercises the DMA-gather kernel on both inputs).
    x = jax.random.uniform(kx, (2, 48, 16, 16), dtype=jnp.float32)
    y = jax.random.uniform(ky, (1, 64, 8, 8), dtype=jnp.float32)

    out_x, out_y = model_forward(x, y)
    jax.block_until_ready((out_x, out_y))

    # Pure-JAX reference check.
    ref_x = _reference_channel_shuffle(_reference_channel_shuffle(x, 2), 16)
    ref_y = _reference_channel_shuffle(_reference_channel_shuffle(y, 2), 16)
    assert jnp.array_equal(out_x, ref_x), "x mismatch"
    assert jnp.array_equal(out_y, ref_y), "y mismatch"

    # Identity short-circuit path: C=32 -> shuffle(16) inverts shuffle(2).
    z = jax.random.uniform(key, (1, 32, 4, 4), dtype=jnp.float32)
    out_z = double_channel_shuffle(z, 2, 16)
    jax.block_until_ready(out_z)
    ref_z = _reference_channel_shuffle(_reference_channel_shuffle(z, 2), 16)
    assert jnp.array_equal(out_z, ref_z), "identity path mismatch"

    print("KERNEL_OK")
</pallas_src>

<mosaic_0001>
module attributes {stable_mosaic.version = 11 : i64} {
  func.func @kernel(%arg0: i32, %arg1: i32, %arg2: memref<2x48x256xf32, #tpu.memory_space<any>>, %arg3: memref<1x48x256xf32, #tpu.memory_space<vmem>>, %arg4: memref<8x!tpu.dma_semaphore, #tpu.memory_space<semaphore_mem>>) attributes {dimension_semantics = [#tpu.dimension_semantics<parallel>, #tpu.dimension_semantics<parallel>], iteration_bounds = array<i64: 2, 1>, scalar_prefetch = 0 : i64, scratch_operands = 1 : i64, tpu.core_type = #tpu.core_type<tc>, window_params = [{}, {transform_indices = @transform_1, window_bounds = array<i64: 1, 48, 256>}]} {
    %c1_i32 = arith.constant 1 : i32
    %0 = arith.muli %arg0, %c1_i32 : i32
    %1 = tpu.assume_multiple %0, 1 : i32
    %c256_i32 = arith.constant 256 : i32
    %2 = arith.muli %arg1, %c256_i32 : i32
    %3 = tpu.assume_multiple %2, 256 : i32
    %c0_i32 = arith.constant 0 : i32
    %c0_i32_0 = arith.constant 0 : i32
    %4 = tpu.memref_slice %arg2[%1, %c0_i32_0, %3] : memref<2x48x256xf32, #tpu.memory_space<any>> -> memref<1x1x256xf32, #tpu.memory_space<any>>
    %c0_i32_1 = arith.constant 0 : i32
    %c0_i32_2 = arith.constant 0 : i32
    %c0_i32_3 = arith.constant 0 : i32
    %5 = tpu.memref_slice %arg3[%c0_i32_1, %c0_i32_2, %c0_i32_3] : memref<1x48x256xf32, #tpu.memory_space<vmem>> -> memref<1x1x256xf32, #tpu.memory_space<vmem>>
    %6 = tpu.memref_slice %arg4[%c0_i32] : memref<8x!tpu.dma_semaphore, #tpu.memory_space<semaphore_mem>> -> memref<1x!tpu.dma_semaphore, #tpu.memory_space<semaphore_mem>>
    %7 = tpu.memref_squeeze %6 : memref<1x!tpu.dma_semaphore, #tpu.memory_space<semaphore_mem>> -> memref<!tpu.dma_semaphore, #tpu.memory_space<semaphore_mem>>
    tpu.enqueue_dma source(%4 : memref<1x1x256xf32, #tpu.memory_space<any>>) target(%5 : memref<1x1x256xf32, #tpu.memory_space<vmem>>) target_semaphore(%7 : memref<!tpu.dma_semaphore, #tpu.memory_space<semaphore_mem>>)
    %c1_i32_4 = arith.constant 1 : i32
    %c25_i32 = arith.constant 25 : i32
    %8 = tpu.memref_slice %arg2[%1, %c25_i32, %3] : memref<2x48x256xf32, #tpu.memory_space<any>> -> memref<1x1x256xf32, #tpu.memory_space<any>>
    %c0_i32_5 = arith.constant 0 : i32
    %c1_i32_6 = arith.constant 1 : i32
    %c0_i32_7 = arith.constant 0 : i32
    %9 = tpu.memref_slice %arg3[%c0_i32_5, %c1_i32_6, %c0_i32_7] : memref<1x48x256xf32, #tpu.memory_space<vmem>> -> memref<1x1x256xf32, #tpu.memory_space<vmem>>
    %10 = tpu.memref_slice %arg4[%c1_i32_4] : memref<8x!tpu.dma_semaphore, #tpu.memory_space<semaphore_mem>> -> memref<1x!tpu.dma_semaphore, #tpu.memory_space<semaphore_mem>>
    %11 = tpu.memref_squeeze %10 : memref<1x!tpu.dma_semaphore, #tpu.memory_space<semaphore_mem>> -> memref<!tpu.dma_semaphore, #tpu.memory_space<semaphore_mem>>
    tpu.enqueue_dma source(%8 : memref<1x1x256xf32, #tpu.memory_space<any>>) target(%9 : memref<1x1x256xf32, #tpu.memory_space<vmem>>) target_semaphore(%11 : memref<!tpu.dma_semaphore, #tpu.memory_space<semaphore_mem>>)
    %c2_i32 = arith.constant 2 : i32
    %c3_i32 = arith.constant 3 : i32
    %12 = tpu.memref_slice %arg2[%1, %c3_i32, %3] : memref<2x48x256xf32, #tpu.memory_space<any>> -> memref<1x1x256xf32, #tpu.memory_space<any>>
    %c0_i32_8 = arith.constant 0 : i32
    %c2_i32_9 = arith.constant 2 : i32
    %c0_i32_10 = arith.constant 0 : i32
    %13 = tpu.memref_slice %arg3[%c0_i32_8, %c2_i32_9, %c0_i32_10] : memref<1x48x256xf32, #tpu.memory_space<vmem>> -> memref<1x1x256xf32, #tpu.memory_space<vmem>>
    %14 = tpu.memref_slice %arg4[%c2_i32] : memref<8x!tpu.dma_semaphore, #tpu.memory_space<semaphore_mem>> -> memref<1x!tpu.dma_semaphore, #tpu.memory_space<semaphore_mem>>
    %15 = tpu.memref_squeeze %14 : memref<1x!tpu.dma_semaphore, #tpu.memory_space<semaphore_mem>> -> memref<!tpu.dma_semaphore, #tpu.memory_space<semaphore_mem>>
    tpu.enqueue_dma source(%12 : memref<1x1x256xf32, #tpu.memory_space<any>>) target(%13 : memref<1x1x256xf32, #tpu.memory_space<vmem>>) target_semaphore(%15 : memref<!tpu.dma_semaphore, #tpu.memory_space<semaphore_mem>>)
    %c3_i32_11 = arith.constant 3 : i32
    %c28_i32 = arith.constant 28 : i32
    %16 = tpu.memref_slice %arg2[%1, %c28_i32, %3] : memref<2x48x256xf32, #tpu.memory_space<any>> -> memref<1x1x256xf32, #tpu.memory_space<any>>
    %c0_i32_12 = arith.constant 0 : i32
    %c3_i32_13 = arith.constant 3 : i32
    %c0_i32_14 = arith.constant 0 : i32
    %17 = tpu.memref_slice %arg3[%c0_i32_12, %c3_i32_13, %c0_i32_14] : memref<1x48x256xf32, #tpu.memory_space<vmem>> -> memref<1x1x256xf32, #tpu.memory_space<vmem>>
    %18 = tpu.memref_slice %arg4[%c3_i32_11] : memref<8x!tpu.dma_semaphore, #tpu.memory_space<semaphore_mem>> -> memref<1x!tpu.dma_semaphore, #tpu.memory_space<semaphore_mem>>
    %19 = tpu.memref_squeeze %18 : memref<1x!tpu.dma_semaphore, #tpu.memory_space<semaphore_mem>> -> memref<!tpu.dma_semaphore, #tpu.memory_space<semaphore_mem>>
    tpu.enqueue_dma source(%16 : memref<1x1x256xf32, #tpu.memory_space<any>>) target(%17 : memref<1x1x256xf32, #tpu.memory_space<vmem>>) target_semaphore(%19 : memref<!tpu.dma_semaphore, #tpu.memory_space<semaphore_mem>>)
    %c4_i32 = arith.constant 4 : i32
    %c6_i32 = arith.constant 6 : i32
    %20 = tpu.memref_slice %arg2[%1, %c6_i32, %3] : memref<2x48x256xf32, #tpu.memory_space<any>> -> memref<1x1x256xf32, #tpu.memory_space<any>>
    %c0_i32_15 = arith.constant 0 : i32
    %c4_i32_16 = arith.constant 4 : i32
    %c0_i32_17 = arith.constant 0 : i32
    %21 = tpu.memref_slice %arg3[%c0_i32_15, %c4_i32_16, %c0_i32_17] : memref<1x48x256xf32, #tpu.memory_space<vmem>> -> memref<1x1x256xf32, #tpu.memory_space<vmem>>
    %22 = tpu.memref_slice %arg4[%c4_i32] : memref<8x!tpu.dma_semaphore, #tpu.memory_space<semaphore_mem>> -> memref<1x!tpu.dma_semaphore, #tpu.memory_space<semaphore_mem>>
    %23 = tpu.memref_squeeze %22 : memref<1x!tpu.dma_semaphore, #tpu.memory_space<semaphore_mem>> -> memref<!tpu.dma_semaphore, #tpu.memory_space<semaphore_mem>>
    tpu.enqueue_dma source(%20 : memref<1x1x256xf32, #tpu.memory_space<any>>) target(%21 : memref<1x1x256xf32, #tpu.memory_space<vmem>>) target_semaphore(%23 : memref<!tpu.dma_semaphore, #tpu.memory_space<semaphore_mem>>)
    %c5_i32 = arith.constant 5 : i32
    %c31_i32 = arith.constant 31 : i32
    %24 = tpu.memref_slice %arg2[%1, %c31_i32, %3] : memref<2x48x256xf32, #tpu.memory_space<any>> -> memref<1x1x256xf32, #tpu.memory_space<any>>
    %c0_i32_18 = arith.constant 0 : i32
    %c5_i32_19 = arith.constant 5 : i32
    %c0_i32_20 = arith.constant 0 : i32
    %25 = tpu.memref_slice %arg3[%c0_i32_18, %c5_i32_19, %c0_i32_20] : memref<1x48x256xf32, #tpu.memory_space<vmem>> -> memref<1x1x256xf32, #tpu.memory_space<vmem>>
    %26 = tpu.memref_slice %arg4[%c5_i32] : memref<8x!tpu.dma_semaphore, #tpu.memory_space<semaphore_mem>> -> memref<1x!tpu.dma_semaphore, #tpu.memory_space<semaphore_mem>>
    %27 = tpu.memref_squeeze %26 : memref<1x!tpu.dma_semaphore, #tpu.memory_space<semaphore_mem>> -> memref<!tpu.dma_semaphore, #tpu.memory_space<semaphore_mem>>
    tpu.enqueue_dma source(%24 : memref<1x1x256xf32, #tpu.memory_space<any>>) target(%25 : memref<1x1x256xf32, #tpu.memory_space<vmem>>) target_semaphore(%27 : memref<!tpu.dma_semaphore, #tpu.memory_space<semaphore_mem>>)
    %c6_i32_21 = arith.constant 6 : i32
    %c9_i32 = arith.constant 9 : i32
    %28 = tpu.memref_slice %arg2[%1, %c9_i32, %3] : memref<2x48x256xf32, #tpu.memory_space<any>> -> memref<1x1x256xf32, #tpu.memory_space<any>>
    %c0_i32_22 = arith.constant 0 : i32
    %c6_i32_23 = arith.constant 6 : i32
    %c0_i32_24 = arith.constant 0 : i32
    %29 = tpu.memref_slice %arg3[%c0_i32_22, %c6_i32_23, %c0_i32_24] : memref<1x48x256xf32, #tpu.memory_space<vmem>> -> memref<1x1x256xf32, #tpu.memory_space<vmem>>
    %30 = tpu.memref_slice %arg4[%c6_i32_21] : memref<8x!tpu.dma_semaphore, #tpu.memory_space<semaphore_mem>> -> memref<1x!tpu.dma_semaphore, #tpu.memory_space<semaphore_mem>>
    %31 = tpu.memref_squeeze %30 : memref<1x!tpu.dma_semaphore, #tpu.memory_space<semaphore_mem>> -> memref<!tpu.dma_semaphore, #tpu.memory_space<semaphore_mem>>
    tpu.enqueue_dma source(%28 : memref<1x1x256xf32, #tpu.memory_space<any>>) target(%29 : memref<1x1x256xf32, #tpu.memory_space<vmem>>) target_semaphore(%31 : memref<!tpu.dma_semaphore, #tpu.memory_space<semaphore_mem>>)
    %c7_i32 = arith.constant 7 : i32
    %c34_i32 = arith.constant 34 : i32
    %32 = tpu.memref_slice %arg2[%1, %c34_i32, %3] : memref<2x48x256xf32, #tpu.memory_space<any>> -> memref<1x1x256xf32, #tpu.memory_space<any>>
    %c0_i32_25 = arith.constant 0 : i32
    %c7_i32_26 = arith.constant 7 : i32
    %c0_i32_27 = arith.constant 0 : i32
    %33 = tpu.memref_slice %arg3[%c0_i32_25, %c7_i32_26, %c0_i32_27] : memref<1x48x256xf32, #tpu.memory_space<vmem>> -> memref<1x1x256xf32, #tpu.memory_space<vmem>>
    %34 = tpu.memref_slice %arg4[%c7_i32] : memref<8x!tpu.dma_semaphore, #tpu.memory_space<semaphore_mem>> -> memref<1x!tpu.dma_semaphore, #tpu.memory_space<semaphore_mem>>
    %35 = tpu.memref_squeeze %34 : memref<1x!tpu.dma_semaphore, #tpu.memory_space<semaphore_mem>> -> memref<!tpu.dma_semaphore, #tpu.memory_space<semaphore_mem>>
    tpu.enqueue_dma source(%32 : memref<1x1x256xf32, #tpu.memory_space<any>>) target(%33 : memref<1x1x256xf32, #tpu.memory_space<vmem>>) target_semaphore(%35 : memref<!tpu.dma_semaphore, #tpu.memory_space<semaphore_mem>>)
    %c0_i32_28 = arith.constant 0 : i32
    %c12_i32 = arith.constant 12 : i32
    %36 = tpu.memref_slice %arg2[%1, %c12_i32, %3] : memref<2x48x256xf32, #tpu.memory_space<any>> -> memref<1x1x256xf32, #tpu.memory_space<any>>
    %c0_i32_29 = arith.constant 0 : i32
    %c8_i32 = arith.constant 8 : i32
    %c0_i32_30 = arith.constant 0 : i32
    %37 = tpu.memref_slice %arg3[%c0_i32_29, %c8_i32, %c0_i32_30] : memref<1x48x256xf32, #tpu.memory_space<vmem>> -> memref<1x1x256xf32, #tpu.memory_space<vmem>>
    %38 = tpu.memref_slice %arg4[%c0_i32_28] : memref<8x!tpu.dma_semaphore, #tpu.memory_space<semaphore_mem>> -> memref<1x!tpu.dma_semaphore, #tpu.memory_space<semaphore_mem>>
    %39 = tpu.memref_squeeze %38 : memref<1x!tpu.dma_semaphore, #tpu.memory_space<semaphore_mem>> -> memref<!tpu.dma_semaphore, #tpu.memory_space<semaphore_mem>>
    tpu.enqueue_dma source(%36 : memref<1x1x256xf32, #tpu.memory_space<any>>) target(%37 : memref<1x1x256xf32, #tpu.memory_space<vmem>>) target_semaphore(%39 : memref<!tpu.dma_semaphore, #tpu.memory_space<semaphore_mem>>)
    %c1_i32_31 = arith.constant 1 : i32
    %c37_i32 = arith.constant 37 : i32
    %40 = tpu.memref_slice %arg2[%1, %c37_i32, %3] : memref<2x48x256xf32, #tpu.memory_space<any>> -> memref<1x1x256xf32, #tpu.memory_space<any>>
    %c0_i32_32 = arith.constant 0 : i32
    %c9_i32_33 = arith.constant 9 : i32
    %c0_i32_34 = arith.constant 0 : i32
    %41 = tpu.memref_slice %arg3[%c0_i32_32, %c9_i32_33, %c0_i32_34] : memref<1x48x256xf32, #tpu.memory_space<vmem>> -> memref<1x1x256xf32, #tpu.memory_space<vmem>>
    %42 = tpu.memref_slice %arg4[%c1_i32_31] : memref<8x!tpu.dma_semaphore, #tpu.memory_space<semaphore_mem>> -> memref<1x!tpu.dma_semaphore, #tpu.memory_space<semaphore_mem>>
    %43 = tpu.memref_squeeze %42 : memref<1x!tpu.dma_semaphore, #tpu.memory_space<semaphore_mem>> -> memref<!tpu.dma_semaphore, #tpu.memory_space<semaphore_mem>>
    tpu.enqueue_dma source(%40 : memref<1x1x256xf32, #tpu.memory_space<any>>) target(%41 : memref<1x1x256xf32, #tpu.memory_space<vmem>>) target_semaphore(%43 : memref<!tpu.dma_semaphore, #tpu.memory_space<semaphore_mem>>)
    %c2_i32_35 = arith.constant 2 : i32
    %c15_i32 = arith.constant 15 : i32
    %44 = tpu.memref_slice %arg2[%1, %c15_i32, %3] : memref<2x48x256xf32, #tpu.memory_space<any>> -> memref<1x1x256xf32, #tpu.memory_space<any>>
    %c0_i32_36 = arith.constant 0 : i32
    %c10_i32 = arith.constant 10 : i32
    %c0_i32_37 = arith.constant 0 : i32
    %45 = tpu.memref_slice %arg3[%c0_i32_36, %c10_i32, %c0_i32_37] : memref<1x48x256xf32, #tpu.memory_space<vmem>> -> memref<1x1x256xf32, #tpu.memory_space<vmem>>
    %46 = tpu.memref_slice %arg4[%c2_i32_35] : memref<8x!tpu.dma_semaphore, #tpu.memory_space<semaphore_mem>> -> memref<1x!tpu.dma_semaphore, #tpu.memory_space<semaphore_mem>>
    %47 = tpu.memref_squeeze %46 : memref<1x!tpu.dma_semaphore, #tpu.memory_space<semaphore_mem>> -> memref<!tpu.dma_semaphore, #tpu.memory_space<semaphore_mem>>
    tpu.enqueue_dma source(%44 : memref<1x1x256xf32, #tpu.memory_space<any>>) target(%45 : memref<1x1x256xf32, #tpu.memory_space<vmem>>) target_semaphore(%47 : memref<!tpu.dma_semaphore, #tpu.memory_space<semaphore_mem>>)
    %c3_i32_38 = arith.constant 3 : i32
    %c40_i32 = arith.constant 40 : i32
    %48 = tpu.memref_slice %arg2[%1, %c40_i32, %3] : memref<2x48x256xf32, #tpu.memory_space<any>> -> memref<1x1x256xf32, #tpu.memory_space<any>>
    %c0_i32_39 = arith.constant 0 : i32
    %c11_i32 = arith.constant 11 : i32
    %c0_i32_40 = arith.constant 0 : i32
    %49 = tpu.memref_slice %arg3[%c0_i32_39, %c11_i32, %c0_i32_40] : memref<1x48x256xf32, #tpu.memory_space<vmem>> -> memref<1x1x256xf32, #tpu.memory_space<vmem>>
    %50 = tpu.memref_slice %arg4[%c3_i32_38] : memref<8x!tpu.dma_semaphore, #tpu.memory_space<semaphore_mem>> -> memref<1x!tpu.dma_semaphore, #tpu.memory_space<semaphore_mem>>
    %51 = tpu.memref_squeeze %50 : memref<1x!tpu.dma_semaphore, #tpu.memory_space<semaphore_mem>> -> memref<!tpu.dma_semaphore, #tpu.memory_space<semaphore_mem>>
    tpu.enqueue_dma source(%48 : memref<1x1x256xf32, #tpu.memory_space<any>>) target(%49 : memref<1x1x256xf32, #tpu.memory_space<vmem>>) target_semaphore(%51 : memref<!tpu.dma_semaphore, #tpu.memory_space<semaphore_mem>>)
    %c4_i32_41 = arith.constant 4 : i32
    %c18_i32 = arith.constant 18 : i32
    %52 = tpu.memref_slice %arg2[%1, %c18_i32, %3] : memref<2x48x256xf32, #tpu.memory_space<any>> -> memref<1x1x256xf32, #tpu.memory_space<any>>
    %c0_i32_42 = arith.constant 0 : i32
    %c12_i32_43 = arith.constant 12 : i32
    %c0_i32_44 = arith.constant 0 : i32
    %53 = tpu.memref_slice %arg3[%c0_i32_42, %c12_i32_43, %c0_i32_44] : memref<1x48x256xf32, #tpu.memory_space<vmem>> -> memref<1x1x256xf32, #tpu.memory_space<vmem>>
    %54 = tpu.memref_slice %arg4[%c4_i32_41] : memref<8x!tpu.dma_semaphore, #tpu.memory_space<semaphore_mem>> -> memref<1x!tpu.dma_semaphore, #tpu.memory_space<semaphore_mem>>
    %55 = tpu.memref_squeeze %54 : memref<1x!tpu.dma_semaphore, #tpu.memory_space<semaphore_mem>> -> memref<!tpu.dma_semaphore, #tpu.memory_space<semaphore_mem>>
    tpu.enqueue_dma source(%52 : memref<1x1x256xf32, #tpu.memory_space<any>>) target(%53 : memref<1x1x256xf32, #tpu.memory_space<vmem>>) target_semaphore(%55 : memref<!tpu.dma_semaphore, #tpu.memory_space<semaphore_mem>>)
    %c5_i32_45 = arith.constant 5 : i32
    %c43_i32 = arith.constant 43 : i32
    %56 = tpu.memref_slice %arg2[%1, %c43_i32, %3] : memref<2x48x256xf32, #tpu.memory_space<any>> -> memref<1x1x256xf32, #tpu.memory_space<any>>
    %c0_i32_46 = arith.constant 0 : i32
    %c13_i32 = arith.constant 13 : i32
    %c0_i32_47 = arith.constant 0 : i32
    %57 = tpu.memref_slice %arg3[%c0_i32_46, %c13_i32, %c0_i32_47] : memref<1x48x256xf32, #tpu.memory_space<vmem>> -> memref<1x1x256xf32, #tpu.memory_space<vmem>>
    %58 = tpu.memref_slice %arg4[%c5_i32_45] : memref<8x!tpu.dma_semaphore, #tpu.memory_space<semaphore_mem>> -> memref<1x!tpu.dma_semaphore, #tpu.memory_space<semaphore_mem>>
    %59 = tpu.memref_squeeze %58 : memref<1x!tpu.dma_semaphore, #tpu.memory_space<semaphore_mem>> -> memref<!tpu.dma_semaphore, #tpu.memory_space<semaphore_mem>>
    tpu.enqueue_dma source(%56 : memref<1x1x256xf32, #tpu.memory_space<any>>) target(%57 : memref<1x1x256xf32, #tpu.memory_space<vmem>>) target_semaphore(%59 : memref<!tpu.dma_semaphore, #tpu.memory_space<semaphore_mem>>)
    %c6_i32_48 = arith.constant 6 : i32
    %c21_i32 = arith.constant 21 : i32
    %60 = tpu.memref_slice %arg2[%1, %c21_i32, %3] : memref<2x48x256xf32, #tpu.memory_space<any>> -> memref<1x1x256xf32, #tpu.memory_space<any>>
    %c0_i32_49 = arith.constant 0 : i32
    %c14_i32 = arith.constant 14 : i32
    %c0_i32_50 = arith.constant 0 : i32
    %61 = tpu.memref_slice %arg3[%c0_i32_49, %c14_i32, %c0_i32_50] : memref<1x48x256xf32, #tpu.memory_space<vmem>> -> memref<1x1x256xf32, #tpu.memory_space<vmem>>
    %62 = tpu.memref_slice %arg4[%c6_i32_48] : memref<8x!tpu.dma_semaphore, #tpu.memory_space<semaphore_mem>> -> memref<1x!tpu.dma_semaphore, #tpu.memory_space<semaphore_mem>>
    %63 = tpu.memref_squeeze %62 : memref<1x!tpu.dma_semaphore, #tpu.memory_space<semaphore_mem>> -> memref<!tpu.dma_semaphore, #tpu.memory_space<semaphore_mem>>
    tpu.enqueue_dma source(%60 : memref<1x1x256xf32, #tpu.memory_space<any>>) target(%61 : memref<1x1x256xf32, #tpu.memory_space<vmem>>) target_semaphore(%63 : memref<!tpu.dma_semaphore, #tpu.memory_space<semaphore_mem>>)
    %c7_i32_51 = arith.constant 7 : i32
    %c46_i32 = arith.constant 46 : i32
    %64 = tpu.memref_slice %arg2[%1, %c46_i32, %3] : memref<2x48x256xf32, #tpu.memory_space<any>> -> memref<1x1x256xf32, #tpu.memory_space<any>>
    %c0_i32_52 = arith.constant 0 : i32
    %c15_i32_53 = arith.constant 15 : i32
    %c0_i32_54 = arith.constant 0 : i32
    %65 = tpu.memref_slice %arg3[%c0_i32_52, %c15_i32_53, %c0_i32_54] : memref<1x48x256xf32, #tpu.memory_space<vmem>> -> memref<1x1x256xf32, #tpu.memory_space<vmem>>
    %66 = tpu.memref_slice %arg4[%c7_i32_51] : memref<8x!tpu.dma_semaphore, #tpu.memory_space<semaphore_mem>> -> memref<1x!tpu.dma_semaphore, #tpu.memory_space<semaphore_mem>>
    %67 = tpu.memref_squeeze %66 : memref<1x!tpu.dma_semaphore, #tpu.memory_space<semaphore_mem>> -> memref<!tpu.dma_semaphore, #tpu.memory_space<semaphore_mem>>
    tpu.enqueue_dma source(%64 : memref<1x1x256xf32, #tpu.memory_space<any>>) target(%65 : memref<1x1x256xf32, #tpu.memory_space<vmem>>) target_semaphore(%67 : memref<!tpu.dma_semaphore, #tpu.memory_space<semaphore_mem>>)
    %c0_i32_55 = arith.constant 0 : i32
    %c24_i32 = arith.constant 24 : i32
    %68 = tpu.memref_slice %arg2[%1, %c24_i32, %3] : memref<2x48x256xf32, #tpu.memory_space<any>> -> memref<1x1x256xf32, #tpu.memory_space<any>>
    %c0_i32_56 = arith.constant 0 : i32
    %c16_i32 = arith.constant 16 : i32
    %c0_i32_57 = arith.constant 0 : i32
    %69 = tpu.memref_slice %arg3[%c0_i32_56, %c16_i32, %c0_i32_57] : memref<1x48x256xf32, #tpu.memory_space<vmem>> -> memref<1x1x256xf32, #tpu.memory_space<vmem>>
    %70 = tpu.memref_slice %arg4[%c0_i32_55] : memref<8x!tpu.dma_semaphore, #tpu.memory_space<semaphore_mem>> -> memref<1x!tpu.dma_semaphore, #tpu.memory_space<semaphore_mem>>
    %71 = tpu.memref_squeeze %70 : memref<1x!tpu.dma_semaphore, #tpu.memory_space<semaphore_mem>> -> memref<!tpu.dma_semaphore, #tpu.memory_space<semaphore_mem>>
    tpu.enqueue_dma source(%68 : memref<1x1x256xf32, #tpu.memory_space<any>>) target(%69 : memref<1x1x256xf32, #tpu.memory_space<vmem>>) target_semaphore(%71 : memref<!tpu.dma_semaphore, #tpu.memory_space<semaphore_mem>>)
    %c1_i32_58 = arith.constant 1 : i32
    %c2_i32_59 = arith.constant 2 : i32
    %72 = tpu.memref_slice %arg2[%1, %c2_i32_59, %3] : memref<2x48x256xf32, #tpu.memory_space<any>> -> memref<1x1x256xf32, #tpu.memory_space<any>>
    %c0_i32_60 = arith.constant 0 : i32
    %c17_i32 = arith.constant 17 : i32
    %c0_i32_61 = arith.constant 0 : i32
    %73 = tpu.memref_slice %arg3[%c0_i32_60, %c17_i32, %c0_i32_61] : memref<1x48x256xf32, #tpu.memory_space<vmem>> -> memref<1x1x256xf32, #tpu.memory_space<vmem>>
    %74 = tpu.memref_slice %arg4[%c1_i32_58] : memref<8x!tpu.dma_semaphore, #tpu.memory_space<semaphore_mem>> -> memref<1x!tpu.dma_semaphore, #tpu.memory_space<semaphore_mem>>
    %75 = tpu.memref_squeeze %74 : memref<1x!tpu.dma_semaphore, #tpu.memory_space<semaphore_mem>> -> memref<!tpu.dma_semaphore, #tpu.memory_space<semaphore_mem>>
    tpu.enqueue_dma source(%72 : memref<1x1x256xf32, #tpu.memory_space<any>>) target(%73 : memref<1x1x256xf32, #tpu.memory_space<vmem>>) target_semaphore(%75 : memref<!tpu.dma_semaphore, #tpu.memory_space<semaphore_mem>>)
    %c2_i32_62 = arith.constant 2 : i32
    %c27_i32 = arith.constant 27 : i32
    %76 = tpu.memref_slice %arg2[%1, %c27_i32, %3] : memref<2x48x256xf32, #tpu.memory_space<any>> -> memref<1x1x256xf32, #tpu.memory_space<any>>
    %c0_i32_63 = arith.constant 0 : i32
    %c18_i32_64 = arith.constant 18 : i32
    %c0_i32_65 = arith.constant 0 : i32
    %77 = tpu.memref_slice %arg3[%c0_i32_63, %c18_i32_64, %c0_i32_65] : memref<1x48x256xf32, #tpu.memory_space<vmem>> -> memref<1x1x256xf32, #tpu.memory_space<vmem>>
    %78 = tpu.memref_slice %arg4[%c2_i32_62] : memref<8x!tpu.dma_semaphore, #tpu.memory_space<semaphore_mem>> -> memref<1x!tpu.dma_semaphore, #tpu.memory_space<semaphore_mem>>
    %79 = tpu.memref_squeeze %78 : memref<1x!tpu.dma_semaphore, #tpu.memory_space<semaphore_mem>> -> memref<!tpu.dma_semaphore, #tpu.memory_space<semaphore_mem>>
    tpu.enqueue_dma source(%76 : memref<1x1x256xf32, #tpu.memory_space<any>>) target(%77 : memref<1x1x256xf32, #tpu.memory_space<vmem>>) target_semaphore(%79 : memref<!tpu.dma_semaphore, #tpu.memory_space<semaphore_mem>>)
    %c3_i32_66 = arith.constant 3 : i32
    %c5_i32_67 = arith.constant 5 : i32
    %80 = tpu.memref_slice %arg2[%1, %c5_i32_67, %3] : memref<2x48x256xf32, #tpu.memory_space<any>> -> memref<1x1x256xf32, #tpu.memory_space<any>>
    %c0_i32_68 = arith.constant 0 : i32
    %c19_i32 = arith.constant 19 : i32
    %c0_i32_69 = arith.constant 0 : i32
    %81 = tpu.memref_slice %arg3[%c0_i32_68, %c19_i32, %c0_i32_69] : memref<1x48x256xf32, #tpu.memory_space<vmem>> -> memref<1x1x256xf32, #tpu.memory_space<vmem>>
    %82 = tpu.memref_slice %arg4[%c3_i32_66] : memref<8x!tpu.dma_semaphore, #tpu.memory_space<semaphore_mem>> -> memref<1x!tpu.dma_semaphore, #tpu.memory_space<semaphore_mem>>
    %83 = tpu.memref_squeeze %82 : memref<1x!tpu.dma_semaphore, #tpu.memory_space<semaphore_mem>> -> memref<!tpu.dma_semaphore, #tpu.memory_space<semaphore_mem>>
    tpu.enqueue_dma source(%80 : memref<1x1x256xf32, #tpu.memory_space<any>>) target(%81 : memref<1x1x256xf32, #tpu.memory_space<vmem>>) target_semaphore(%83 : memref<!tpu.dma_semaphore, #tpu.memory_space<semaphore_mem>>)
    %c4_i32_70 = arith.constant 4 : i32
    %c30_i32 = arith.constant 30 : i32
    %84 = tpu.memref_slice %arg2[%1, %c30_i32, %3] : memref<2x48x256xf32, #tpu.memory_space<any>> -> memref<1x1x256xf32, #tpu.memory_space<any>>
    %c0_i32_71 = arith.constant 0 : i32
    %c20_i32 = arith.constant 20 : i32
    %c0_i32_72 = arith.constant 0 : i32
    %85 = tpu.memref_slice %arg3[%c0_i32_71, %c20_i32, %c0_i32_72] : memref<1x48x256xf32, #tpu.memory_space<vmem>> -> memref<1x1x256xf32, #tpu.memory_space<vmem>>
    %86 = tpu.memref_slice %arg4[%c4_i32_70] : memref<8x!tpu.dma_semaphore, #tpu.memory_space<semaphore_mem>> -> memref<1x!tpu.dma_semaphore, #tpu.memory_space<semaphore_mem>>
    %87 = tpu.memref_squeeze %86 : memref<1x!tpu.dma_semaphore, #tpu.memory_space<semaphore_mem>> -> memref<!tpu.dma_semaphore, #tpu.memory_space<semaphore_mem>>
    tpu.enqueue_dma source(%84 : memref<1x1x256xf32, #tpu.memory_space<any>>) target(%85 : memref<1x1x256xf32, #tpu.memory_space<vmem>>) target_semaphore(%87 : memref<!tpu.dma_semaphore, #tpu.memory_space<semaphore_mem>>)
    %c5_i32_73 = arith.constant 5 : i32
    %c8_i32_74 = arith.constant 8 : i32
    %88 = tpu.memref_slice %arg2[%1, %c8_i32_74, %3] : memref<2x48x256xf32, #tpu.memory_space<any>> -> memref<1x1x256xf32, #tpu.memory_space<any>>
    %c0_i32_75 = arith.constant 0 : i32
    %c21_i32_76 = arith.constant 21 : i32
    %c0_i32_77 = arith.constant 0 : i32
    %89 = tpu.memref_slice %arg3[%c0_i32_75, %c21_i32_76, %c0_i32_77] : memref<1x48x256xf32, #tpu.memory_space<vmem>> -> memref<1x1x256xf32, #tpu.memory_space<vmem>>
    %90 = tpu.memref_slice %arg4[%c5_i32_73] : memref<8x!tpu.dma_semaphore, #tpu.memory_space<semaphore_mem>> -> memref<1x!tpu.dma_semaphore, #tpu.memory_space<semaphore_mem>>
    %91 = tpu.memref_squeeze %90 : memref<1x!tpu.dma_semaphore, #tpu.memory_space<semaphore_mem>> -> memref<!tpu.dma_semaphore, #tpu.memory_space<semaphore_mem>>
    tpu.enqueue_dma source(%88 : memref<1x1x256xf32, #tpu.memory_space<any>>) target(%89 : memref<1x1x256xf32, #tpu.memory_space<vmem>>) target_semaphore(%91 : memref<!tpu.dma_semaphore, #tpu.memory_space<semaphore_mem>>)
    %c6_i32_78 = arith.constant 6 : i32
    %c33_i32 = arith.constant 33 : i32
    %92 = tpu.memref_slice %arg2[%1, %c33_i32, %3] : memref<2x48x256xf32, #tpu.memory_space<any>> -> memref<1x1x256xf32, #tpu.memory_space<any>>
    %c0_i32_79 = arith.constant 0 : i32
    %c22_i32 = arith.constant 22 : i32
    %c0_i32_80 = arith.constant 0 : i32
    %93 = tpu.memref_slice %arg3[%c0_i32_79, %c22_i32, %c0_i32_80] : memref<1x48x256xf32, #tpu.memory_space<vmem>> -> memref<1x1x256xf32, #tpu.memory_space<vmem>>
    %94 = tpu.memref_slice %arg4[%c6_i32_78] : memref<8x!tpu.dma_semaphore, #tpu.memory_space<semaphore_mem>> -> memref<1x!tpu.dma_semaphore, #tpu.memory_space<semaphore_mem>>
    %95 = tpu.memref_squeeze %94 : memref<1x!tpu.dma_semaphore, #tpu.memory_space<semaphore_mem>> -> memref<!tpu.dma_semaphore, #tpu.memory_space<semaphore_mem>>
    tpu.enqueue_dma source(%92 : memref<1x1x256xf32, #tpu.memory_space<any>>) target(%93 : memref<1x1x256xf32, #tpu.memory_space<vmem>>) target_semaphore(%95 : memref<!tpu.dma_semaphore, #tpu.memory_space<semaphore_mem>>)
    %c7_i32_81 = arith.constant 7 : i32
    %c11_i32_82 = arith.constant 11 : i32
    %96 = tpu.memref_slice %arg2[%1, %c11_i32_82, %3] : memref<2x48x256xf32, #tpu.memory_space<any>> -> memref<1x1x256xf32, #tpu.memory_space<any>>
    %c0_i32_83 = arith.constant 0 : i32
    %c23_i32 = arith.constant 23 : i32
    %c0_i32_84 = arith.constant 0 : i32
    %97 = tpu.memref_slice %arg3[%c0_i32_83, %c23_i32, %c0_i32_84] : memref<1x48x256xf32, #tpu.memory_space<vmem>> -> memref<1x1x256xf32, #tpu.memory_space<vmem>>
    %98 = tpu.memref_slice %arg4[%c7_i32_81] : memref<8x!tpu.dma_semaphore, #tpu.memory_space<semaphore_mem>> -> memref<1x!tpu.dma_semaphore, #tpu.memory_space<semaphore_mem>>
    %99 = tpu.memref_squeeze %98 : memref<1x!tpu.dma_semaphore, #tpu.memory_space<semaphore_mem>> -> memref<!tpu.dma_semaphore, #tpu.memory_space<semaphore_mem>>
    tpu.enqueue_dma source(%96 : memref<1x1x256xf32, #tpu.memory_space<any>>) target(%97 : memref<1x1x256xf32, #tpu.memory_space<vmem>>) target_semaphore(%99 : memref<!tpu.dma_semaphore, #tpu.memory_space<semaphore_mem>>)
    %c0_i32_85 = arith.constant 0 : i32
    %c36_i32 = arith.constant 36 : i32
    %100 = tpu.memref_slice %arg2[%1, %c36_i32, %3] : memref<2x48x256xf32, #tpu.memory_space<any>> -> memref<1x1x256xf32, #tpu.memory_space<any>>
    %c0_i32_86 = arith.constant 0 : i32
    %c24_i32_87 = arith.constant 24 : i32
    %c0_i32_88 = arith.constant 0 : i32
    %101 = tpu.memref_slice %arg3[%c0_i32_86, %c24_i32_87, %c0_i32_88] : memref<1x48x256xf32, #tpu.memory_space<vmem>> -> memref<1x1x256xf32, #tpu.memory_space<vmem>>
    %102 = tpu.memref_slice %arg4[%c0_i32_85] : memref<8x!tpu.dma_semaphore, #tpu.memory_space<semaphore_mem>> -> memref<1x!tpu.dma_semaphore, #tpu.memory_space<semaphore_mem>>
    %103 = tpu.memref_squeeze %102 : memref<1x!tpu.dma_semaphore, #tpu.memory_space<semaphore_mem>> -> memref<!tpu.dma_semaphore, #tpu.memory_space<semaphore_mem>>
    tpu.enqueue_dma source(%100 : memref<1x1x256xf32, #tpu.memory_space<any>>) target(%101 : memref<1x1x256xf32, #tpu.memory_space<vmem>>) target_semaphore(%103 : memref<!tpu.dma_semaphore, #tpu.memory_space<semaphore_mem>>)
    %c1_i32_89 = arith.constant 1 : i32
    %c14_i32_90 = arith.constant 14 : i32
    %104 = tpu.memref_slice %arg2[%1, %c14_i32_90, %3] : memref<2x48x256xf32, #tpu.memory_space<any>> -> memref<1x1x256xf32, #tpu.memory_space<any>>
    %c0_i32_91 = arith.constant 0 : i32
    %c25_i32_92 = arith.constant 25 : i32
    %c0_i32_93 = arith.constant 0 : i32
    %105 = tpu.memref_slice %arg3[%c0_i32_91, %c25_i32_92, %c0_i32_93] : memref<1x48x256xf32, #tpu.memory_space<vmem>> -> memref<1x1x256xf32, #tpu.memory_space<vmem>>
    %106 = tpu.memref_slice %arg4[%c1_i32_89] : memref<8x!tpu.dma_semaphore, #tpu.memory_space<semaphore_mem>> -> memref<1x!tpu.dma_semaphore, #tpu.memory_space<semaphore_mem>>
    %107 = tpu.memref_squeeze %106 : memref<1x!tpu.dma_semaphore, #tpu.memory_space<semaphore_mem>> -> memref<!tpu.dma_semaphore, #tpu.memory_space<semaphore_mem>>
    tpu.enqueue_dma source(%104 : memref<1x1x256xf32, #tpu.memory_space<any>>) target(%105 : memref<1x1x256xf32, #tpu.memory_space<vmem>>) target_semaphore(%107 : memref<!tpu.dma_semaphore, #tpu.memory_space<semaphore_mem>>)
    %c2_i32_94 = arith.constant 2 : i32
    %c39_i32 = arith.constant 39 : i32
    %108 = tpu.memref_slice %arg2[%1, %c39_i32, %3] : memref<2x48x256xf32, #tpu.memory_space<any>> -> memref<1x1x256xf32, #tpu.memory_space<any>>
    %c0_i32_95 = arith.constant 0 : i32
    %c26_i32 = arith.constant 26 : i32
    %c0_i32_96 = arith.constant 0 : i32
    %109 = tpu.memref_slice %arg3[%c0_i32_95, %c26_i32, %c0_i32_96] : memref<1x48x256xf32, #tpu.memory_space<vmem>> -> memref<1x1x256xf32, #tpu.memory_space<vmem>>
    %110 = tpu.memref_slice %arg4[%c2_i32_94] : memref<8x!tpu.dma_semaphore, #tpu.memory_space<semaphore_mem>> -> memref<1x!tpu.dma_semaphore, #tpu.memory_space<semaphore_mem>>
    %111 = tpu.memref_squeeze %110 : memref<1x!tpu.dma_semaphore, #tpu.memory_space<semaphore_mem>> -> memref<!tpu.dma_semaphore, #tpu.memory_space<semaphore_mem>>
    tpu.enqueue_dma source(%108 : memref<1x1x256xf32, #tpu.memory_space<any>>) target(%109 : memref<1x1x256xf32, #tpu.memory_space<vmem>>) target_semaphore(%111 : memref<!tpu.dma_semaphore, #tpu.memory_space<semaphore_mem>>)
    %c3_i32_97 = arith.constant 3 : i32
    %c17_i32_98 = arith.constant 17 : i32
    %112 = tpu.memref_slice %arg2[%1, %c17_i32_98, %3] : memref<2x48x256xf32, #tpu.memory_space<any>> -> memref<1x1x256xf32, #tpu.memory_space<any>>
    %c0_i32_99 = arith.constant 0 : i32
    %c27_i32_100 = arith.constant 27 : i32
    %c0_i32_101 = arith.constant 0 : i32
    %113 = tpu.memref_slice %arg3[%c0_i32_99, %c27_i32_100, %c0_i32_101] : memref<1x48x256xf32, #tpu.memory_space<vmem>> -> memref<1x1x256xf32, #tpu.memory_space<vmem>>
    %114 = tpu.memref_slice %arg4[%c3_i32_97] : memref<8x!tpu.dma_semaphore, #tpu.memory_space<semaphore_mem>> -> memref<1x!tpu.dma_semaphore, #tpu.memory_space<semaphore_mem>>
    %115 = tpu.memref_squeeze %114 : memref<1x!tpu.dma_semaphore, #tpu.memory_space<semaphore_mem>> -> memref<!tpu.dma_semaphore, #tpu.memory_space<semaphore_mem>>
    tpu.enqueue_dma source(%112 : memref<1x1x256xf32, #tpu.memory_space<any>>) target(%113 : memref<1x1x256xf32, #tpu.memory_space<vmem>>) target_semaphore(%115 : memref<!tpu.dma_semaphore, #tpu.memory_space<semaphore_mem>>)
    %c4_i32_102 = arith.constant 4 : i32
    %c42_i32 = arith.constant 42 : i32
    %116 = tpu.memref_slice %arg2[%1, %c42_i32, %3] : memref<2x48x256xf32, #tpu.memory_space<any>> -> memref<1x1x256xf32, #tpu.memory_space<any>>
    %c0_i32_103 = arith.constant 0 : i32
    %c28_i32_104 = arith.constant 28 : i32
    %c0_i32_105 = arith.constant 0 : i32
    %117 = tpu.memref_slice %arg3[%c0_i32_103, %c28_i32_104, %c0_i32_105] : memref<1x48x256xf32, #tpu.memory_space<vmem>> -> memref<1x1x256xf32, #tpu.memory_space<vmem>>
    %118 = tpu.memref_slice %arg4[%c4_i32_102] : memref<8x!tpu.dma_semaphore, #tpu.memory_space<semaphore_mem>> -> memref<1x!tpu.dma_semaphore, #tpu.memory_space<semaphore_mem>>
    %119 = tpu.memref_squeeze %118 : memref<1x!tpu.dma_semaphore, #tpu.memory_space<semaphore_mem>> -> memref<!tpu.dma_semaphore, #tpu.memory_space<semaphore_mem>>
    tpu.enqueue_dma source(%116 : memref<1x1x256xf32, #tpu.memory_space<any>>) target(%117 : memref<1x1x256xf32, #tpu.memory_space<vmem>>) target_semaphore(%119 : memref<!tpu.dma_semaphore, #tpu.memory_space<semaphore_mem>>)
    %c5_i32_106 = arith.constant 5 : i32
    %c20_i32_107 = arith.constant 20 : i32
    %120 = tpu.memref_slice %arg2[%1, %c20_i32_107, %3] : memref<2x48x256xf32, #tpu.memory_space<any>> -> memref<1x1x256xf32, #tpu.memory_space<any>>
    %c0_i32_108 = arith.constant 0 : i32
    %c29_i32 = arith.constant 29 : i32
    %c0_i32_109 = arith.constant 0 : i32
    %121 = tpu.memref_slice %arg3[%c0_i32_108, %c29_i32, %c0_i32_109] : memref<1x48x256xf32, #tpu.memory_space<vmem>> -> memref<1x1x256xf32, #tpu.memory_space<vmem>>
    %122 = tpu.memref_slice %arg4[%c5_i32_106] : memref<8x!tpu.dma_semaphore, #tpu.memory_space<semaphore_mem>> -> memref<1x!tpu.dma_semaphore, #tpu.memory_space<semaphore_mem>>
    %123 = tpu.memref_squeeze %122 : memref<1x!tpu.dma_semaphore, #tpu.memory_space<semaphore_mem>> -> memref<!tpu.dma_semaphore, #tpu.memory_space<semaphore_mem>>
    tpu.enqueue_dma source(%120 : memref<1x1x256xf32, #tpu.memory_space<any>>) target(%121 : memref<1x1x256xf32, #tpu.memory_space<vmem>>) target_semaphore(%123 : memref<!tpu.dma_semaphore, #tpu.memory_space<semaphore_mem>>)
    %c6_i32_110 = arith.constant 6 : i32
    %c45_i32 = arith.constant 45 : i32
    %124 = tpu.memref_slice %arg2[%1, %c45_i32, %3] : memref<2x48x256xf32, #tpu.memory_space<any>> -> memref<1x1x256xf32, #tpu.memory_space<any>>
    %c0_i32_111 = arith.constant 0 : i32
    %c30_i32_112 = arith.constant 30 : i32
    %c0_i32_113 = arith.constant 0 : i32
    %125 = tpu.memref_slice %arg3[%c0_i32_111, %c30_i32_112, %c0_i32_113] : memref<1x48x256xf32, #tpu.memory_space<vmem>> -> memref<1x1x256xf32, #tpu.memory_space<vmem>>
    %126 = tpu.memref_slice %arg4[%c6_i32_110] : memref<8x!tpu.dma_semaphore, #tpu.memory_space<semaphore_mem>> -> memref<1x!tpu.dma_semaphore, #tpu.memory_space<semaphore_mem>>
    %127 = tpu.memref_squeeze %126 : memref<1x!tpu.dma_semaphore, #tpu.memory_space<semaphore_mem>> -> memref<!tpu.dma_semaphore, #tpu.memory_space<semaphore_mem>>
    tpu.enqueue_dma source(%124 : memref<1x1x256xf32, #tpu.memory_space<any>>) target(%125 : memref<1x1x256xf32, #tpu.memory_space<vmem>>) target_semaphore(%127 : memref<!tpu.dma_semaphore, #tpu.memory_space<semaphore_mem>>)
    %c7_i32_114 = arith.constant 7 : i32
    %c23_i32_115 = arith.constant 23 : i32
    %128 = tpu.memref_slice %arg2[%1, %c23_i32_115, %3] : memref<2x48x256xf32, #tpu.memory_space<any>> -> memref<1x1x256xf32, #tpu.memory_space<any>>
    %c0_i32_116 = arith.constant 0 : i32
    %c31_i32_117 = arith.constant 31 : i32
    %c0_i32_118 = arith.constant 0 : i32
    %129 = tpu.memref_slice %arg3[%c0_i32_116, %c31_i32_117, %c0_i32_118] : memref<1x48x256xf32, #tpu.memory_space<vmem>> -> memref<1x1x256xf32, #tpu.memory_space<vmem>>
    %130 = tpu.memref_slice %arg4[%c7_i32_114] : memref<8x!tpu.dma_semaphore, #tpu.memory_space<semaphore_mem>> -> memref<1x!tpu.dma_semaphore, #tpu.memory_space<semaphore_mem>>
    %131 = tpu.memref_squeeze %130 : memref<1x!tpu.dma_semaphore, #tpu.memory_space<semaphore_mem>> -> memref<!tpu.dma_semaphore, #tpu.memory_space<semaphore_mem>>
    tpu.enqueue_dma source(%128 : memref<1x1x256xf32, #tpu.memory_space<any>>) target(%129 : memref<1x1x256xf32, #tpu.memory_space<vmem>>) target_semaphore(%131 : memref<!tpu.dma_semaphore, #tpu.memory_space<semaphore_mem>>)
    %c0_i32_119 = arith.constant 0 : i32
    %c1_i32_120 = arith.constant 1 : i32
    %132 = tpu.memref_slice %arg2[%1, %c1_i32_120, %3] : memref<2x48x256xf32, #tpu.memory_space<any>> -> memref<1x1x256xf32, #tpu.memory_space<any>>
    %c0_i32_121 = arith.constant 0 : i32
    %c32_i32 = arith.constant 32 : i32
    %c0_i32_122 = arith.constant 0 : i32
    %133 = tpu.memref_slice %arg3[%c0_i32_121, %c32_i32, %c0_i32_122] : memref<1x48x256xf32, #tpu.memory_space<vmem>> -> memref<1x1x256xf32, #tpu.memory_space<vmem>>
    %134 = tpu.memref_slice %arg4[%c0_i32_119] : memref<8x!tpu.dma_semaphore, #tpu.memory_space<semaphore_mem>> -> memref<1x!tpu.dma_semaphore, #tpu.memory_space<semaphore_mem>>
    %135 = tpu.memref_squeeze %134 : memref<1x!tpu.dma_semaphore, #tpu.memory_space<semaphore_mem>> -> memref<!tpu.dma_semaphore, #tpu.memory_space<semaphore_mem>>
    tpu.enqueue_dma source(%132 : memref<1x1x256xf32, #tpu.memory_space<any>>) target(%133 : memref<1x1x256xf32, #tpu.memory_space<vmem>>) target_semaphore(%135 : memref<!tpu.dma_semaphore, #tpu.memory_space<semaphore_mem>>)
    %c1_i32_123 = arith.constant 1 : i32
    %c26_i32_124 = arith.constant 26 : i32
    %136 = tpu.memref_slice %arg2[%1, %c26_i32_124, %3] : memref<2x48x256xf32, #tpu.memory_space<any>> -> memref<1x1x256xf32, #tpu.memory_space<any>>
    %c0_i32_125 = arith.constant 0 : i32
    %c33_i32_126 = arith.constant 33 : i32
    %c0_i32_127 = arith.constant 0 : i32
    %137 = tpu.memref_slice %arg3[%c0_i32_125, %c33_i32_126, %c0_i32_127] : memref<1x48x256xf32, #tpu.memory_space<vmem>> -> memref<1x1x256xf32, #tpu.memory_space<vmem>>
    %138 = tpu.memref_slice %arg4[%c1_i32_123] : memref<8x!tpu.dma_semaphore, #tpu.memory_space<semaphore_mem>> -> memref<1x!tpu.dma_semaphore, #tpu.memory_space<semaphore_mem>>
    %139 = tpu.memref_squeeze %138 : memref<1x!tpu.dma_semaphore, #tpu.memory_space<semaphore_mem>> -> memref<!tpu.dma_semaphore, #tpu.memory_space<semaphore_mem>>
    tpu.enqueue_dma source(%136 : memref<1x1x256xf32, #tpu.memory_space<any>>) target(%137 : memref<1x1x256xf32, #tpu.memory_space<vmem>>) target_semaphore(%139 : memref<!tpu.dma_semaphore, #tpu.memory_space<semaphore_mem>>)
    %c2_i32_128 = arith.constant 2 : i32
    %c4_i32_129 = arith.constant 4 : i32
    %140 = tpu.memref_slice %arg2[%1, %c4_i32_129, %3] : memref<2x48x256xf32, #tpu.memory_space<any>> -> memref<1x1x256xf32, #tpu.memory_space<any>>
    %c0_i32_130 = arith.constant 0 : i32
    %c34_i32_131 = arith.constant 34 : i32
    %c0_i32_132 = arith.constant 0 : i32
    %141 = tpu.memref_slice %arg3[%c0_i32_130, %c34_i32_131, %c0_i32_132] : memref<1x48x256xf32, #tpu.memory_space<vmem>> -> memref<1x1x256xf32, #tpu.memory_space<vmem>>
    %142 = tpu.memref_slice %arg4[%c2_i32_128] : memref<8x!tpu.dma_semaphore, #tpu.memory_space<semaphore_mem>> -> memref<1x!tpu.dma_semaphore, #tpu.memory_space<semaphore_mem>>
    %143 = tpu.memref_squeeze %142 : memref<1x!tpu.dma_semaphore, #tpu.memory_space<semaphore_mem>> -> memref<!tpu.dma_semaphore, #tpu.memory_space<semaphore_mem>>
    tpu.enqueue_dma source(%140 : memref<1x1x256xf32, #tpu.memory_space<any>>) target(%141 : memref<1x1x256xf32, #tpu.memory_space<vmem>>) target_semaphore(%143 : memref<!tpu.dma_semaphore, #tpu.memory_space<semaphore_mem>>)
    %c3_i32_133 = arith.constant 3 : i32
    %c29_i32_134 = arith.constant 29 : i32
    %144 = tpu.memref_slice %arg2[%1, %c29_i32_134, %3] : memref<2x48x256xf32, #tpu.memory_space<any>> -> memref<1x1x256xf32, #tpu.memory_space<any>>
    %c0_i32_135 = arith.constant 0 : i32
    %c35_i32 = arith.constant 35 : i32
    %c0_i32_136 = arith.constant 0 : i32
    %145 = tpu.memref_slice %arg3[%c0_i32_135, %c35_i32, %c0_i32_136] : memref<1x48x256xf32, #tpu.memory_space<vmem>> -> memref<1x1x256xf32, #tpu.memory_space<vmem>>
    %146 = tpu.memref_slice %arg4[%c3_i32_133] : memref<8x!tpu.dma_semaphore, #tpu.memory_space<semaphore_mem>> -> memref<1x!tpu.dma_semaphore, #tpu.memory_space<semaphore_mem>>
    %147 = tpu.memref_squeeze %146 : memref<1x!tpu.dma_semaphore, #tpu.memory_space<semaphore_mem>> -> memref<!tpu.dma_semaphore, #tpu.memory_space<semaphore_mem>>
    tpu.enqueue_dma source(%144 : memref<1x1x256xf32, #tpu.memory_space<any>>) target(%145 : memref<1x1x256xf32, #tpu.memory_space<vmem>>) target_semaphore(%147 : memref<!tpu.dma_semaphore, #tpu.memory_space<semaphore_mem>>)
    %c4_i32_137 = arith.constant 4 : i32
    %c7_i32_138 = arith.constant 7 : i32
    %148 = tpu.memref_slice %arg2[%1, %c7_i32_138, %3] : memref<2x48x256xf32, #tpu.memory_space<any>> -> memref<1x1x256xf32, #tpu.memory_space<any>>
    %c0_i32_139 = arith.constant 0 : i32
    %c36_i32_140 = arith.constant 36 : i32
    %c0_i32_141 = arith.constant 0 : i32
    %149 = tpu.memref_slice %arg3[%c0_i32_139, %c36_i32_140, %c0_i32_141] : memref<1x48x256xf32, #tpu.memory_space<vmem>> -> memref<1x1x256xf32, #tpu.memory_space<vmem>>
    %150 = tpu.memref_slice %arg4[%c4_i32_137] : memref<8x!tpu.dma_semaphore, #tpu.memory_space<semaphore_mem>> -> memref<1x!tpu.dma_semaphore, #tpu.memory_space<semaphore_mem>>
    %151 = tpu.memref_squeeze %150 : memref<1x!tpu.dma_semaphore, #tpu.memory_space<semaphore_mem>> -> memref<!tpu.dma_semaphore, #tpu.memory_space<semaphore_mem>>
    tpu.enqueue_dma source(%148 : memref<1x1x256xf32, #tpu.memory_space<any>>) target(%149 : memref<1x1x256xf32, #tpu.memory_space<vmem>>) target_semaphore(%151 : memref<!tpu.dma_semaphore, #tpu.memory_space<semaphore_mem>>)
    %c5_i32_142 = arith.constant 5 : i32
    %c32_i32_143 = arith.constant 32 : i32
    %152 = tpu.memref_slice %arg2[%1, %c32_i32_143, %3] : memref<2x48x256xf32, #tpu.memory_space<any>> -> memref<1x1x256xf32, #tpu.memory_space<any>>
    %c0_i32_144 = arith.constant 0 : i32
    %c37_i32_145 = arith.constant 37 : i32
    %c0_i32_146 = arith.constant 0 : i32
    %153 = tpu.memref_slice %arg3[%c0_i32_144, %c37_i32_145, %c0_i32_146] : memref<1x48x256xf32, #tpu.memory_space<vmem>> -> memref<1x1x256xf32, #tpu.memory_space<vmem>>
    %154 = tpu.memref_slice %arg4[%c5_i32_142] : memref<8x!tpu.dma_semaphore, #tpu.memory_space<semaphore_mem>> -> memref<1x!tpu.dma_semaphore, #tpu.memory_space<semaphore_mem>>
    %155 = tpu.memref_squeeze %154 : memref<1x!tpu.dma_semaphore, #tpu.memory_space<semaphore_mem>> -> memref<!tpu.dma_semaphore, #tpu.memory_space<semaphore_mem>>
    tpu.enqueue_dma source(%152 : memref<1x1x256xf32, #tpu.memory_space<any>>) target(%153 : memref<1x1x256xf32, #tpu.memory_space<vmem>>) target_semaphore(%155 : memref<!tpu.dma_semaphore, #tpu.memory_space<semaphore_mem>>)
    %c6_i32_147 = arith.constant 6 : i32
    %c10_i32_148 = arith.constant 10 : i32
    %156 = tpu.memref_slice %arg2[%1, %c10_i32_148, %3] : memref<2x48x256xf32, #tpu.memory_space<any>> -> memref<1x1x256xf32, #tpu.memory_space<any>>
    %c0_i32_149 = arith.constant 0 : i32
    %c38_i32 = arith.constant 38 : i32
    %c0_i32_150 = arith.constant 0 : i32
    %157 = tpu.memref_slice %arg3[%c0_i32_149, %c38_i32, %c0_i32_150] : memref<1x48x256xf32, #tpu.memory_space<vmem>> -> memref<1x1x256xf32, #tpu.memory_space<vmem>>
    %158 = tpu.memref_slice %arg4[%c6_i32_147] : memref<8x!tpu.dma_semaphore, #tpu.memory_space<semaphore_mem>> -> memref<1x!tpu.dma_semaphore, #tpu.memory_space<semaphore_mem>>
    %159 = tpu.memref_squeeze %158 : memref<1x!tpu.dma_semaphore, #tpu.memory_space<semaphore_mem>> -> memref<!tpu.dma_semaphore, #tpu.memory_space<semaphore_mem>>
    tpu.enqueue_dma source(%156 : memref<1x1x256xf32, #tpu.memory_space<any>>) target(%157 : memref<1x1x256xf32, #tpu.memory_space<vmem>>) target_semaphore(%159 : memref<!tpu.dma_semaphore, #tpu.memory_space<semaphore_mem>>)
    %c7_i32_151 = arith.constant 7 : i32
    %c35_i32_152 = arith.constant 35 : i32
    %160 = tpu.memref_slice %arg2[%1, %c35_i32_152, %3] : memref<2x48x256xf32, #tpu.memory_space<any>> -> memref<1x1x256xf32, #tpu.memory_space<any>>
    %c0_i32_153 = arith.constant 0 : i32
    %c39_i32_154 = arith.constant 39 : i32
    %c0_i32_155 = arith.constant 0 : i32
    %161 = tpu.memref_slice %arg3[%c0_i32_153, %c39_i32_154, %c0_i32_155] : memref<1x48x256xf32, #tpu.memory_space<vmem>> -> memref<1x1x256xf32, #tpu.memory_space<vmem>>
    %162 = tpu.memref_slice %arg4[%c7_i32_151] : memref<8x!tpu.dma_semaphore, #tpu.memory_space<semaphore_mem>> -> memref<1x!tpu.dma_semaphore, #tpu.memory_space<semaphore_mem>>
    %163 = tpu.memref_squeeze %162 : memref<1x!tpu.dma_semaphore, #tpu.memory_space<semaphore_mem>> -> memref<!tpu.dma_semaphore, #tpu.memory_space<semaphore_mem>>
    tpu.enqueue_dma source(%160 : memref<1x1x256xf32, #tpu.memory_space<any>>) target(%161 : memref<1x1x256xf32, #tpu.memory_space<vmem>>) target_semaphore(%163 : memref<!tpu.dma_semaphore, #tpu.memory_space<semaphore_mem>>)
    %c0_i32_156 = arith.constant 0 : i32
    %c13_i32_157 = arith.constant 13 : i32
    %164 = tpu.memref_slice %arg2[%1, %c13_i32_157, %3] : memref<2x48x256xf32, #tpu.memory_space<any>> -> memref<1x1x256xf32, #tpu.memory_space<any>>
    %c0_i32_158 = arith.constant 0 : i32
    %c40_i32_159 = arith.constant 40 : i32
    %c0_i32_160 = arith.constant 0 : i32
    %165 = tpu.memref_slice %arg3[%c0_i32_158, %c40_i32_159, %c0_i32_160] : memref<1x48x256xf32, #tpu.memory_space<vmem>> -> memref<1x1x256xf32, #tpu.memory_space<vmem>>
    %166 = tpu.memref_slice %arg4[%c0_i32_156] : memref<8x!tpu.dma_semaphore, #tpu.memory_space<semaphore_mem>> -> memref<1x!tpu.dma_semaphore, #tpu.memory_space<semaphore_mem>>
    %167 = tpu.memref_squeeze %166 : memref<1x!tpu.dma_semaphore, #tpu.memory_space<semaphore_mem>> -> memref<!tpu.dma_semaphore, #tpu.memory_space<semaphore_mem>>
    tpu.enqueue_dma source(%164 : memref<1x1x256xf32, #tpu.memory_space<any>>) target(%165 : memref<1x1x256xf32, #tpu.memory_space<vmem>>) target_semaphore(%167 : memref<!tpu.dma_semaphore, #tpu.memory_space<semaphore_mem>>)
    %c1_i32_161 = arith.constant 1 : i32
    %c38_i32_162 = arith.constant 38 : i32
    %168 = tpu.memref_slice %arg2[%1, %c38_i32_162, %3] : memref<2x48x256xf32, #tpu.memory_space<any>> -> memref<1x1x256xf32, #tpu.memory_space<any>>
    %c0_i32_163 = arith.constant 0 : i32
    %c41_i32 = arith.constant 41 : i32
    %c0_i32_164 = arith.constant 0 : i32
    %169 = tpu.memref_slice %arg3[%c0_i32_163, %c41_i32, %c0_i32_164] : memref<1x48x256xf32, #tpu.memory_space<vmem>> -> memref<1x1x256xf32, #tpu.memory_space<vmem>>
    %170 = tpu.memref_slice %arg4[%c1_i32_161] : memref<8x!tpu.dma_semaphore, #tpu.memory_space<semaphore_mem>> -> memref<1x!tpu.dma_semaphore, #tpu.memory_space<semaphore_mem>>
    %171 = tpu.memref_squeeze %170 : memref<1x!tpu.dma_semaphore, #tpu.memory_space<semaphore_mem>> -> memref<!tpu.dma_semaphore, #tpu.memory_space<semaphore_mem>>
    tpu.enqueue_dma source(%168 : memref<1x1x256xf32, #tpu.memory_space<any>>) target(%169 : memref<1x1x256xf32, #tpu.memory_space<vmem>>) target_semaphore(%171 : memref<!tpu.dma_semaphore, #tpu.memory_space<semaphore_mem>>)
    %c2_i32_165 = arith.constant 2 : i32
    %c16_i32_166 = arith.constant 16 : i32
    %172 = tpu.memref_slice %arg2[%1, %c16_i32_166, %3] : memref<2x48x256xf32, #tpu.memory_space<any>> -> memref<1x1x256xf32, #tpu.memory_space<any>>
    %c0_i32_167 = arith.constant 0 : i32
    %c42_i32_168 = arith.constant 42 : i32
    %c0_i32_169 = arith.constant 0 : i32
    %173 = tpu.memref_slice %arg3[%c0_i32_167, %c42_i32_168, %c0_i32_169] : memref<1x48x256xf32, #tpu.memory_space<vmem>> -> memref<1x1x256xf32, #tpu.memory_space<vmem>>
    %174 = tpu.memref_slice %arg4[%c2_i32_165] : memref<8x!tpu.dma_semaphore, #tpu.memory_space<semaphore_mem>> -> memref<1x!tpu.dma_semaphore, #tpu.memory_space<semaphore_mem>>
    %175 = tpu.memref_squeeze %174 : memref<1x!tpu.dma_semaphore, #tpu.memory_space<semaphore_mem>> -> memref<!tpu.dma_semaphore, #tpu.memory_space<semaphore_mem>>
    tpu.enqueue_dma source(%172 : memref<1x1x256xf32, #tpu.memory_space<any>>) target(%173 : memref<1x1x256xf32, #tpu.memory_space<vmem>>) target_semaphore(%175 : memref<!tpu.dma_semaphore, #tpu.memory_space<semaphore_mem>>)
    %c3_i32_170 = arith.constant 3 : i32
    %c41_i32_171 = arith.constant 41 : i32
    %176 = tpu.memref_slice %arg2[%1, %c41_i32_171, %3] : memref<2x48x256xf32, #tpu.memory_space<any>> -> memref<1x1x256xf32, #tpu.memory_space<any>>
    %c0_i32_172 = arith.constant 0 : i32
    %c43_i32_173 = arith.constant 43 : i32
    %c0_i32_174 = arith.constant 0 : i32
    %177 = tpu.memref_slice %arg3[%c0_i32_172, %c43_i32_173, %c0_i32_174] : memref<1x48x256xf32, #tpu.memory_space<vmem>> -> memref<1x1x256xf32, #tpu.memory_space<vmem>>
    %178 = tpu.memref_slice %arg4[%c3_i32_170] : memref<8x!tpu.dma_semaphore, #tpu.memory_space<semaphore_mem>> -> memref<1x!tpu.dma_semaphore, #tpu.memory_space<semaphore_mem>>
    %179 = tpu.memref_squeeze %178 : memref<1x!tpu.dma_semaphore, #tpu.memory_space<semaphore_mem>> -> memref<!tpu.dma_semaphore, #tpu.memory_space<semaphore_mem>>
    tpu.enqueue_dma source(%176 : memref<1x1x256xf32, #tpu.memory_space<any>>) target(%177 : memref<1x1x256xf32, #tpu.memory_space<vmem>>) target_semaphore(%179 : memref<!tpu.dma_semaphore, #tpu.memory_space<semaphore_mem>>)
    %c4_i32_175 = arith.constant 4 : i32
    %c19_i32_176 = arith.constant 19 : i32
    %180 = tpu.memref_slice %arg2[%1, %c19_i32_176, %3] : memref<2x48x256xf32, #tpu.memory_space<any>> -> memref<1x1x256xf32, #tpu.memory_space<any>>
    %c0_i32_177 = arith.constant 0 : i32
    %c44_i32 = arith.constant 44 : i32
    %c0_i32_178 = arith.constant 0 : i32
    %181 = tpu.memref_slice %arg3[%c0_i32_177, %c44_i32, %c0_i32_178] : memref<1x48x256xf32, #tpu.memory_space<vmem>> -> memref<1x1x256xf32, #tpu.memory_space<vmem>>
    %182 = tpu.memref_slice %arg4[%c4_i32_175] : memref<8x!tpu.dma_semaphore, #tpu.memory_space<semaphore_mem>> -> memref<1x!tpu.dma_semaphore, #tpu.memory_space<semaphore_mem>>
    %183 = tpu.memref_squeeze %182 : memref<1x!tpu.dma_semaphore, #tpu.memory_space<semaphore_mem>> -> memref<!tpu.dma_semaphore, #tpu.memory_space<semaphore_mem>>
    tpu.enqueue_dma source(%180 : memref<1x1x256xf32, #tpu.memory_space<any>>) target(%181 : memref<1x1x256xf32, #tpu.memory_space<vmem>>) target_semaphore(%183 : memref<!tpu.dma_semaphore, #tpu.memory_space<semaphore_mem>>)
    %c5_i32_179 = arith.constant 5 : i32
    %c44_i32_180 = arith.constant 44 : i32
    %184 = tpu.memref_slice %arg2[%1, %c44_i32_180, %3] : memref<2x48x256xf32, #tpu.memory_space<any>> -> memref<1x1x256xf32, #tpu.memory_space<any>>
    %c0_i32_181 = arith.constant 0 : i32
    %c45_i32_182 = arith.constant 45 : i32
    %c0_i32_183 = arith.constant 0 : i32
    %185 = tpu.memref_slice %arg3[%c0_i32_181, %c45_i32_182, %c0_i32_183] : memref<1x48x256xf32, #tpu.memory_space<vmem>> -> memref<1x1x256xf32, #tpu.memory_space<vmem>>
    %186 = tpu.memref_slice %arg4[%c5_i32_179] : memref<8x!tpu.dma_semaphore, #tpu.memory_space<semaphore_mem>> -> memref<1x!tpu.dma_semaphore, #tpu.memory_space<semaphore_mem>>
    %187 = tpu.memref_squeeze %186 : memref<1x!tpu.dma_semaphore, #tpu.memory_space<semaphore_mem>> -> memref<!tpu.dma_semaphore, #tpu.memory_space<semaphore_mem>>
    tpu.enqueue_dma source(%184 : memref<1x1x256xf32, #tpu.memory_space<any>>) target(%185 : memref<1x1x256xf32, #tpu.memory_space<vmem>>) target_semaphore(%187 : memref<!tpu.dma_semaphore, #tpu.memory_space<semaphore_mem>>)
    %c6_i32_184 = arith.constant 6 : i32
    %c22_i32_185 = arith.constant 22 : i32
    %188 = tpu.memref_slice %arg2[%1, %c22_i32_185, %3] : memref<2x48x256xf32, #tpu.memory_space<any>> -> memref<1x1x256xf32, #tpu.memory_space<any>>
    %c0_i32_186 = arith.constant 0 : i32
    %c46_i32_187 = arith.constant 46 : i32
    %c0_i32_188 = arith.constant 0 : i32
    %189 = tpu.memref_slice %arg3[%c0_i32_186, %c46_i32_187, %c0_i32_188] : memref<1x48x256xf32, #tpu.memory_space<vmem>> -> memref<1x1x256xf32, #tpu.memory_space<vmem>>
    %190 = tpu.memref_slice %arg4[%c6_i32_184] : memref<8x!tpu.dma_semaphore, #tpu.memory_space<semaphore_mem>> -> memref<1x!tpu.dma_semaphore, #tpu.memory_space<semaphore_mem>>
    %191 = tpu.memref_squeeze %190 : memref<1x!tpu.dma_semaphore, #tpu.memory_space<semaphore_mem>> -> memref<!tpu.dma_semaphore, #tpu.memory_space<semaphore_mem>>
    tpu.enqueue_dma source(%188 : memref<1x1x256xf32, #tpu.memory_space<any>>) target(%189 : memref<1x1x256xf32, #tpu.memory_space<vmem>>) target_semaphore(%191 : memref<!tpu.dma_semaphore, #tpu.memory_space<semaphore_mem>>)
    %c7_i32_189 = arith.constant 7 : i32
    %c47_i32 = arith.constant 47 : i32
    %192 = tpu.memref_slice %arg2[%1, %c47_i32, %3] : memref<2x48x256xf32, #tpu.memory_space<any>> -> memref<1x1x256xf32, #tpu.memory_space<any>>
    %c0_i32_190 = arith.constant 0 : i32
    %c47_i32_191 = arith.constant 47 : i32
    %c0_i32_192 = arith.constant 0 : i32
    %193 = tpu.memref_slice %arg3[%c0_i32_190, %c47_i32_191, %c0_i32_192] : memref<1x48x256xf32, #tpu.memory_space<vmem>> -> memref<1x1x256xf32, #tpu.memory_space<vmem>>
    %194 = tpu.memref_slice %arg4[%c7_i32_189] : memref<8x!tpu.dma_semaphore, #tpu.memory_space<semaphore_mem>> -> memref<1x!tpu.dma_semaphore, #tpu.memory_space<semaphore_mem>>
    %195 = tpu.memref_squeeze %194 : memref<1x!tpu.dma_semaphore, #tpu.memory_space<semaphore_mem>> -> memref<!tpu.dma_semaphore, #tpu.memory_space<semaphore_mem>>
    tpu.enqueue_dma source(%192 : memref<1x1x256xf32, #tpu.memory_space<any>>) target(%193 : memref<1x1x256xf32, #tpu.memory_space<vmem>>) target_semaphore(%195 : memref<!tpu.dma_semaphore, #tpu.memory_space<semaphore_mem>>)
    %c0_i32_193 = arith.constant 0 : i32
    %c0_i32_194 = arith.constant 0 : i32
    %196 = tpu.memref_slice %arg2[%1, %c0_i32_194, %3] : memref<2x48x256xf32, #tpu.memory_space<any>> -> memref<1x1x256xf32, #tpu.memory_space<any>>
    %c0_i32_195 = arith.constant 0 : i32
    %c0_i32_196 = arith.constant 0 : i32
    %c0_i32_197 = arith.constant 0 : i32
    %197 = tpu.memref_slice %arg3[%c0_i32_195, %c0_i32_196, %c0_i32_197] : memref<1x48x256xf32, #tpu.memory_space<vmem>> -> memref<1x1x256xf32, #tpu.memory_space<vmem>>
    %198 = tpu.memref_slice %arg4[%c0_i32_193] : memref<8x!tpu.dma_semaphore, #tpu.memory_space<semaphore_mem>> -> memref<1x!tpu.dma_semaphore, #tpu.memory_space<semaphore_mem>>
    %199 = tpu.memref_squeeze %198 : memref<1x!tpu.dma_semaphore, #tpu.memory_space<semaphore_mem>> -> memref<!tpu.dma_semaphore, #tpu.memory_space<semaphore_mem>>
    tpu.wait_dma2 semaphore(%199 : memref<!tpu.dma_semaphore, #tpu.memory_space<semaphore_mem>>) src(%196 : memref<1x1x256xf32, #tpu.memory_space<any>>) dst(%197 : memref<1x1x256xf32, #tpu.memory_space<vmem>>)
    %c1_i32_198 = arith.constant 1 : i32
    %c25_i32_199 = arith.constant 25 : i32
    %200 = tpu.memref_slice %arg2[%1, %c25_i32_199, %3] : memref<2x48x256xf32, #tpu.memory_space<any>> -> memref<1x1x256xf32, #tpu.memory_space<any>>
    %c0_i32_200 = arith.constant 0 : i32
    %c1_i32_201 = arith.constant 1 : i32
    %c0_i32_202 = arith.constant 0 : i32
    %201 = tpu.memref_slice %arg3[%c0_i32_200, %c1_i32_201, %c0_i32_202] : memref<1x48x256xf32, #tpu.memory_space<vmem>> -> memref<1x1x256xf32, #tpu.memory_space<vmem>>
    %202 = tpu.memref_slice %arg4[%c1_i32_198] : memref<8x!tpu.dma_semaphore, #tpu.memory_space<semaphore_mem>> -> memref<1x!tpu.dma_semaphore, #tpu.memory_space<semaphore_mem>>
    %203 = tpu.memref_squeeze %202 : memref<1x!tpu.dma_semaphore, #tpu.memory_space<semaphore_mem>> -> memref<!tpu.dma_semaphore, #tpu.memory_space<semaphore_mem>>
    tpu.wait_dma2 semaphore(%203 : memref<!tpu.dma_semaphore, #tpu.memory_space<semaphore_mem>>) src(%200 : memref<1x1x256xf32, #tpu.memory_space<any>>) dst(%201 : memref<1x1x256xf32, #tpu.memory_space<vmem>>)
    %c2_i32_203 = arith.constant 2 : i32
    %c3_i32_204 = arith.constant 3 : i32
    %204 = tpu.memref_slice %arg2[%1, %c3_i32_204, %3] : memref<2x48x256xf32, #tpu.memory_space<any>> -> memref<1x1x256xf32, #tpu.memory_space<any>>
    %c0_i32_205 = arith.constant 0 : i32
    %c2_i32_206 = arith.constant 2 : i32
    %c0_i32_207 = arith.constant 0 : i32
    %205 = tpu.memref_slice %arg3[%c0_i32_205, %c2_i32_206, %c0_i32_207] : memref<1x48x256xf32, #tpu.memory_space<vmem>> -> memref<1x1x256xf32, #tpu.memory_space<vmem>>
    %206 = tpu.memref_slice %arg4[%c2_i32_203] : memref<8x!tpu.dma_semaphore, #tpu.memory_space<semaphore_mem>> -> memref<1x!tpu.dma_semaphore, #tpu.memory_space<semaphore_mem>>
    %207 = tpu.memref_squeeze %206 : memref<1x!tpu.dma_semaphore, #tpu.memory_space<semaphore_mem>> -> memref<!tpu.dma_semaphore, #tpu.memory_space<semaphore_mem>>
    tpu.wait_dma2 semaphore(%207 : memref<!tpu.dma_semaphore, #tpu.memory_space<semaphore_mem>>) src(%204 : memref<1x1x256xf32, #tpu.memory_space<any>>) dst(%205 : memref<1x1x256xf32, #tpu.memory_space<vmem>>)
    %c3_i32_208 = arith.constant 3 : i32
    %c28_i32_209 = arith.constant 28 : i32
    %208 = tpu.memref_slice %arg2[%1, %c28_i32_209, %3] : memref<2x48x256xf32, #tpu.memory_space<any>> -> memref<1x1x256xf32, #tpu.memory_space<any>>
    %c0_i32_210 = arith.constant 0 : i32
    %c3_i32_211 = arith.constant 3 : i32
    %c0_i32_212 = arith.constant 0 : i32
    %209 = tpu.memref_slice %arg3[%c0_i32_210, %c3_i32_211, %c0_i32_212] : memref<1x48x256xf32, #tpu.memory_space<vmem>> -> memref<1x1x256xf32, #tpu.memory_space<vmem>>
    %210 = tpu.memref_slice %arg4[%c3_i32_208] : memref<8x!tpu.dma_semaphore, #tpu.memory_space<semaphore_mem>> -> memref<1x!tpu.dma_semaphore, #tpu.memory_space<semaphore_mem>>
    %211 = tpu.memref_squeeze %210 : memref<1x!tpu.dma_semaphore, #tpu.memory_space<semaphore_mem>> -> memref<!tpu.dma_semaphore, #tpu.memory_space<semaphore_mem>>
    tpu.wait_dma2 semaphore(%211 : memref<!tpu.dma_semaphore, #tpu.memory_space<semaphore_mem>>) src(%208 : memref<1x1x256xf32, #tpu.memory_space<any>>) dst(%209 : memref<1x1x256xf32, #tpu.memory_space<vmem>>)
    %c4_i32_213 = arith.constant 4 : i32
    %c6_i32_214 = arith.constant 6 : i32
    %212 = tpu.memref_slice %arg2[%1, %c6_i32_214, %3] : memref<2x48x256xf32, #tpu.memory_space<any>> -> memref<1x1x256xf32, #tpu.memory_space<any>>
    %c0_i32_215 = arith.constant 0 : i32
    %c4_i32_216 = arith.constant 4 : i32
    %c0_i32_217 = arith.constant 0 : i32
    %213 = tpu.memref_slice %arg3[%c0_i32_215, %c4_i32_216, %c0_i32_217] : memref<1x48x256xf32, #tpu.memory_space<vmem>> -> memref<1x1x256xf32, #tpu.memory_space<vmem>>
    %214 = tpu.memref_slice %arg4[%c4_i32_213] : memref<8x!tpu.dma_semaphore, #tpu.memory_space<semaphore_mem>> -> memref<1x!tpu.dma_semaphore, #tpu.memory_space<semaphore_mem>>
    %215 = tpu.memref_squeeze %214 : memref<1x!tpu.dma_semaphore, #tpu.memory_space<semaphore_mem>> -> memref<!tpu.dma_semaphore, #tpu.memory_space<semaphore_mem>>
    tpu.wait_dma2 semaphore(%215 : memref<!tpu.dma_semaphore, #tpu.memory_space<semaphore_mem>>) src(%212 : memref<1x1x256xf32, #tpu.memory_space<any>>) dst(%213 : memref<1x1x256xf32, #tpu.memory_space<vmem>>)
    %c5_i32_218 = arith.constant 5 : i32
    %c31_i32_219 = arith.constant 31 : i32
    %216 = tpu.memref_slice %arg2[%1, %c31_i32_219, %3] : memref<2x48x256xf32, #tpu.memory_space<any>> -> memref<1x1x256xf32, #tpu.memory_space<any>>
    %c0_i32_220 = arith.constant 0 : i32
    %c5_i32_221 = arith.constant 5 : i32
    %c0_i32_222 = arith.constant 0 : i32
    %217 = tpu.memref_slice %arg3[%c0_i32_220, %c5_i32_221, %c0_i32_222] : memref<1x48x256xf32, #tpu.memory_space<vmem>> -> memref<1x1x256xf32, #tpu.memory_space<vmem>>
    %218 = tpu.memref_slice %arg4[%c5_i32_218] : memref<8x!tpu.dma_semaphore, #tpu.memory_space<semaphore_mem>> -> memref<1x!tpu.dma_semaphore, #tpu.memory_space<semaphore_mem>>
    %219 = tpu.memref_squeeze %218 : memref<1x!tpu.dma_semaphore, #tpu.memory_space<semaphore_mem>> -> memref<!tpu.dma_semaphore, #tpu.memory_space<semaphore_mem>>
    tpu.wait_dma2 semaphore(%219 : memref<!tpu.dma_semaphore, #tpu.memory_space<semaphore_mem>>) src(%216 : memref<1x1x256xf32, #tpu.memory_space<any>>) dst(%217 : memref<1x1x256xf32, #tpu.memory_space<vmem>>)
    %c6_i32_223 = arith.constant 6 : i32
    %c9_i32_224 = arith.constant 9 : i32
    %220 = tpu.memref_slice %arg2[%1, %c9_i32_224, %3] : memref<2x48x256xf32, #tpu.memory_space<any>> -> memref<1x1x256xf32, #tpu.memory_space<any>>
    %c0_i32_225 = arith.constant 0 : i32
    %c6_i32_226 = arith.constant 6 : i32
    %c0_i32_227 = arith.constant 0 : i32
    %221 = tpu.memref_slice %arg3[%c0_i32_225, %c6_i32_226, %c0_i32_227] : memref<1x48x256xf32, #tpu.memory_space<vmem>> -> memref<1x1x256xf32, #tpu.memory_space<vmem>>
    %222 = tpu.memref_slice %arg4[%c6_i32_223] : memref<8x!tpu.dma_semaphore, #tpu.memory_space<semaphore_mem>> -> memref<1x!tpu.dma_semaphore, #tpu.memory_space<semaphore_mem>>
    %223 = tpu.memref_squeeze %222 : memref<1x!tpu.dma_semaphore, #tpu.memory_space<semaphore_mem>> -> memref<!tpu.dma_semaphore, #tpu.memory_space<semaphore_mem>>
    tpu.wait_dma2 semaphore(%223 : memref<!tpu.dma_semaphore, #tpu.memory_space<semaphore_mem>>) src(%220 : memref<1x1x256xf32, #tpu.memory_space<any>>) dst(%221 : memref<1x1x256xf32, #tpu.memory_space<vmem>>)
    %c7_i32_228 = arith.constant 7 : i32
    %c34_i32_229 = arith.constant 34 : i32
    %224 = tpu.memref_slice %arg2[%1, %c34_i32_229, %3] : memref<2x48x256xf32, #tpu.memory_space<any>> -> memref<1x1x256xf32, #tpu.memory_space<any>>
    %c0_i32_230 = arith.constant 0 : i32
    %c7_i32_231 = arith.constant 7 : i32
    %c0_i32_232 = arith.constant 0 : i32
    %225 = tpu.memref_slice %arg3[%c0_i32_230, %c7_i32_231, %c0_i32_232] : memref<1x48x256xf32, #tpu.memory_space<vmem>> -> memref<1x1x256xf32, #tpu.memory_space<vmem>>
    %226 = tpu.memref_slice %arg4[%c7_i32_228] : memref<8x!tpu.dma_semaphore, #tpu.memory_space<semaphore_mem>> -> memref<1x!tpu.dma_semaphore, #tpu.memory_space<semaphore_mem>>
    %227 = tpu.memref_squeeze %226 : memref<1x!tpu.dma_semaphore, #tpu.memory_space<semaphore_mem>> -> memref<!tpu.dma_semaphore, #tpu.memory_space<semaphore_mem>>
    tpu.wait_dma2 semaphore(%227 : memref<!tpu.dma_semaphore, #tpu.memory_space<semaphore_mem>>) src(%224 : memref<1x1x256xf32, #tpu.memory_space<any>>) dst(%225 : memref<1x1x256xf32, #tpu.memory_space<vmem>>)
    %c0_i32_233 = arith.constant 0 : i32
    %c12_i32_234 = arith.constant 12 : i32
    %228 = tpu.memref_slice %arg2[%1, %c12_i32_234, %3] : memref<2x48x256xf32, #tpu.memory_space<any>> -> memref<1x1x256xf32, #tpu.memory_space<any>>
    %c0_i32_235 = arith.constant 0 : i32
    %c8_i32_236 = arith.constant 8 : i32
    %c0_i32_237 = arith.constant 0 : i32
    %229 = tpu.memref_slice %arg3[%c0_i32_235, %c8_i32_236, %c0_i32_237] : memref<1x48x256xf32, #tpu.memory_space<vmem>> -> memref<1x1x256xf32, #tpu.memory_space<vmem>>
    %230 = tpu.memref_slice %arg4[%c0_i32_233] : memref<8x!tpu.dma_semaphore, #tpu.memory_space<semaphore_mem>> -> memref<1x!tpu.dma_semaphore, #tpu.memory_space<semaphore_mem>>
    %231 = tpu.memref_squeeze %230 : memref<1x!tpu.dma_semaphore, #tpu.memory_space<semaphore_mem>> -> memref<!tpu.dma_semaphore, #tpu.memory_space<semaphore_mem>>
    tpu.wait_dma2 semaphore(%231 : memref<!tpu.dma_semaphore, #tpu.memory_space<semaphore_mem>>) src(%228 : memref<1x1x256xf32, #tpu.memory_space<any>>) dst(%229 : memref<1x1x256xf32, #tpu.memory_space<vmem>>)
    %c1_i32_238 = arith.constant 1 : i32
    %c37_i32_239 = arith.constant 37 : i32
    %232 = tpu.memref_slice %arg2[%1, %c37_i32_239, %3] : memref<2x48x256xf32, #tpu.memory_space<any>> -> memref<1x1x256xf32, #tpu.memory_space<any>>
    %c0_i32_240 = arith.constant 0 : i32
    %c9_i32_241 = arith.constant 9 : i32
    %c0_i32_242 = arith.constant 0 : i32
    %233 = tpu.memref_slice %arg3[%c0_i32_240, %c9_i32_241, %c0_i32_242] : memref<1x48x256xf32, #tpu.memory_space<vmem>> -> memref<1x1x256xf32, #tpu.memory_space<vmem>>
    %234 = tpu.memref_slice %arg4[%c1_i32_238] : memref<8x!tpu.dma_semaphore, #tpu.memory_space<semaphore_mem>> -> memref<1x!tpu.dma_semaphore, #tpu.memory_space<semaphore_mem>>
    %235 = tpu.memref_squeeze %234 : memref<1x!tpu.dma_semaphore, #tpu.memory_space<semaphore_mem>> -> memref<!tpu.dma_semaphore, #tpu.memory_space<semaphore_mem>>
    tpu.wait_dma2 semaphore(%235 : memref<!tpu.dma_semaphore, #tpu.memory_space<semaphore_mem>>) src(%232 : memref<1x1x256xf32, #tpu.memory_space<any>>) dst(%233 : memref<1x1x256xf32, #tpu.memory_space<vmem>>)
    %c2_i32_243 = arith.constant 2 : i32
    %c15_i32_244 = arith.constant 15 : i32
    %236 = tpu.memref_slice %arg2[%1, %c15_i32_244, %3] : memref<2x48x256xf32, #tpu.memory_space<any>> -> memref<1x1x256xf32, #tpu.memory_space<any>>
    %c0_i32_245 = arith.constant 0 : i32
    %c10_i32_246 = arith.constant 10 : i32
    %c0_i32_247 = arith.constant 0 : i32
    %237 = tpu.memref_slice %arg3[%c0_i32_245, %c10_i32_246, %c0_i32_247] : memref<1x48x256xf32, #tpu.memory_space<vmem>> -> memref<1x1x256xf32, #tpu.memory_space<vmem>>
    %238 = tpu.memref_slice %arg4[%c2_i32_243] : memref<8x!tpu.dma_semaphore, #tpu.memory_space<semaphore_mem>> -> memref<1x!tpu.dma_semaphore, #tpu.memory_space<semaphore_mem>>
    %239 = tpu.memref_squeeze %238 : memref<1x!tpu.dma_semaphore, #tpu.memory_space<semaphore_mem>> -> memref<!tpu.dma_semaphore, #tpu.memory_space<semaphore_mem>>
    tpu.wait_dma2 semaphore(%239 : memref<!tpu.dma_semaphore, #tpu.memory_space<semaphore_mem>>) src(%236 : memref<1x1x256xf32, #tpu.memory_space<any>>) dst(%237 : memref<1x1x256xf32, #tpu.memory_space<vmem>>)
    %c3_i32_248 = arith.constant 3 : i32
    %c40_i32_249 = arith.constant 40 : i32
    %240 = tpu.memref_slice %arg2[%1, %c40_i32_249, %3] : memref<2x48x256xf32, #tpu.memory_space<any>> -> memref<1x1x256xf32, #tpu.memory_space<any>>
    %c0_i32_250 = arith.constant 0 : i32
    %c11_i32_251 = arith.constant 11 : i32
    %c0_i32_252 = arith.constant 0 : i32
    %241 = tpu.memref_slice %arg3[%c0_i32_250, %c11_i32_251, %c0_i32_252] : memref<1x48x256xf32, #tpu.memory_space<vmem>> -> memref<1x1x256xf32, #tpu.memory_space<vmem>>
    %242 = tpu.memref_slice %arg4[%c3_i32_248] : memref<8x!tpu.dma_semaphore, #tpu.memory_space<semaphore_mem>> -> memref<1x!tpu.dma_semaphore, #tpu.memory_space<semaphore_mem>>
    %243 = tpu.memref_squeeze %242 : memref<1x!tpu.dma_semaphore, #tpu.memory_space<semaphore_mem>> -> memref<!tpu.dma_semaphore, #tpu.memory_space<semaphore_mem>>
    tpu.wait_dma2 semaphore(%243 : memref<!tpu.dma_semaphore, #tpu.memory_space<semaphore_mem>>) src(%240 : memref<1x1x256xf32, #tpu.memory_space<any>>) dst(%241 : memref<1x1x256xf32, #tpu.memory_space<vmem>>)
    %c4_i32_253 = arith.constant 4 : i32
    %c18_i32_254 = arith.constant 18 : i32
    %244 = tpu.memref_slice %arg2[%1, %c18_i32_254, %3] : memref<2x48x256xf32, #tpu.memory_space<any>> -> memref<1x1x256xf32, #tpu.memory_space<any>>
    %c0_i32_255 = arith.constant 0 : i32
    %c12_i32_256 = arith.constant 12 : i32
    %c0_i32_257 = arith.constant 0 : i32
    %245 = tpu.memref_slice %arg3[%c0_i32_255, %c12_i32_256, %c0_i32_257] : memref<1x48x256xf32, #tpu.memory_space<vmem>> -> memref<1x1x256xf32, #tpu.memory_space<vmem>>
    %246 = tpu.memref_slice %arg4[%c4_i32_253] : memref<8x!tpu.dma_semaphore, #tpu.memory_space<semaphore_mem>> -> memref<1x!tpu.dma_semaphore, #tpu.memory_space<semaphore_mem>>
    %247 = tpu.memref_squeeze %246 : memref<1x!tpu.dma_semaphore, #tpu.memory_space<semaphore_mem>> -> memref<!tpu.dma_semaphore, #tpu.memory_space<semaphore_mem>>
    tpu.wait_dma2 semaphore(%247 : memref<!tpu.dma_semaphore, #tpu.memory_space<semaphore_mem>>) src(%244 : memref<1x1x256xf32, #tpu.memory_space<any>>) dst(%245 : memref<1x1x256xf32, #tpu.memory_space<vmem>>)
    %c5_i32_258 = arith.constant 5 : i32
    %c43_i32_259 = arith.constant 43 : i32
    %248 = tpu.memref_slice %arg2[%1, %c43_i32_259, %3] : memref<2x48x256xf32, #tpu.memory_space<any>> -> memref<1x1x256xf32, #tpu.memory_space<any>>
    %c0_i32_260 = arith.constant 0 : i32
    %c13_i32_261 = arith.constant 13 : i32
    %c0_i32_262 = arith.constant 0 : i32
    %249 = tpu.memref_slice %arg3[%c0_i32_260, %c13_i32_261, %c0_i32_262] : memref<1x48x256xf32, #tpu.memory_space<vmem>> -> memref<1x1x256xf32, #tpu.memory_space<vmem>>
    %250 = tpu.memref_slice %arg4[%c5_i32_258] : memref<8x!tpu.dma_semaphore, #tpu.memory_space<semaphore_mem>> -> memref<1x!tpu.dma_semaphore, #tpu.memory_space<semaphore_mem>>
    %251 = tpu.memref_squeeze %250 : memref<1x!tpu.dma_semaphore, #tpu.memory_space<semaphore_mem>> -> memref<!tpu.dma_semaphore, #tpu.memory_space<semaphore_mem>>
    tpu.wait_dma2 semaphore(%251 : memref<!tpu.dma_semaphore, #tpu.memory_space<semaphore_mem>>) src(%248 : memref<1x1x256xf32, #tpu.memory_space<any>>) dst(%249 : memref<1x1x256xf32, #tpu.memory_space<vmem>>)
    %c6_i32_263 = arith.constant 6 : i32
    %c21_i32_264 = arith.constant 21 : i32
    %252 = tpu.memref_slice %arg2[%1, %c21_i32_264, %3] : memref<2x48x256xf32, #tpu.memory_space<any>> -> memref<1x1x256xf32, #tpu.memory_space<any>>
    %c0_i32_265 = arith.constant 0 : i32
    %c14_i32_266 = arith.constant 14 : i32
    %c0_i32_267 = arith.constant 0 : i32
    %253 = tpu.memref_slice %arg3[%c0_i32_265, %c14_i32_266, %c0_i32_267] : memref<1x48x256xf32, #tpu.memory_space<vmem>> -> memref<1x1x256xf32, #tpu.memory_space<vmem>>
    %254 = tpu.memref_slice %arg4[%c6_i32_263] : memref<8x!tpu.dma_semaphore, #tpu.memory_space<semaphore_mem>> -> memref<1x!tpu.dma_semaphore, #tpu.memory_space<semaphore_mem>>
    %255 = tpu.memref_squeeze %254 : memref<1x!tpu.dma_semaphore, #tpu.memory_space<semaphore_mem>> -> memref<!tpu.dma_semaphore, #tpu.memory_space<semaphore_mem>>
    tpu.wait_dma2 semaphore(%255 : memref<!tpu.dma_semaphore, #tpu.memory_space<semaphore_mem>>) src(%252 : memref<1x1x256xf32, #tpu.memory_space<any>>) dst(%253 : memref<1x1x256xf32, #tpu.memory_space<vmem>>)
    %c7_i32_268 = arith.constant 7 : i32
    %c46_i32_269 = arith.constant 46 : i32
    %256 = tpu.memref_slice %arg2[%1, %c46_i32_269, %3] : memref<2x48x256xf32, #tpu.memory_space<any>> -> memref<1x1x256xf32, #tpu.memory_space<any>>
    %c0_i32_270 = arith.constant 0 : i32
    %c15_i32_271 = arith.constant 15 : i32
    %c0_i32_272 = arith.constant 0 : i32
    %257 = tpu.memref_slice %arg3[%c0_i32_270, %c15_i32_271, %c0_i32_272] : memref<1x48x256xf32, #tpu.memory_space<vmem>> -> memref<1x1x256xf32, #tpu.memory_space<vmem>>
    %258 = tpu.memref_slice %arg4[%c7_i32_268] : memref<8x!tpu.dma_semaphore, #tpu.memory_space<semaphore_mem>> -> memref<1x!tpu.dma_semaphore, #tpu.memory_space<semaphore_mem>>
    %259 = tpu.memref_squeeze %258 : memref<1x!tpu.dma_semaphore, #tpu.memory_space<semaphore_mem>> -> memref<!tpu.dma_semaphore, #tpu.memory_space<semaphore_mem>>
    tpu.wait_dma2 semaphore(%259 : memref<!tpu.dma_semaphore, #tpu.memory_space<semaphore_mem>>) src(%256 : memref<1x1x256xf32, #tpu.memory_space<any>>) dst(%257 : memref<1x1x256xf32, #tpu.memory_space<vmem>>)
    %c0_i32_273 = arith.constant 0 : i32
    %c24_i32_274 = arith.constant 24 : i32
    %260 = tpu.memref_slice %arg2[%1, %c24_i32_274, %3] : memref<2x48x256xf32, #tpu.memory_space<any>> -> memref<1x1x256xf32, #tpu.memory_space<any>>
    %c0_i32_275 = arith.constant 0 : i32
    %c16_i32_276 = arith.constant 16 : i32
    %c0_i32_277 = arith.constant 0 : i32
    %261 = tpu.memref_slice %arg3[%c0_i32_275, %c16_i32_276, %c0_i32_277] : memref<1x48x256xf32, #tpu.memory_space<vmem>> -> memref<1x1x256xf32, #tpu.memory_space<vmem>>
    %262 = tpu.memref_slice %arg4[%c0_i32_273] : memref<8x!tpu.dma_semaphore, #tpu.memory_space<semaphore_mem>> -> memref<1x!tpu.dma_semaphore, #tpu.memory_space<semaphore_mem>>
    %263 = tpu.memref_squeeze %262 : memref<1x!tpu.dma_semaphore, #tpu.memory_space<semaphore_mem>> -> memref<!tpu.dma_semaphore, #tpu.memory_space<semaphore_mem>>
    tpu.wait_dma2 semaphore(%263 : memref<!tpu.dma_semaphore, #tpu.memory_space<semaphore_mem>>) src(%260 : memref<1x1x256xf32, #tpu.memory_space<any>>) dst(%261 : memref<1x1x256xf32, #tpu.memory_space<vmem>>)
    %c1_i32_278 = arith.constant 1 : i32
    %c2_i32_279 = arith.constant 2 : i32
    %264 = tpu.memref_slice %arg2[%1, %c2_i32_279, %3] : memref<2x48x256xf32, #tpu.memory_space<any>> -> memref<1x1x256xf32, #tpu.memory_space<any>>
    %c0_i32_280 = arith.constant 0 : i32
    %c17_i32_281 = arith.constant 17 : i32
    %c0_i32_282 = arith.constant 0 : i32
    %265 = tpu.memref_slice %arg3[%c0_i32_280, %c17_i32_281, %c0_i32_282] : memref<1x48x256xf32, #tpu.memory_space<vmem>> -> memref<1x1x256xf32, #tpu.memory_space<vmem>>
    %266 = tpu.memref_slice %arg4[%c1_i32_278] : memref<8x!tpu.dma_semaphore, #tpu.memory_space<semaphore_mem>> -> memref<1x!tpu.dma_semaphore, #tpu.memory_space<semaphore_mem>>
    %267 = tpu.memref_squeeze %266 : memref<1x!tpu.dma_semaphore, #tpu.memory_space<semaphore_mem>> -> memref<!tpu.dma_semaphore, #tpu.memory_space<semaphore_mem>>
    tpu.wait_dma2 semaphore(%267 : memref<!tpu.dma_semaphore, #tpu.memory_space<semaphore_mem>>) src(%264 : memref<1x1x256xf32, #tpu.memory_space<any>>) dst(%265 : memref<1x1x256xf32, #tpu.memory_space<vmem>>)
    %c2_i32_283 = arith.constant 2 : i32
    %c27_i32_284 = arith.constant 27 : i32
    %268 = tpu.memref_slice %arg2[%1, %c27_i32_284, %3] : memref<2x48x256xf32, #tpu.memory_space<any>> -> memref<1x1x256xf32, #tpu.memory_space<any>>
    %c0_i32_285 = arith.constant 0 : i32
    %c18_i32_286 = arith.constant 18 : i32
    %c0_i32_287 = arith.constant 0 : i32
    %269 = tpu.memref_slice %arg3[%c0_i32_285, %c18_i32_286, %c0_i32_287] : memref<1x48x256xf32, #tpu.memory_space<vmem>> -> memref<1x1x256xf32, #tpu.memory_space<vmem>>
    %270 = tpu.memref_slice %arg4[%c2_i32_283] : memref<8x!tpu.dma_semaphore, #tpu.memory_space<semaphore_mem>> -> memref<1x!tpu.dma_semaphore, #tpu.memory_space<semaphore_mem>>
    %271 = tpu.memref_squeeze %270 : memref<1x!tpu.dma_semaphore, #tpu.memory_space<semaphore_mem>> -> memref<!tpu.dma_semaphore, #tpu.memory_space<semaphore_mem>>
    tpu.wait_dma2 semaphore(%271 : memref<!tpu.dma_semaphore, #tpu.memory_space<semaphore_mem>>) src(%268 : memref<1x1x256xf32, #tpu.memory_space<any>>) dst(%269 : memref<1x1x256xf32, #tpu.memory_space<vmem>>)
    %c3_i32_288 = arith.constant 3 : i32
    %c5_i32_289 = arith.constant 5 : i32
    %272 = tpu.memref_slice %arg2[%1, %c5_i32_289, %3] : memref<2x48x256xf32, #tpu.memory_space<any>> -> memref<1x1x256xf32, #tpu.memory_space<any>>
    %c0_i32_290 = arith.constant 0 : i32
    %c19_i32_291 = arith.constant 19 : i32
    %c0_i32_292 = arith.constant 0 : i32
    %273 = tpu.memref_slice %arg3[%c0_i32_290, %c19_i32_291, %c0_i32_292] : memref<1x48x256xf32, #tpu.memory_space<vmem>> -> memref<1x1x256xf32, #tpu.memory_space<vmem>>
    %274 = tpu.memref_slice %arg4[%c3_i32_288] : memref<8x!tpu.dma_semaphore, #tpu.memory_space<semaphore_mem>> -> memref<1x!tpu.dma_semaphore, #tpu.memory_space<semaphore_mem>>
    %275 = tpu.memref_squeeze %274 : memref<1x!tpu.dma_semaphore, #tpu.memory_space<semaphore_mem>> -> memref<!tpu.dma_semaphore, #tpu.memory_space<semaphore_mem>>
    tpu.wait_dma2 semaphore(%275 : memref<!tpu.dma_semaphore, #tpu.memory_space<semaphore_mem>>) src(%272 : memref<1x1x256xf32, #tpu.memory_space<any>>) dst(%273 : memref<1x1x256xf32, #tpu.memory_space<vmem>>)
    %c4_i32_293 = arith.constant 4 : i32
    %c30_i32_294 = arith.constant 30 : i32
    %276 = tpu.memref_slice %arg2[%1, %c30_i32_294, %3] : memref<2x48x256xf32, #tpu.memory_space<any>> -> memref<1x1x256xf32, #tpu.memory_space<any>>
    %c0_i32_295 = arith.constant 0 : i32
    %c20_i32_296 = arith.constant 20 : i32
    %c0_i32_297 = arith.constant 0 : i32
    %277 = tpu.memref_slice %arg3[%c0_i32_295, %c20_i32_296, %c0_i32_297] : memref<1x48x256xf32, #tpu.memory_space<vmem>> -> memref<1x1x256xf32, #tpu.memory_space<vmem>>
    %278 = tpu.memref_slice %arg4[%c4_i32_293] : memref<8x!tpu.dma_semaphore, #tpu.memory_space<semaphore_mem>> -> memref<1x!tpu.dma_semaphore, #tpu.memory_space<semaphore_mem>>
    %279 = tpu.memref_squeeze %278 : memref<1x!tpu.dma_semaphore, #tpu.memory_space<semaphore_mem>> -> memref<!tpu.dma_semaphore, #tpu.memory_space<semaphore_mem>>
    tpu.wait_dma2 semaphore(%279 : memref<!tpu.dma_semaphore, #tpu.memory_space<semaphore_mem>>) src(%276 : memref<1x1x256xf32, #tpu.memory_space<any>>) dst(%277 : memref<1x1x256xf32, #tpu.memory_space<vmem>>)
    %c5_i32_298 = arith.constant 5 : i32
    %c8_i32_299 = arith.constant 8 : i32
    %280 = tpu.memref_slice %arg2[%1, %c8_i32_299, %3] : memref<2x48x256xf32, #tpu.memory_space<any>> -> memref<1x1x256xf32, #tpu.memory_space<any>>
    %c0_i32_300 = arith.constant 0 : i32
    %c21_i32_301 = arith.constant 21 : i32
    %c0_i32_302 = arith.constant 0 : i32
    %281 = tpu.memref_slice %arg3[%c0_i32_300, %c21_i32_301, %c0_i32_302] : memref<1x48x256xf32, #tpu.memory_space<vmem>> -> memref<1x1x256xf32, #tpu.memory_space<vmem>>
    %282 = tpu.memref_slice %arg4[%c5_i32_298] : memref<8x!tpu.dma_semaphore, #tpu.memory_space<semaphore_mem>> -> memref<1x!tpu.dma_semaphore, #tpu.memory_space<semaphore_mem>>
    %283 = tpu.memref_squeeze %282 : memref<1x!tpu.dma_semaphore, #tpu.memory_space<semaphore_mem>> -> memref<!tpu.dma_semaphore, #tpu.memory_space<semaphore_mem>>
    tpu.wait_dma2 semaphore(%283 : memref<!tpu.dma_semaphore, #tpu.memory_space<semaphore_mem>>) src(%280 : memref<1x1x256xf32, #tpu.memory_space<any>>) dst(%281 : memref<1x1x256xf32, #tpu.memory_space<vmem>>)
    %c6_i32_303 = arith.constant 6 : i32
    %c33_i32_304 = arith.constant 33 : i32
    %284 = tpu.memref_slice %arg2[%1, %c33_i32_304, %3] : memref<2x48x256xf32, #tpu.memory_space<any>> -> memref<1x1x256xf32, #tpu.memory_space<any>>
    %c0_i32_305 = arith.constant 0 : i32
    %c22_i32_306 = arith.constant 22 : i32
    %c0_i32_307 = arith.constant 0 : i32
    %285 = tpu.memref_slice %arg3[%c0_i32_305, %c22_i32_306, %c0_i32_307] : memref<1x48x256xf32, #tpu.memory_space<vmem>> -> memref<1x1x256xf32, #tpu.memory_space<vmem>>
    %286 = tpu.memref_slice %arg4[%c6_i32_303] : memref<8x!tpu.dma_semaphore, #tpu.memory_space<semaphore_mem>> -> memref<1x!tpu.dma_semaphore, #tpu.memory_space<semaphore_mem>>
    %287 = tpu.memref_squeeze %286 : memref<1x!tpu.dma_semaphore, #tpu.memory_space<semaphore_mem>> -> memref<!tpu.dma_semaphore, #tpu.memory_space<semaphore_mem>>
    tpu.wait_dma2 semaphore(%287 : memref<!tpu.dma_semaphore, #tpu.memory_space<semaphore_mem>>) src(%284 : memref<1x1x256xf32, #tpu.memory_space<any>>) dst(%285 : memref<1x1x256xf32, #tpu.memory_space<vmem>>)
    %c7_i32_308 = arith.constant 7 : i32
    %c11_i32_309 = arith.constant 11 : i32
    %288 = tpu.memref_slice %arg2[%1, %c11_i32_309, %3] : memref<2x48x256xf32, #tpu.memory_space<any>> -> memref<1x1x256xf32, #tpu.memory_space<any>>
    %c0_i32_310 = arith.constant 0 : i32
    %c23_i32_311 = arith.constant 23 : i32
    %c0_i32_312 = arith.constant 0 : i32
    %289 = tpu.memref_slice %arg3[%c0_i32_310, %c23_i32_311, %c0_i32_312] : memref<1x48x256xf32, #tpu.memory_space<vmem>> -> memref<1x1x256xf32, #tpu.memory_space<vmem>>
    %290 = tpu.memref_slice %arg4[%c7_i32_308] : memref<8x!tpu.dma_semaphore, #tpu.memory_space<semaphore_mem>> -> memref<1x!tpu.dma_semaphore, #tpu.memory_space<semaphore_mem>>
    %291 = tpu.memref_squeeze %290 : memref<1x!tpu.dma_semaphore, #tpu.memory_space<semaphore_mem>> -> memref<!tpu.dma_semaphore, #tpu.memory_space<semaphore_mem>>
    tpu.wait_dma2 semaphore(%291 : memref<!tpu.dma_semaphore, #tpu.memory_space<semaphore_mem>>) src(%288 : memref<1x1x256xf32, #tpu.memory_space<any>>) dst(%289 : memref<1x1x256xf32, #tpu.memory_space<vmem>>)
    %c0_i32_313 = arith.constant 0 : i32
    %c36_i32_314 = arith.constant 36 : i32
    %292 = tpu.memref_slice %arg2[%1, %c36_i32_314, %3] : memref<2x48x256xf32, #tpu.memory_space<any>> -> memref<1x1x256xf32, #tpu.memory_space<any>>
    %c0_i32_315 = arith.constant 0 : i32
    %c24_i32_316 = arith.constant 24 : i32
    %c0_i32_317 = arith.constant 0 : i32
    %293 = tpu.memref_slice %arg3[%c0_i32_315, %c24_i32_316, %c0_i32_317] : memref<1x48x256xf32, #tpu.memory_space<vmem>> -> memref<1x1x256xf32, #tpu.memory_space<vmem>>
    %294 = tpu.memref_slice %arg4[%c0_i32_313] : memref<8x!tpu.dma_semaphore, #tpu.memory_space<semaphore_mem>> -> memref<1x!tpu.dma_semaphore, #tpu.memory_space<semaphore_mem>>
    %295 = tpu.memref_squeeze %294 : memref<1x!tpu.dma_semaphore, #tpu.memory_space<semaphore_mem>> -> memref<!tpu.dma_semaphore, #tpu.memory_space<semaphore_mem>>
    tpu.wait_dma2 semaphore(%295 : memref<!tpu.dma_semaphore, #tpu.memory_space<semaphore_mem>>) src(%292 : memref<1x1x256xf32, #tpu.memory_space<any>>) dst(%293 : memref<1x1x256xf32, #tpu.memory_space<vmem>>)
    %c1_i32_318 = arith.constant 1 : i32
    %c14_i32_319 = arith.constant 14 : i32
    %296 = tpu.memref_slice %arg2[%1, %c14_i32_319, %3] : memref<2x48x256xf32, #tpu.memory_space<any>> -> memref<1x1x256xf32, #tpu.memory_space<any>>
    %c0_i32_320 = arith.constant 0 : i32
    %c25_i32_321 = arith.constant 25 : i32
    %c0_i32_322 = arith.constant 0 : i32
    %297 = tpu.memref_slice %arg3[%c0_i32_320, %c25_i32_321, %c0_i32_322] : memref<1x48x256xf32, #tpu.memory_space<vmem>> -> memref<1x1x256xf32, #tpu.memory_space<vmem>>
    %298 = tpu.memref_slice %arg4[%c1_i32_318] : memref<8x!tpu.dma_semaphore, #tpu.memory_space<semaphore_mem>> -> memref<1x!tpu.dma_semaphore, #tpu.memory_space<semaphore_mem>>
    %299 = tpu.memref_squeeze %298 : memref<1x!tpu.dma_semaphore, #tpu.memory_space<semaphore_mem>> -> memref<!tpu.dma_semaphore, #tpu.memory_space<semaphore_mem>>
    tpu.wait_dma2 semaphore(%299 : memref<!tpu.dma_semaphore, #tpu.memory_space<semaphore_mem>>) src(%296 : memref<1x1x256xf32, #tpu.memory_space<any>>) dst(%297 : memref<1x1x256xf32, #tpu.memory_space<vmem>>)
    %c2_i32_323 = arith.constant 2 : i32
    %c39_i32_324 = arith.constant 39 : i32
    %300 = tpu.memref_slice %arg2[%1, %c39_i32_324, %3] : memref<2x48x256xf32, #tpu.memory_space<any>> -> memref<1x1x256xf32, #tpu.memory_space<any>>
    %c0_i32_325 = arith.constant 0 : i32
    %c26_i32_326 = arith.constant 26 : i32
    %c0_i32_327 = arith.constant 0 : i32
    %301 = tpu.memref_slice %arg3[%c0_i32_325, %c26_i32_326, %c0_i32_327] : memref<1x48x256xf32, #tpu.memory_space<vmem>> -> memref<1x1x256xf32, #tpu.memory_space<vmem>>
    %302 = tpu.memref_slice %arg4[%c2_i32_323] : memref<8x!tpu.dma_semaphore, #tpu.memory_space<semaphore_mem>> -> memref<1x!tpu.dma_semaphore, #tpu.memory_space<semaphore_mem>>
    %303 = tpu.memref_squeeze %302 : memref<1x!tpu.dma_semaphore, #tpu.memory_space<semaphore_mem>> -> memref<!tpu.dma_semaphore, #tpu.memory_space<semaphore_mem>>
    tpu.wait_dma2 semaphore(%303 : memref<!tpu.dma_semaphore, #tpu.memory_space<semaphore_mem>>) src(%300 : memref<1x1x256xf32, #tpu.memory_space<any>>) dst(%301 : memref<1x1x256xf32, #tpu.memory_space<vmem>>)
    %c3_i32_328 = arith.constant 3 : i32
    %c17_i32_329 = arith.constant 17 : i32
    %304 = tpu.memref_slice %arg2[%1, %c17_i32_329, %3] : memref<2x48x256xf32, #tpu.memory_space<any>> -> memref<1x1x256xf32, #tpu.memory_space<any>>
    %c0_i32_330 = arith.constant 0 : i32
    %c27_i32_331 = arith.constant 27 : i32
    %c0_i32_332 = arith.constant 0 : i32
    %305 = tpu.memref_slice %arg3[%c0_i32_330, %c27_i32_331, %c0_i32_332] : memref<1x48x256xf32, #tpu.memory_space<vmem>> -> memref<1x1x256xf32, #tpu.memory_space<vmem>>
    %306 = tpu.memref_slice %arg4[%c3_i32_328] : memref<8x!tpu.dma_semaphore, #tpu.memory_space<semaphore_mem>> -> memref<1x!tpu.dma_semaphore, #tpu.memory_space<semaphore_mem>>
    %307 = tpu.memref_squeeze %306 : memref<1x!tpu.dma_semaphore, #tpu.memory_space<semaphore_mem>> -> memref<!tpu.dma_semaphore, #tpu.memory_space<semaphore_mem>>
    tpu.wait_dma2 semaphore(%307 : memref<!tpu.dma_semaphore, #tpu.memory_space<semaphore_mem>>) src(%304 : memref<1x1x256xf32, #tpu.memory_space<any>>) dst(%305 : memref<1x1x256xf32, #tpu.memory_space<vmem>>)
    %c4_i32_333 = arith.constant 4 : i32
    %c42_i32_334 = arith.constant 42 : i32
    %308 = tpu.memref_slice %arg2[%1, %c42_i32_334, %3] : memref<2x48x256xf32, #tpu.memory_space<any>> -> memref<1x1x256xf32, #tpu.memory_space<any>>
    %c0_i32_335 = arith.constant 0 : i32
    %c28_i32_336 = arith.constant 28 : i32
    %c0_i32_337 = arith.constant 0 : i32
    %309 = tpu.memref_slice %arg3[%c0_i32_335, %c28_i32_336, %c0_i32_337] : memref<1x48x256xf32, #tpu.memory_space<vmem>> -> memref<1x1x256xf32, #tpu.memory_space<vmem>>
    %310 = tpu.memref_slice %arg4[%c4_i32_333] : memref<8x!tpu.dma_semaphore, #tpu.memory_space<semaphore_mem>> -> memref<1x!tpu.dma_semaphore, #tpu.memory_space<semaphore_mem>>
    %311 = tpu.memref_squeeze %310 : memref<1x!tpu.dma_semaphore, #tpu.memory_space<semaphore_mem>> -> memref<!tpu.dma_semaphore, #tpu.memory_space<semaphore_mem>>
    tpu.wait_dma2 semaphore(%311 : memref<!tpu.dma_semaphore, #tpu.memory_space<semaphore_mem>>) src(%308 : memref<1x1x256xf32, #tpu.memory_space<any>>) dst(%309 : memref<1x1x256xf32, #tpu.memory_space<vmem>>)
    %c5_i32_338 = arith.constant 5 : i32
    %c20_i32_339 = arith.constant 20 : i32
    %312 = tpu.memref_slice %arg2[%1, %c20_i32_339, %3] : memref<2x48x256xf32, #tpu.memory_space<any>> -> memref<1x1x256xf32, #tpu.memory_space<any>>
    %c0_i32_340 = arith.constant 0 : i32
    %c29_i32_341 = arith.constant 29 : i32
    %c0_i32_342 = arith.constant 0 : i32
    %313 = tpu.memref_slice %arg3[%c0_i32_340, %c29_i32_341, %c0_i32_342] : memref<1x48x256xf32, #tpu.memory_space<vmem>> -> memref<1x1x256xf32, #tpu.memory_space<vmem>>
    %314 = tpu.memref_slice %arg4[%c5_i32_338] : memref<8x!tpu.dma_semaphore, #tpu.memory_space<semaphore_mem>> -> memref<1x!tpu.dma_semaphore, #tpu.memory_space<semaphore_mem>>
    %315 = tpu.memref_squeeze %314 : memref<1x!tpu.dma_semaphore, #tpu.memory_space<semaphore_mem>> -> memref<!tpu.dma_semaphore, #tpu.memory_space<semaphore_mem>>
    tpu.wait_dma2 semaphore(%315 : memref<!tpu.dma_semaphore, #tpu.memory_space<semaphore_mem>>) src(%312 : memref<1x1x256xf32, #tpu.memory_space<any>>) dst(%313 : memref<1x1x256xf32, #tpu.memory_space<vmem>>)
    %c6_i32_343 = arith.constant 6 : i32
    %c45_i32_344 = arith.constant 45 : i32
    %316 = tpu.memref_slice %arg2[%1, %c45_i32_344, %3] : memref<2x48x256xf32, #tpu.memory_space<any>> -> memref<1x1x256xf32, #tpu.memory_space<any>>
    %c0_i32_345 = arith.constant 0 : i32
    %c30_i32_346 = arith.constant 30 : i32
    %c0_i32_347 = arith.constant 0 : i32
    %317 = tpu.memref_slice %arg3[%c0_i32_345, %c30_i32_346, %c0_i32_347] : memref<1x48x256xf32, #tpu.memory_space<vmem>> -> memref<1x1x256xf32, #tpu.memory_space<vmem>>
    %318 = tpu.memref_slice %arg4[%c6_i32_343] : memref<8x!tpu.dma_semaphore, #tpu.memory_space<semaphore_mem>> -> memref<1x!tpu.dma_semaphore, #tpu.memory_space<semaphore_mem>>
    %319 = tpu.memref_squeeze %318 : memref<1x!tpu.dma_semaphore, #tpu.memory_space<semaphore_mem>> -> memref<!tpu.dma_semaphore, #tpu.memory_space<semaphore_mem>>
    tpu.wait_dma2 semaphore(%319 : memref<!tpu.dma_semaphore, #tpu.memory_space<semaphore_mem>>) src(%316 : memref<1x1x256xf32, #tpu.memory_space<any>>) dst(%317 : memref<1x1x256xf32, #tpu.memory_space<vmem>>)
    %c7_i32_348 = arith.constant 7 : i32
    %c23_i32_349 = arith.constant 23 : i32
    %320 = tpu.memref_slice %arg2[%1, %c23_i32_349, %3] : memref<2x48x256xf32, #tpu.memory_space<any>> -> memref<1x1x256xf32, #tpu.memory_space<any>>
    %c0_i32_350 = arith.constant 0 : i32
    %c31_i32_351 = arith.constant 31 : i32
    %c0_i32_352 = arith.constant 0 : i32
    %321 = tpu.memref_slice %arg3[%c0_i32_350, %c31_i32_351, %c0_i32_352] : memref<1x48x256xf32, #tpu.memory_space<vmem>> -> memref<1x1x256xf32, #tpu.memory_space<vmem>>
    %322 = tpu.memref_slice %arg4[%c7_i32_348] : memref<8x!tpu.dma_semaphore, #tpu.memory_space<semaphore_mem>> -> memref<1x!tpu.dma_semaphore, #tpu.memory_space<semaphore_mem>>
    %323 = tpu.memref_squeeze %322 : memref<1x!tpu.dma_semaphore, #tpu.memory_space<semaphore_mem>> -> memref<!tpu.dma_semaphore, #tpu.memory_space<semaphore_mem>>
    tpu.wait_dma2 semaphore(%323 : memref<!tpu.dma_semaphore, #tpu.memory_space<semaphore_mem>>) src(%320 : memref<1x1x256xf32, #tpu.memory_space<any>>) dst(%321 : memref<1x1x256xf32, #tpu.memory_space<vmem>>)
    %c0_i32_353 = arith.constant 0 : i32
    %c1_i32_354 = arith.constant 1 : i32
    %324 = tpu.memref_slice %arg2[%1, %c1_i32_354, %3] : memref<2x48x256xf32, #tpu.memory_space<any>> -> memref<1x1x256xf32, #tpu.memory_space<any>>
    %c0_i32_355 = arith.constant 0 : i32
    %c32_i32_356 = arith.constant 32 : i32
    %c0_i32_357 = arith.constant 0 : i32
    %325 = tpu.memref_slice %arg3[%c0_i32_355, %c32_i32_356, %c0_i32_357] : memref<1x48x256xf32, #tpu.memory_space<vmem>> -> memref<1x1x256xf32, #tpu.memory_space<vmem>>
    %326 = tpu.memref_slice %arg4[%c0_i32_353] : memref<8x!tpu.dma_semaphore, #tpu.memory_space<semaphore_mem>> -> memref<1x!tpu.dma_semaphore, #tpu.memory_space<semaphore_mem>>
    %327 = tpu.memref_squeeze %326 : memref<1x!tpu.dma_semaphore, #tpu.memory_space<semaphore_mem>> -> memref<!tpu.dma_semaphore, #tpu.memory_space<semaphore_mem>>
    tpu.wait_dma2 semaphore(%327 : memref<!tpu.dma_semaphore, #tpu.memory_space<semaphore_mem>>) src(%324 : memref<1x1x256xf32, #tpu.memory_space<any>>) dst(%325 : memref<1x1x256xf32, #tpu.memory_space<vmem>>)
    %c1_i32_358 = arith.constant 1 : i32
    %c26_i32_359 = arith.constant 26 : i32
    %328 = tpu.memref_slice %arg2[%1, %c26_i32_359, %3] : memref<2x48x256xf32, #tpu.memory_space<any>> -> memref<1x1x256xf32, #tpu.memory_space<any>>
    %c0_i32_360 = arith.constant 0 : i32
    %c33_i32_361 = arith.constant 33 : i32
    %c0_i32_362 = arith.constant 0 : i32
    %329 = tpu.memref_slice %arg3[%c0_i32_360, %c33_i32_361, %c0_i32_362] : memref<1x48x256xf32, #tpu.memory_space<vmem>> -> memref<1x1x256xf32, #tpu.memory_space<vmem>>
    %330 = tpu.memref_slice %arg4[%c1_i32_358] : memref<8x!tpu.dma_semaphore, #tpu.memory_space<semaphore_mem>> -> memref<1x!tpu.dma_semaphore, #tpu.memory_space<semaphore_mem>>
    %331 = tpu.memref_squeeze %330 : memref<1x!tpu.dma_semaphore, #tpu.memory_space<semaphore_mem>> -> memref<!tpu.dma_semaphore, #tpu.memory_space<semaphore_mem>>
    tpu.wait_dma2 semaphore(%331 : memref<!tpu.dma_semaphore, #tpu.memory_space<semaphore_mem>>) src(%328 : memref<1x1x256xf32, #tpu.memory_space<any>>) dst(%329 : memref<1x1x256xf32, #tpu.memory_space<vmem>>)
    %c2_i32_363 = arith.constant 2 : i32
    %c4_i32_364 = arith.constant 4 : i32
    %332 = tpu.memref_slice %arg2[%1, %c4_i32_364, %3] : memref<2x48x256xf32, #tpu.memory_space<any>> -> memref<1x1x256xf32, #tpu.memory_space<any>>
    %c0_i32_365 = arith.constant 0 : i32
    %c34_i32_366 = arith.constant 34 : i32
    %c0_i32_367 = arith.constant 0 : i32
    %333 = tpu.memref_slice %arg3[%c0_i32_365, %c34_i32_366, %c0_i32_367] : memref<1x48x256xf32, #tpu.memory_space<vmem>> -> memref<1x1x256xf32, #tpu.memory_space<vmem>>
    %334 = tpu.memref_slice %arg4[%c2_i32_363] : memref<8x!tpu.dma_semaphore, #tpu.memory_space<semaphore_mem>> -> memref<1x!tpu.dma_semaphore, #tpu.memory_space<semaphore_mem>>
    %335 = tpu.memref_squeeze %334 : memref<1x!tpu.dma_semaphore, #tpu.memory_space<semaphore_mem>> -> memref<!tpu.dma_semaphore, #tpu.memory_space<semaphore_mem>>
    tpu.wait_dma2 semaphore(%335 : memref<!tpu.dma_semaphore, #tpu.memory_space<semaphore_mem>>) src(%332 : memref<1x1x256xf32, #tpu.memory_space<any>>) dst(%333 : memref<1x1x256xf32, #tpu.memory_space<vmem>>)
    %c3_i32_368 = arith.constant 3 : i32
    %c29_i32_369 = arith.constant 29 : i32
    %336 = tpu.memref_slice %arg2[%1, %c29_i32_369, %3] : memref<2x48x256xf32, #tpu.memory_space<any>> -> memref<1x1x256xf32, #tpu.memory_space<any>>
    %c0_i32_370 = arith.constant 0 : i32
    %c35_i32_371 = arith.constant 35 : i32
    %c0_i32_372 = arith.constant 0 : i32
    %337 = tpu.memref_slice %arg3[%c0_i32_370, %c35_i32_371, %c0_i32_372] : memref<1x48x256xf32, #tpu.memory_space<vmem>> -> memref<1x1x256xf32, #tpu.memory_space<vmem>>
    %338 = tpu.memref_slice %arg4[%c3_i32_368] : memref<8x!tpu.dma_semaphore, #tpu.memory_space<semaphore_mem>> -> memref<1x!tpu.dma_semaphore, #tpu.memory_space<semaphore_mem>>
    %339 = tpu.memref_squeeze %338 : memref<1x!tpu.dma_semaphore, #tpu.memory_space<semaphore_mem>> -> memref<!tpu.dma_semaphore, #tpu.memory_space<semaphore_mem>>
    tpu.wait_dma2 semaphore(%339 : memref<!tpu.dma_semaphore, #tpu.memory_space<semaphore_mem>>) src(%336 : memref<1x1x256xf32, #tpu.memory_space<any>>) dst(%337 : memref<1x1x256xf32, #tpu.memory_space<vmem>>)
    %c4_i32_373 = arith.constant 4 : i32
    %c7_i32_374 = arith.constant 7 : i32
    %340 = tpu.memref_slice %arg2[%1, %c7_i32_374, %3] : memref<2x48x256xf32, #tpu.memory_space<any>> -> memref<1x1x256xf32, #tpu.memory_space<any>>
    %c0_i32_375 = arith.constant 0 : i32
    %c36_i32_376 = arith.constant 36 : i32
    %c0_i32_377 = arith.constant 0 : i32
    %341 = tpu.memref_slice %arg3[%c0_i32_375, %c36_i32_376, %c0_i32_377] : memref<1x48x256xf32, #tpu.memory_space<vmem>> -> memref<1x1x256xf32, #tpu.memory_space<vmem>>
    %342 = tpu.memref_slice %arg4[%c4_i32_373] : memref<8x!tpu.dma_semaphore, #tpu.memory_space<semaphore_mem>> -> memref<1x!tpu.dma_semaphore, #tpu.memory_space<semaphore_mem>>
    %343 = tpu.memref_squeeze %342 : memref<1x!tpu.dma_semaphore, #tpu.memory_space<semaphore_mem>> -> memref<!tpu.dma_semaphore, #tpu.memory_space<semaphore_mem>>
    tpu.wait_dma2 semaphore(%343 : memref<!tpu.dma_semaphore, #tpu.memory_space<semaphore_mem>>) src(%340 : memref<1x1x256xf32, #tpu.memory_space<any>>) dst(%341 : memref<1x1x256xf32, #tpu.memory_space<vmem>>)
    %c5_i32_378 = arith.constant 5 : i32
    %c32_i32_379 = arith.constant 32 : i32
    %344 = tpu.memref_slice %arg2[%1, %c32_i32_379, %3] : memref<2x48x256xf32, #tpu.memory_space<any>> -> memref<1x1x256xf32, #tpu.memory_space<any>>
    %c0_i32_380 = arith.constant 0 : i32
    %c37_i32_381 = arith.constant 37 : i32
    %c0_i32_382 = arith.constant 0 : i32
    %345 = tpu.memref_slice %arg3[%c0_i32_380, %c37_i32_381, %c0_i32_382] : memref<1x48x256xf32, #tpu.memory_space<vmem>> -> memref<1x1x256xf32, #tpu.memory_space<vmem>>
    %346 = tpu.memref_slice %arg4[%c5_i32_378] : memref<8x!tpu.dma_semaphore, #tpu.memory_space<semaphore_mem>> -> memref<1x!tpu.dma_semaphore, #tpu.memory_space<semaphore_mem>>
    %347 = tpu.memref_squeeze %346 : memref<1x!tpu.dma_semaphore, #tpu.memory_space<semaphore_mem>> -> memref<!tpu.dma_semaphore, #tpu.memory_space<semaphore_mem>>
    tpu.wait_dma2 semaphore(%347 : memref<!tpu.dma_semaphore, #tpu.memory_space<semaphore_mem>>) src(%344 : memref<1x1x256xf32, #tpu.memory_space<any>>) dst(%345 : memref<1x1x256xf32, #tpu.memory_space<vmem>>)
    %c6_i32_383 = arith.constant 6 : i32
    %c10_i32_384 = arith.constant 10 : i32
    %348 = tpu.memref_slice %arg2[%1, %c10_i32_384, %3] : memref<2x48x256xf32, #tpu.memory_space<any>> -> memref<1x1x256xf32, #tpu.memory_space<any>>
    %c0_i32_385 = arith.constant 0 : i32
    %c38_i32_386 = arith.constant 38 : i32
    %c0_i32_387 = arith.constant 0 : i32
    %349 = tpu.memref_slice %arg3[%c0_i32_385, %c38_i32_386, %c0_i32_387] : memref<1x48x256xf32, #tpu.memory_space<vmem>> -> memref<1x1x256xf32, #tpu.memory_space<vmem>>
    %350 = tpu.memref_slice %arg4[%c6_i32_383] : memref<8x!tpu.dma_semaphore, #tpu.memory_space<semaphore_mem>> -> memref<1x!tpu.dma_semaphore, #tpu.memory_space<semaphore_mem>>
    %351 = tpu.memref_squeeze %350 : memref<1x!tpu.dma_semaphore, #tpu.memory_space<semaphore_mem>> -> memref<!tpu.dma_semaphore, #tpu.memory_space<semaphore_mem>>
    tpu.wait_dma2 semaphore(%351 : memref<!tpu.dma_semaphore, #tpu.memory_space<semaphore_mem>>) src(%348 : memref<1x1x256xf32, #tpu.memory_space<any>>) dst(%349 : memref<1x1x256xf32, #tpu.memory_space<vmem>>)
    %c7_i32_388 = arith.constant 7 : i32
    %c35_i32_389 = arith.constant 35 : i32
    %352 = tpu.memref_slice %arg2[%1, %c35_i32_389, %3] : memref<2x48x256xf32, #tpu.memory_space<any>> -> memref<1x1x256xf32, #tpu.memory_space<any>>
    %c0_i32_390 = arith.constant 0 : i32
    %c39_i32_391 = arith.constant 39 : i32
    %c0_i32_392 = arith.constant 0 : i32
    %353 = tpu.memref_slice %arg3[%c0_i32_390, %c39_i32_391, %c0_i32_392] : memref<1x48x256xf32, #tpu.memory_space<vmem>> -> memref<1x1x256xf32, #tpu.memory_space<vmem>>
    %354 = tpu.memref_slice %arg4[%c7_i32_388] : memref<8x!tpu.dma_semaphore, #tpu.memory_space<semaphore_mem>> -> memref<1x!tpu.dma_semaphore, #tpu.memory_space<semaphore_mem>>
    %355 = tpu.memref_squeeze %354 : memref<1x!tpu.dma_semaphore, #tpu.memory_space<semaphore_mem>> -> memref<!tpu.dma_semaphore, #tpu.memory_space<semaphore_mem>>
    tpu.wait_dma2 semaphore(%355 : memref<!tpu.dma_semaphore, #tpu.memory_space<semaphore_mem>>) src(%352 : memref<1x1x256xf32, #tpu.memory_space<any>>) dst(%353 : memref<1x1x256xf32, #tpu.memory_space<vmem>>)
    %c0_i32_393 = arith.constant 0 : i32
    %c13_i32_394 = arith.constant 13 : i32
    %356 = tpu.memref_slice %arg2[%1, %c13_i32_394, %3] : memref<2x48x256xf32, #tpu.memory_space<any>> -> memref<1x1x256xf32, #tpu.memory_space<any>>
    %c0_i32_395 = arith.constant 0 : i32
    %c40_i32_396 = arith.constant 40 : i32
    %c0_i32_397 = arith.constant 0 : i32
    %357 = tpu.memref_slice %arg3[%c0_i32_395, %c40_i32_396, %c0_i32_397] : memref<1x48x256xf32, #tpu.memory_space<vmem>> -> memref<1x1x256xf32, #tpu.memory_space<vmem>>
    %358 = tpu.memref_slice %arg4[%c0_i32_393] : memref<8x!tpu.dma_semaphore, #tpu.memory_space<semaphore_mem>> -> memref<1x!tpu.dma_semaphore, #tpu.memory_space<semaphore_mem>>
    %359 = tpu.memref_squeeze %358 : memref<1x!tpu.dma_semaphore, #tpu.memory_space<semaphore_mem>> -> memref<!tpu.dma_semaphore, #tpu.memory_space<semaphore_mem>>
    tpu.wait_dma2 semaphore(%359 : memref<!tpu.dma_semaphore, #tpu.memory_space<semaphore_mem>>) src(%356 : memref<1x1x256xf32, #tpu.memory_space<any>>) dst(%357 : memref<1x1x256xf32, #tpu.memory_space<vmem>>)
    %c1_i32_398 = arith.constant 1 : i32
    %c38_i32_399 = arith.constant 38 : i32
    %360 = tpu.memref_slice %arg2[%1, %c38_i32_399, %3] : memref<2x48x256xf32, #tpu.memory_space<any>> -> memref<1x1x256xf32, #tpu.memory_space<any>>
    %c0_i32_400 = arith.constant 0 : i32
    %c41_i32_401 = arith.constant 41 : i32
    %c0_i32_402 = arith.constant 0 : i32
    %361 = tpu.memref_slice %arg3[%c0_i32_400, %c41_i32_401, %c0_i32_402] : memref<1x48x256xf32, #tpu.memory_space<vmem>> -> memref<1x1x256xf32, #tpu.memory_space<vmem>>
    %362 = tpu.memref_slice %arg4[%c1_i32_398] : memref<8x!tpu.dma_semaphore, #tpu.memory_space<semaphore_mem>> -> memref<1x!tpu.dma_semaphore, #tpu.memory_space<semaphore_mem>>
    %363 = tpu.memref_squeeze %362 : memref<1x!tpu.dma_semaphore, #tpu.memory_space<semaphore_mem>> -> memref<!tpu.dma_semaphore, #tpu.memory_space<semaphore_mem>>
    tpu.wait_dma2 semaphore(%363 : memref<!tpu.dma_semaphore, #tpu.memory_space<semaphore_mem>>) src(%360 : memref<1x1x256xf32, #tpu.memory_space<any>>) dst(%361 : memref<1x1x256xf32, #tpu.memory_space<vmem>>)
    %c2_i32_403 = arith.constant 2 : i32
    %c16_i32_404 = arith.constant 16 : i32
    %364 = tpu.memref_slice %arg2[%1, %c16_i32_404, %3] : memref<2x48x256xf32, #tpu.memory_space<any>> -> memref<1x1x256xf32, #tpu.memory_space<any>>
    %c0_i32_405 = arith.constant 0 : i32
    %c42_i32_406 = arith.constant 42 : i32
    %c0_i32_407 = arith.constant 0 : i32
    %365 = tpu.memref_slice %arg3[%c0_i32_405, %c42_i32_406, %c0_i32_407] : memref<1x48x256xf32, #tpu.memory_space<vmem>> -> memref<1x1x256xf32, #tpu.memory_space<vmem>>
    %366 = tpu.memref_slice %arg4[%c2_i32_403] : memref<8x!tpu.dma_semaphore, #tpu.memory_space<semaphore_mem>> -> memref<1x!tpu.dma_semaphore, #tpu.memory_space<semaphore_mem>>
    %367 = tpu.memref_squeeze %366 : memref<1x!tpu.dma_semaphore, #tpu.memory_space<semaphore_mem>> -> memref<!tpu.dma_semaphore, #tpu.memory_space<semaphore_mem>>
    tpu.wait_dma2 semaphore(%367 : memref<!tpu.dma_semaphore, #tpu.memory_space<semaphore_mem>>) src(%364 : memref<1x1x256xf32, #tpu.memory_space<any>>) dst(%365 : memref<1x1x256xf32, #tpu.memory_space<vmem>>)
    %c3_i32_408 = arith.constant 3 : i32
    %c41_i32_409 = arith.constant 41 : i32
    %368 = tpu.memref_slice %arg2[%1, %c41_i32_409, %3] : memref<2x48x256xf32, #tpu.memory_space<any>> -> memref<1x1x256xf32, #tpu.memory_space<any>>
    %c0_i32_410 = arith.constant 0 : i32
    %c43_i32_411 = arith.constant 43 : i32
    %c0_i32_412 = arith.constant 0 : i32
    %369 = tpu.memref_slice %arg3[%c0_i32_410, %c43_i32_411, %c0_i32_412] : memref<1x48x256xf32, #tpu.memory_space<vmem>> -> memref<1x1x256xf32, #tpu.memory_space<vmem>>
    %370 = tpu.memref_slice %arg4[%c3_i32_408] : memref<8x!tpu.dma_semaphore, #tpu.memory_space<semaphore_mem>> -> memref<1x!tpu.dma_semaphore, #tpu.memory_space<semaphore_mem>>
    %371 = tpu.memref_squeeze %370 : memref<1x!tpu.dma_semaphore, #tpu.memory_space<semaphore_mem>> -> memref<!tpu.dma_semaphore, #tpu.memory_space<semaphore_mem>>
    tpu.wait_dma2 semaphore(%371 : memref<!tpu.dma_semaphore, #tpu.memory_space<semaphore_mem>>) src(%368 : memref<1x1x256xf32, #tpu.memory_space<any>>) dst(%369 : memref<1x1x256xf32, #tpu.memory_space<vmem>>)
    %c4_i32_413 = arith.constant 4 : i32
    %c19_i32_414 = arith.constant 19 : i32
    %372 = tpu.memref_slice %arg2[%1, %c19_i32_414, %3] : memref<2x48x256xf32, #tpu.memory_space<any>> -> memref<1x1x256xf32, #tpu.memory_space<any>>
    %c0_i32_415 = arith.constant 0 : i32
    %c44_i32_416 = arith.constant 44 : i32
    %c0_i32_417 = arith.constant 0 : i32
    %373 = tpu.memref_slice %arg3[%c0_i32_415, %c44_i32_416, %c0_i32_417] : memref<1x48x256xf32, #tpu.memory_space<vmem>> -> memref<1x1x256xf32, #tpu.memory_space<vmem>>
    %374 = tpu.memref_slice %arg4[%c4_i32_413] : memref<8x!tpu.dma_semaphore, #tpu.memory_space<semaphore_mem>> -> memref<1x!tpu.dma_semaphore, #tpu.memory_space<semaphore_mem>>
    %375 = tpu.memref_squeeze %374 : memref<1x!tpu.dma_semaphore, #tpu.memory_space<semaphore_mem>> -> memref<!tpu.dma_semaphore, #tpu.memory_space<semaphore_mem>>
    tpu.wait_dma2 semaphore(%375 : memref<!tpu.dma_semaphore, #tpu.memory_space<semaphore_mem>>) src(%372 : memref<1x1x256xf32, #tpu.memory_space<any>>) dst(%373 : memref<1x1x256xf32, #tpu.memory_space<vmem>>)
    %c5_i32_418 = arith.constant 5 : i32
    %c44_i32_419 = arith.constant 44 : i32
    %376 = tpu.memref_slice %arg2[%1, %c44_i32_419, %3] : memref<2x48x256xf32, #tpu.memory_space<any>> -> memref<1x1x256xf32, #tpu.memory_space<any>>
    %c0_i32_420 = arith.constant 0 : i32
    %c45_i32_421 = arith.constant 45 : i32
    %c0_i32_422 = arith.constant 0 : i32
    %377 = tpu.memref_slice %arg3[%c0_i32_420, %c45_i32_421, %c0_i32_422] : memref<1x48x256xf32, #tpu.memory_space<vmem>> -> memref<1x1x256xf32, #tpu.memory_space<vmem>>
    %378 = tpu.memref_slice %arg4[%c5_i32_418] : memref<8x!tpu.dma_semaphore, #tpu.memory_space<semaphore_mem>> -> memref<1x!tpu.dma_semaphore, #tpu.memory_space<semaphore_mem>>
    %379 = tpu.memref_squeeze %378 : memref<1x!tpu.dma_semaphore, #tpu.memory_space<semaphore_mem>> -> memref<!tpu.dma_semaphore, #tpu.memory_space<semaphore_mem>>
    tpu.wait_dma2 semaphore(%379 : memref<!tpu.dma_semaphore, #tpu.memory_space<semaphore_mem>>) src(%376 : memref<1x1x256xf32, #tpu.memory_space<any>>) dst(%377 : memref<1x1x256xf32, #tpu.memory_space<vmem>>)
    %c6_i32_423 = arith.constant 6 : i32
    %c22_i32_424 = arith.constant 22 : i32
    %380 = tpu.memref_slice %arg2[%1, %c22_i32_424, %3] : memref<2x48x256xf32, #tpu.memory_space<any>> -> memref<1x1x256xf32, #tpu.memory_space<any>>
    %c0_i32_425 = arith.constant 0 : i32
    %c46_i32_426 = arith.constant 46 : i32
    %c0_i32_427 = arith.constant 0 : i32
    %381 = tpu.memref_slice %arg3[%c0_i32_425, %c46_i32_426, %c0_i32_427] : memref<1x48x256xf32, #tpu.memory_space<vmem>> -> memref<1x1x256xf32, #tpu.memory_space<vmem>>
    %382 = tpu.memref_slice %arg4[%c6_i32_423] : memref<8x!tpu.dma_semaphore, #tpu.memory_space<semaphore_mem>> -> memref<1x!tpu.dma_semaphore, #tpu.memory_space<semaphore_mem>>
    %383 = tpu.memref_squeeze %382 : memref<1x!tpu.dma_semaphore, #tpu.memory_space<semaphore_mem>> -> memref<!tpu.dma_semaphore, #tpu.memory_space<semaphore_mem>>
    tpu.wait_dma2 semaphore(%383 : memref<!tpu.dma_semaphore, #tpu.memory_space<semaphore_mem>>) src(%380 : memref<1x1x256xf32, #tpu.memory_space<any>>) dst(%381 : memref<1x1x256xf32, #tpu.memory_space<vmem>>)
    %c7_i32_428 = arith.constant 7 : i32
    %c47_i32_429 = arith.constant 47 : i32
    %384 = tpu.memref_slice %arg2[%1, %c47_i32_429, %3] : memref<2x48x256xf32, #tpu.memory_space<any>> -> memref<1x1x256xf32, #tpu.memory_space<any>>
    %c0_i32_430 = arith.constant 0 : i32
    %c47_i32_431 = arith.constant 47 : i32
    %c0_i32_432 = arith.constant 0 : i32
    %385 = tpu.memref_slice %arg3[%c0_i32_430, %c47_i32_431, %c0_i32_432] : memref<1x48x256xf32, #tpu.memory_space<vmem>> -> memref<1x1x256xf32, #tpu.memory_space<vmem>>
    %386 = tpu.memref_slice %arg4[%c7_i32_428] : memref<8x!tpu.dma_semaphore, #tpu.memory_space<semaphore_mem>> -> memref<1x!tpu.dma_semaphore, #tpu.memory_space<semaphore_mem>>
    %387 = tpu.memref_squeeze %386 : memref<1x!tpu.dma_semaphore, #tpu.memory_space<semaphore_mem>> -> memref<!tpu.dma_semaphore, #tpu.memory_space<semaphore_mem>>
    tpu.wait_dma2 semaphore(%387 : memref<!tpu.dma_semaphore, #tpu.memory_space<semaphore_mem>>) src(%384 : memref<1x1x256xf32, #tpu.memory_space<any>>) dst(%385 : memref<1x1x256xf32, #tpu.memory_space<vmem>>)
    return
  }
  func.func @transform_1(%arg0: i32, %arg1: i32) -> (i32, i32, i32) {
    %c0_i32 = arith.constant 0 : i32
    %c0_i32_0 = arith.constant 0 : i32
    return %arg0, %c0_i32, %arg1 : i32, i32, i32
  }
}

</mosaic_0001>

<bundles_post_ra>
// kernel: tpu_custom_call.1
= control target key start
LH: loop header
LB: loop body
LE: loop exit
PB: predicated region body
PF: predicated region fallthrough
CT: control target
= control target key end

     0   :  { %6 = vsyncpa [#allocation4], 0  ;;  %s2883_s0 = inlined_call_operand.hbm [shape: f32[2,48,256], index: 0, kind: input, shape index: {}]   ;;  %s2884_s1 = inlined_call_operand.hbm [shape: f32[2,48,256], index: 1, kind: output, shape index: {}]  }
   0x1   :  { %8 = vsyncpa [#allocation4 + $0x1], 0  ;;  %s2442_s6 = smov 0   ;;  %s2444_s7 = smov 0  }
   0x2   :  { %s2446_s8 = smov 0   ;;  %s2448_s9 = smov 0  }
   0x3 LB: > { %s23_s10 = sadd.s32 1, %s2421_s8  ;;  %s1058_s11 = sadd.s32 4294967295, %s2425_s9   ;;  %s2425_s9 = sphi %s2448_s9, %s14_s9   ;;  %s2421_s8 = sphi %s2446_s8, %s2889_s8   ;;  %s2417_s7 = sphi %s2444_s7, %s2888_s7   ;;  %s2413_s6 = sphi %s2442_s6, %s2887_s6  }
   0x4   : > { %p25_p0 = scmp.ge.s32.totalorder %s23_s10, 2  ;;  %p41_p1 = scmp.ne.s32.totalorder %s2417_s7, %s2413_s6 }
   0x5   : > { %s32_s12 = sadd.s32 1, %s2417_s7  ;;  %p42_p2 = scmp.eq.s32.totalorder %s1058_s11, 1 }
   0x6   : > { %s2891_s10 = smov (%p25_p0, %s23_s10), 0  ;;  %p36_p3 = scmp.eq.s32.totalorder %s2425_s9, 1 }
   0x7   : > { %s27_s13 = ssub.s32 %s2421_s8, %s2891_s10  ;;  %p2472_p6 = por %p42_p2, %p41_p1 }
   0x8   : > { %p30_p4 = scmp.eq.s32.totalorder %s27_s13, 0  ;;  %p1059_p5 = scmp.ne.s32.totalorder %s27_s13, 0 }
   0x9   : > { %p1060_p8 = scmp.ge.s32.totalorder %s2425_s9, 2 }
   0xa   : > { %s2477_s15 = scalar_select %p30_p4, %s2417_s7, %s32_s12  }
   0xb   : > { %p2479_p7 = por %p1059_p5, %p36_p3  ;;  %51 = sbr.rel (%p1060_p8) target bundleno = 651 (0x28b), region = 12 }
   0xc   : > { %s56_s17 = sand.u32 (!%p1060_p8), 1, %s2417_s7   ;;  %s1120_s18 = smul.u32 (!%p1060_p8), 1536, %s2421_s8 }
   0xd   : > { %s1121_s19 = smul.u32 (!%p1060_p8), 96, %s56_s17  ;;  %s2427_s29 = smov (!%p1060_p8), [#allocation3]  }
   0xe   : > { %s2493_s22 = scalar_lea.hbm (!%p1060_p8), %s2883_s0, %s1120_s18  ;;  %s1178_s30 = sshll.u32 (!%p1060_p8), %s2427_s29, 4  ;;  %s2504_s30 = int_to_ptr.vmem [resolvable:$false] %s1178_s30 }
   0xf   : > { %s756_s23 = scalar_lea.hbm (!%p1060_p8), %s2493_s22, 784  ;;  %s2496_s24 = scalar_lea.vmem (!%p1060_p8), [#allocation3], %s1121_s19 }
  0x10   : > { %s69_s25 = sshll.u32 %s2496_s24, 4  ;;  %s77_s26 = scalar_lea.vmem %s2496_s24, 1 [#allocation3]  ;;  %s2500_s25 = int_to_ptr.vmem [resolvable:$true] %s69_s25 }
  0x11   : > { %s80_s27 = sshll.u32 %s77_s26, 4  ;;  %s1176_s28 = scalar_lea.vmem %s2500_s25, 32  ;;  %s81_s27 = int_to_ptr.vmem [resolvable:$true] %s80_s27 }
  0x12   : > { %p1177_p9 = scmp.ne.s32.totalorder %s2500_s25, %s1176_s28  ;;  %s2507_s2 = scalar_lea.vmem %s2504_s30, 3072 }
  0x13   : > { %p1181_p10 = scmp.lt.s32.totalorder %s2500_s25, %s2504_s30  ;;  %p1182_p11 = scmp.lt.s32.totalorder %s2507_s2, %s1176_s28 }
  0x15   : > { %p1183_p12 = por %p1182_p11, %p1181_p10 }
  0x17   : > { %p1184_p13 = pnand %p1183_p12, %p1177_p9 }
  0x19   : > { %1187 = shalt.err (!%p1184_p13)  }
  0x1a   : > { %s2428_s3 = smov 128   ;;  %s2429_s4 = smov 1  }
  0x1b   : > { %72 = dma.hbm_to_vmem [thread:$0]  %s2493_s22, 32, %s2500_s25, [#allocation2], %s2428_s3, %s2428_s3, %s2429_s4 }
  0x1c   : > { %s762_s5 = scalar_lea.hbm %s2493_s22, 48  ;;  %s1198_s11 = scalar_lea.vmem %s81_s27, 32 }
  0x1d   : > { %p1199_p0 = scmp.ne.s32.totalorder %s81_s27, %s1198_s11  ;;  %p1203_p1 = scmp.lt.s32.totalorder %s81_s27, %s2504_s30 }
  0x1e   : > { %p1204_p2 = scmp.lt.s32.totalorder %s2507_s2, %s1198_s11 }
  0x20   : > { %p1205_p3 = por %p1204_p2, %p1203_p1 }
  0x22   : > { %p1206_p4 = pnand %p1205_p3, %p1199_p0 }
  0x24   : > { %1209 = shalt.err (!%p1206_p4)  }
  0x25   : > { %83 = dma.hbm_to_vmem [thread:$0]  %s756_s23, 32, %s81_s27, [#allocation2 + $0x1], %s2428_s3, %s2428_s3, %s2429_s4 }
  0x26   : > { %s88_s12 = scalar_lea.vmem %s2496_s24, 2 [#allocation3]  ;;  %s768_s13 = scalar_lea.hbm %s2493_s22, 832 }
  0x27   : > { %s91_s19 = sshll.u32 %s88_s12, 4  ;;  %s99_s20 = scalar_lea.vmem %s2496_s24, 3 [#allocation3]  ;;  %s92_s19 = int_to_ptr.vmem [resolvable:$true] %s91_s19 }
  0x28   : > { %s102_s21 = sshll.u32 %s99_s20, 4  ;;  %s1221_s26 = scalar_lea.vmem %s92_s19, 32  ;;  %s103_s21 = int_to_ptr.vmem [resolvable:$true] %s102_s21 }
  0x29   : > { %p1222_p5 = scmp.ne.s32.totalorder %s92_s19, %s1221_s26  ;;  %p1226_p8 = scmp.lt.s32.totalorder %s92_s19, %s2504_s30 }
  0x2a   : > { %p1227_p9 = scmp.lt.s32.totalorder %s2507_s2, %s1221_s26 }
  0x2c   : > { %p1228_p11 = por %p1227_p9, %p1226_p8 }
  0x2e   : > { %p1229_p12 = pnand %p1228_p11, %p1222_p5 }
  0x30   : > { %1232 = shalt.err (!%p1229_p12)  }
  0x31   : > { %94 = dma.hbm_to_vmem [thread:$0]  %s762_s5, 32, %s92_s19, [#allocation2 + $0x2], %s2428_s3, %s2428_s3, %s2429_s4 }
  0x32   : > { %s774_s23 = scalar_lea.hbm %s2493_s22, 96  ;;  %s1244_s27 = scalar_lea.vmem %s103_s21, 32 }
  0x33   : > { %p1245_p13 = scmp.ne.s32.totalorder %s103_s21, %s1244_s27  ;;  %p1249_p0 = scmp.lt.s32.totalorder %s103_s21, %s2504_s30 }
  0x34   : > { %p1250_p1 = scmp.lt.s32.totalorder %s2507_s2, %s1244_s27 }
  0x36   : > { %p1251_p2 = por %p1250_p1, %p1249_p0 }
  0x38   : > { %p1252_p3 = pnand %p1251_p2, %p1245_p13 }
  0x3a   : > { %1255 = shalt.err (!%p1252_p3)  }
  0x3b   : > { %105 = dma.hbm_to_vmem [thread:$0]  %s768_s13, 32, %s103_s21, [#allocation2 + $0x3], %s2428_s3, %s2428_s3, %s2429_s4 }
  0x3c   : > { %s110_s28 = scalar_lea.vmem %s2496_s24, 4 [#allocation3]  ;;  %s780_s29 = scalar_lea.hbm %s2493_s22, 880 }
  0x3d   : > { %s113_s5 = sshll.u32 %s110_s28, 4  ;;  %s121_s11 = scalar_lea.vmem %s2496_s24, 5 [#allocation3]  ;;  %s114_s5 = int_to_ptr.vmem [resolvable:$true] %s113_s5 }
  0x3e   : > { %s124_s12 = sshll.u32 %s121_s11, 4  ;;  %s1267_s19 = scalar_lea.vmem %s114_s5, 32  ;;  %s125_s12 = int_to_ptr.vmem [resolvable:$true] %s124_s12 }
  0x3f   : > { %p1268_p4 = scmp.ne.s32.totalorder %s114_s5, %s1267_s19  ;;  %p1272_p5 = scmp.lt.s32.totalorder %s114_s5, %s2504_s30 }
  0x40   : > { %p1273_p8 = scmp.lt.s32.totalorder %s2507_s2, %s1267_s19 }
  0x42   : > { %p1274_p9 = por %p1273_p8, %p1272_p5 }
  0x44   : > { %p1275_p11 = pnand %p1274_p9, %p1268_p4 }
  0x46   : > { %1278 = shalt.err (!%p1275_p11)  }
  0x47   : > { %116 = dma.hbm_to_vmem [thread:$0]  %s774_s23, 32, %s114_s5, [#allocation2 + $0x4], %s2428_s3, %s2428_s3, %s2429_s4 }
  0x48   : > { %s786_s13 = scalar_lea.hbm %s2493_s22, 272  ;;  %s1290_s20 = scalar_lea.vmem %s125_s12, 32 }
  0x49   : > { %p1291_p12 = scmp.ne.s32.totalorder %s125_s12, %s1290_s20  ;;  %p1295_p13 = scmp.lt.s32.totalorder %s125_s12, %s2504_s30 }
  0x4a   : > { %p1296_p0 = scmp.lt.s32.totalorder %s2507_s2, %s1290_s20 }
  0x4c   : > { %p1297_p1 = por %p1296_p0, %p1295_p13 }
  0x4e   : > { %p1298_p2 = pnand %p1297_p1, %p1291_p12 }
  0x50   : > { %1301 = shalt.err (!%p1298_p2)  }
  0x51   : > { %127 = dma.hbm_to_vmem [thread:$0]  %s780_s29, 32, %s125_s12, [#allocation2 + $0x5], %s2428_s3, %s2428_s3, %s2429_s4 }
  0x52   : > { %s132_s21 = scalar_lea.vmem %s2496_s24, 6 [#allocation3]  ;;  %s792_s26 = scalar_lea.hbm %s2493_s22, 1056 }
  0x53   : > { %s135_s23 = sshll.u32 %s132_s21, 4  ;;  %s143_s27 = scalar_lea.vmem %s2496_s24, 7 [#allocation3]  ;;  %s136_s23 = int_to_ptr.vmem [resolvable:$true] %s135_s23 }
  0x54   : > { %s146_s28 = sshll.u32 %s143_s27, 4  ;;  %s1313_s5 = scalar_lea.vmem %s136_s23, 32  ;;  %s147_s28 = int_to_ptr.vmem [resolvable:$true] %s146_s28 }
  0x55   : > { %p1314_p3 = scmp.ne.s32.totalorder %s136_s23, %s1313_s5  ;;  %p1318_p4 = scmp.lt.s32.totalorder %s136_s23, %s2504_s30 }
  0x56   : > { %p1319_p5 = scmp.lt.s32.totalorder %s2507_s2, %s1313_s5 }
  0x58   : > { %p1320_p8 = por %p1319_p5, %p1318_p4 }
  0x5a   : > { %p1321_p9 = pnand %p1320_p8, %p1314_p3 }
  0x5c   : > { %1324 = shalt.err (!%p1321_p9)  }
  0x5d   : > { %138 = dma.hbm_to_vmem [thread:$0]  %s786_s13, 32, %s136_s23, [#allocation2 + $0x6], %s2428_s3, %s2428_s3, %s2429_s4 }
  0x5e   : > { %s798_s29 = scalar_lea.hbm %s2493_s22, 320  ;;  %s1336_s11 = scalar_lea.vmem %s147_s28, 32 }
  0x5f   : > { %p1337_p11 = scmp.ne.s32.totalorder %s147_s28, %s1336_s11  ;;  %p1341_p12 = scmp.lt.s32.totalorder %s147_s28, %s2504_s30 }
  0x60   : > { %p1342_p13 = scmp.lt.s32.totalorder %s2507_s2, %s1336_s11 }
  0x62   : > { %p1343_p0 = por %p1342_p13, %p1341_p12 }
  0x64   : > { %p1344_p1 = pnand %p1343_p0, %p1337_p11 }
  0x66   : > { %1347 = shalt.err (!%p1344_p1)  }
  0x67   : > { %149 = dma.hbm_to_vmem [thread:$0]  %s792_s26, 32, %s147_s28, [#allocation2 + $0x7], %s2428_s3, %s2428_s3, %s2429_s4 }
  0x68   : > { %s154_s12 = scalar_lea.vmem %s2496_s24, 16 [#allocation3]  ;;  %s804_s19 = scalar_lea.hbm %s2493_s22, 1104 }
  0x69   : > { %s156_s13 = sshll.u32 %s154_s12, 4  ;;  %s164_s20 = scalar_lea.vmem %s2496_s24, 17 [#allocation3]  ;;  %s157_s13 = int_to_ptr.vmem [resolvable:$true] %s156_s13 }
  0x6a   : > { %s166_s21 = sshll.u32 %s164_s20, 4  ;;  %s1359_s23 = scalar_lea.vmem %s157_s13, 32  ;;  %s167_s21 = int_to_ptr.vmem [resolvable:$true] %s166_s21 }
  0x6b   : > { %p1360_p2 = scmp.ne.s32.totalorder %s157_s13, %s1359_s23  ;;  %p1364_p3 = scmp.lt.s32.totalorder %s157_s13, %s2504_s30 }
  0x6c   : > { %p1365_p4 = scmp.lt.s32.totalorder %s2507_s2, %s1359_s23 }
  0x6e   : > { %p1366_p5 = por %p1365_p4, %p1364_p3 }
  0x70   : > { %p1367_p8 = pnand %p1366_p5, %p1360_p2 }
  0x72   : > { %1370 = shalt.err (!%p1367_p8)  }
  0x73   : > { %159 = dma.hbm_to_vmem [thread:$0]  %s798_s29, 32, %s157_s13, [#allocation2], %s2428_s3, %s2428_s3, %s2429_s4 }
  0x74   : > { %s810_s26 = scalar_lea.hbm %s2493_s22, 368  ;;  %s1382_s27 = scalar_lea.vmem %s167_s21, 32 }
  0x75   : > { %p1383_p9 = scmp.ne.s32.totalorder %s167_s21, %s1382_s27  ;;  %p1387_p11 = scmp.lt.s32.totalorder %s167_s21, %s2504_s30 }
  0x76   : > { %p1388_p12 = scmp.lt.s32.totalorder %s2507_s2, %s1382_s27 }
  0x78   : > { %p1389_p13 = por %p1388_p12, %p1387_p11 }
  0x7a   : > { %p1390_p0 = pnand %p1389_p13, %p1383_p9 }
  0x7c   : > { %1393 = shalt.err (!%p1390_p0)  }
  0x7d   : > { %169 = dma.hbm_to_vmem [thread:$0]  %s804_s19, 32, %s167_s21, [#allocation2 + $0x1], %s2428_s3, %s2428_s3, %s2429_s4 }
  0x7e   : > { %s174_s28 = scalar_lea.vmem %s2496_s24, 18 [#allocation3]  ;;  %s816_s5 = scalar_lea.hbm %s2493_s22, 1280 }
  0x7f   : > { %s176_s29 = sshll.u32 %s174_s28, 4  ;;  %s184_s11 = scalar_lea.vmem %s2496_s24, 19 [#allocation3]  ;;  %s177_s29 = int_to_ptr.vmem [resolvable:$true] %s176_s29 }
  0x80   : > { %s186_s12 = sshll.u32 %s184_s11, 4  ;;  %s1405_s13 = scalar_lea.vmem %s177_s29, 32  ;;  %s187_s12 = int_to_ptr.vmem [resolvable:$true] %s186_s12 }
  0x81   : > { %p1406_p1 = scmp.ne.s32.totalorder %s177_s29, %s1405_s13  ;;  %p1410_p2 = scmp.lt.s32.totalorder %s177_s29, %s2504_s30 }
  0x82   : > { %p1411_p3 = scmp.lt.s32.totalorder %s2507_s2, %s1405_s13 }
  0x84   : > { %p1412_p4 = por %p1411_p3, %p1410_p2 }
  0x86   : > { %p1413_p5 = pnand %p1412_p4, %p1406_p1 }
  0x88   : > { %1416 = shalt.err (!%p1413_p5)  }
  0x89   : > { %179 = dma.hbm_to_vmem [thread:$0]  %s810_s26, 32, %s177_s29, [#allocation2 + $0x2], %s2428_s3, %s2428_s3, %s2429_s4 }
  0x8a   : > { %s822_s19 = scalar_lea.hbm %s2493_s22, 544  ;;  %s1428_s20 = scalar_lea.vmem %s187_s12, 32 }
  0x8b   : > { %p1429_p8 = scmp.ne.s32.totalorder %s187_s12, %s1428_s20  ;;  %p1433_p9 = scmp.lt.s32.totalorder %s187_s12, %s2504_s30 }
  0x8c   : > { %p1434_p11 = scmp.lt.s32.totalorder %s2507_s2, %s1428_s20 }
  0x8e   : > { %p1435_p12 = por %p1434_p11, %p1433_p9 }
  0x90   : > { %p1436_p13 = pnand %p1435_p12, %p1429_p8 }
  0x92   : > { %1439 = shalt.err (!%p1436_p13)  }
  0x93   : > { %189 = dma.hbm_to_vmem [thread:$0]  %s816_s5, 32, %s187_s12, [#allocation2 + $0x3], %s2428_s3, %s2428_s3, %s2429_s4 }
  0x94   : > { %s194_s21 = scalar_lea.vmem %s2496_s24, 20 [#allocation3]  ;;  %s828_s23 = scalar_lea.hbm %s2493_s22, 1328 }
  0x95   : > { %s196_s26 = sshll.u32 %s194_s21, 4  ;;  %s204_s27 = scalar_lea.vmem %s2496_s24, 21 [#allocation3]  ;;  %s197_s26 = int_to_ptr.vmem [resolvable:$true] %s196_s26 }
  0x96   : > { %s206_s28 = sshll.u32 %s204_s27, 4  ;;  %s1451_s29 = scalar_lea.vmem %s197_s26, 32  ;;  %s207_s28 = int_to_ptr.vmem [resolvable:$true] %s206_s28 }
  0x97   : > { %p1452_p0 = scmp.ne.s32.totalorder %s197_s26, %s1451_s29  ;;  %p1456_p1 = scmp.lt.s32.totalorder %s197_s26, %s2504_s30 }
  0x98   : > { %p1457_p2 = scmp.lt.s32.totalorder %s2507_s2, %s1451_s29 }
  0x9a   : > { %p1458_p3 = por %p1457_p2, %p1456_p1 }
  0x9c   : > { %p1459_p4 = pnand %p1458_p3, %p1452_p0 }
  0x9e   : > { %1462 = shalt.err (!%p1459_p4)  }
  0x9f   : > { %199 = dma.hbm_to_vmem [thread:$0]  %s822_s19, 32, %s197_s26, [#allocation2 + $0x4], %s2428_s3, %s2428_s3, %s2429_s4 }
  0xa0   : > { %s834_s5 = scalar_lea.hbm %s2493_s22, 592  ;;  %s1474_s11 = scalar_lea.vmem %s207_s28, 32 }
  0xa1   : > { %p1475_p5 = scmp.ne.s32.totalorder %s207_s28, %s1474_s11  ;;  %p1479_p8 = scmp.lt.s32.totalorder %s207_s28, %s2504_s30 }
  0xa2   : > { %p1480_p9 = scmp.lt.s32.totalorder %s2507_s2, %s1474_s11 }
  0xa4   : > { %p1481_p11 = por %p1480_p9, %p1479_p8 }
  0xa6   : > { %p1482_p12 = pnand %p1481_p11, %p1475_p5 }
  0xa8   : > { %1485 = shalt.err (!%p1482_p12)  }
  0xa9   : > { %209 = dma.hbm_to_vmem [thread:$0]  %s828_s23, 32, %s207_s28, [#allocation2 + $0x5], %s2428_s3, %s2428_s3, %s2429_s4 }
  0xaa   : > { %s214_s12 = scalar_lea.vmem %s2496_s24, 22 [#allocation3]  ;;  %s840_s13 = scalar_lea.hbm %s2493_s22, 1376 }
  0xab   : > { %s216_s19 = sshll.u32 %s214_s12, 4  ;;  %s224_s20 = scalar_lea.vmem %s2496_s24, 23 [#allocation3]  ;;  %s217_s19 = int_to_ptr.vmem [resolvable:$true] %s216_s19 }
  0xac   : > { %s226_s21 = sshll.u32 %s224_s20, 4  ;;  %s1497_s26 = scalar_lea.vmem %s217_s19, 32  ;;  %s227_s21 = int_to_ptr.vmem [resolvable:$true] %s226_s21 }
  0xad   : > { %p1498_p13 = scmp.ne.s32.totalorder %s217_s19, %s1497_s26  ;;  %p1502_p0 = scmp.lt.s32.totalorder %s217_s19, %s2504_s30 }
  0xae   : > { %p1503_p1 = scmp.lt.s32.totalorder %s2507_s2, %s1497_s26 }
  0xb0   : > { %p1504_p2 = por %p1503_p1, %p1502_p0 }
  0xb2   : > { %p1505_p3 = pnand %p1504_p2, %p1498_p13 }
  0xb4   : > { %1508 = shalt.err (!%p1505_p3)  }
  0xb5   : > { %219 = dma.hbm_to_vmem [thread:$0]  %s834_s5, 32, %s217_s19, [#allocation2 + $0x6], %s2428_s3, %s2428_s3, %s2429_s4 }
  0xb6   : > { %s846_s23 = scalar_lea.hbm %s2493_s22, 768  ;;  %s1520_s27 = scalar_lea.vmem %s227_s21, 32 }
  0xb7   : > { %p1521_p4 = scmp.ne.s32.totalorder %s227_s21, %s1520_s27  ;;  %p1525_p5 = scmp.lt.s32.totalorder %s227_s21, %s2504_s30 }
  0xb8   : > { %p1526_p8 = scmp.lt.s32.totalorder %s2507_s2, %s1520_s27 }
  0xba   : > { %p1527_p9 = por %p1526_p8, %p1525_p5 }
  0xbc   : > { %p1528_p11 = pnand %p1527_p9, %p1521_p4 }
  0xbe   : > { %1531 = shalt.err (!%p1528_p11)  }
  0xbf   : > { %229 = dma.hbm_to_vmem [thread:$0]  %s840_s13, 32, %s227_s21, [#allocation2 + $0x7], %s2428_s3, %s2428_s3, %s2429_s4 }
  0xc0   : > { %s234_s28 = scalar_lea.vmem %s2496_s24, 32 [#allocation3]  ;;  %s852_s29 = scalar_lea.hbm %s2493_s22, 32 }
  0xc1   : > { %s236_s5 = sshll.u32 %s234_s28, 4  ;;  %s244_s11 = scalar_lea.vmem %s2496_s24, 33 [#allocation3]  ;;  %s237_s5 = int_to_ptr.vmem [resolvable:$true] %s236_s5 }
  0xc2   : > { %s246_s12 = sshll.u32 %s244_s11, 4  ;;  %s1543_s19 = scalar_lea.vmem %s237_s5, 32  ;;  %s247_s12 = int_to_ptr.vmem [resolvable:$true] %s246_s12 }
  0xc3   : > { %p1544_p12 = scmp.ne.s32.totalorder %s237_s5, %s1543_s19  ;;  %p1548_p13 = scmp.lt.s32.totalorder %s237_s5, %s2504_s30 }
  0xc4   : > { %p1549_p0 = scmp.lt.s32.totalorder %s2507_s2, %s1543_s19 }
  0xc6   : > { %p1550_p1 = por %p1549_p0, %p1548_p13 }
  0xc8   : > { %p1551_p2 = pnand %p1550_p1, %p1544_p12 }
  0xca   : > { %1554 = shalt.err (!%p1551_p2)  }
  0xcb   : > { %239 = dma.hbm_to_vmem [thread:$0]  %s846_s23, 32, %s237_s5, [#allocation2], %s2428_s3, %s2428_s3, %s2429_s4 }
  0xcc   : > { %s858_s13 = scalar_lea.hbm %s2493_s22, 816  ;;  %s1566_s20 = scalar_lea.vmem %s247_s12, 32 }
  0xcd   : > { %p1567_p3 = scmp.ne.s32.totalorder %s247_s12, %s1566_s20  ;;  %p1571_p4 = scmp.lt.s32.totalorder %s247_s12, %s2504_s30 }
  0xce   : > { %p1572_p5 = scmp.lt.s32.totalorder %s2507_s2, %s1566_s20 }
  0xd0   : > { %p1573_p8 = por %p1572_p5, %p1571_p4 }
  0xd2   : > { %p1574_p9 = pnand %p1573_p8, %p1567_p3 }
  0xd4   : > { %1577 = shalt.err (!%p1574_p9)  }
  0xd5   : > { %249 = dma.hbm_to_vmem [thread:$0]  %s852_s29, 32, %s247_s12, [#allocation2 + $0x1], %s2428_s3, %s2428_s3, %s2429_s4 }
  0xd6   : > { %s254_s21 = scalar_lea.vmem %s2496_s24, 34 [#allocation3]  ;;  %s864_s26 = scalar_lea.hbm %s2493_s22, 80 }
  0xd7   : > { %s256_s23 = sshll.u32 %s254_s21, 4  ;;  %s264_s27 = scalar_lea.vmem %s2496_s24, 35 [#allocation3]  ;;  %s257_s23 = int_to_ptr.vmem [resolvable:$true] %s256_s23 }
  0xd8   : > { %s266_s28 = sshll.u32 %s264_s27, 4  ;;  %s1589_s5 = scalar_lea.vmem %s257_s23, 32  ;;  %s267_s28 = int_to_ptr.vmem [resolvable:$true] %s266_s28 }
  0xd9   : > { %p1590_p11 = scmp.ne.s32.totalorder %s257_s23, %s1589_s5  ;;  %p1594_p12 = scmp.lt.s32.totalorder %s257_s23, %s2504_s30 }
  0xda   : > { %p1595_p13 = scmp.lt.s32.totalorder %s2507_s2, %s1589_s5 }
  0xdc   : > { %p1596_p0 = por %p1595_p13, %p1594_p12 }
  0xde   : > { %p1597_p1 = pnand %p1596_p0, %p1590_p11 }
  0xe0   : > { %1600 = shalt.err (!%p1597_p1)  }
  0xe1   : > { %259 = dma.hbm_to_vmem [thread:$0]  %s858_s13, 32, %s257_s23, [#allocation2 + $0x2], %s2428_s3, %s2428_s3, %s2429_s4 }
  0xe2   : > { %s870_s29 = scalar_lea.hbm %s2493_s22, 864  ;;  %s1612_s11 = scalar_lea.vmem %s267_s28, 32 }
  0xe3   : > { %p1613_p2 = scmp.ne.s32.totalorder %s267_s28, %s1612_s11  ;;  %p1617_p3 = scmp.lt.s32.totalorder %s267_s28, %s2504_s30 }
  0xe4   : > { %p1618_p4 = scmp.lt.s32.totalorder %s2507_s2, %s1612_s11 }
  0xe6   : > { %p1619_p5 = por %p1618_p4, %p1617_p3 }
  0xe8   : > { %p1620_p8 = pnand %p1619_p5, %p1613_p2 }
  0xea   : > { %1623 = shalt.err (!%p1620_p8)  }
  0xeb   : > { %269 = dma.hbm_to_vmem [thread:$0]  %s864_s26, 32, %s267_s28, [#allocation2 + $0x3], %s2428_s3, %s2428_s3, %s2429_s4 }
  0xec   : > { %s274_s12 = scalar_lea.vmem %s2496_s24, 36 [#allocation3]  ;;  %s876_s19 = scalar_lea.hbm %s2493_s22, 256 }
  0xed   : > { %s276_s13 = sshll.u32 %s274_s12, 4  ;;  %s284_s20 = scalar_lea.vmem %s2496_s24, 37 [#allocation3]  ;;  %s277_s13 = int_to_ptr.vmem [resolvable:$true] %s276_s13 }
  0xee   : > { %s286_s21 = sshll.u32 %s284_s20, 4  ;;  %s1635_s23 = scalar_lea.vmem %s277_s13, 32  ;;  %s287_s21 = int_to_ptr.vmem [resolvable:$true] %s286_s21 }
  0xef   : > { %p1636_p9 = scmp.ne.s32.totalorder %s277_s13, %s1635_s23  ;;  %p1640_p11 = scmp.lt.s32.totalorder %s277_s13, %s2504_s30 }
  0xf0   : > { %p1641_p12 = scmp.lt.s32.totalorder %s2507_s2, %s1635_s23 }
  0xf2   : > { %p1642_p13 = por %p1641_p12, %p1640_p11 }
  0xf4   : > { %p1643_p0 = pnand %p1642_p13, %p1636_p9 }
  0xf6   : > { %1646 = shalt.err (!%p1643_p0)  }
  0xf7   : > { %279 = dma.hbm_to_vmem [thread:$0]  %s870_s29, 32, %s277_s13, [#allocation2 + $0x4], %s2428_s3, %s2428_s3, %s2429_s4 }
  0xf8   : > { %s882_s26 = scalar_lea.hbm %s2493_s22, 1040  ;;  %s1658_s27 = scalar_lea.vmem %s287_s21, 32 }
  0xf9   : > { %p1659_p1 = scmp.ne.s32.totalorder %s287_s21, %s1658_s27  ;;  %p1663_p2 = scmp.lt.s32.totalorder %s287_s21, %s2504_s30 }
  0xfa   : > { %p1664_p3 = scmp.lt.s32.totalorder %s2507_s2, %s1658_s27 }
  0xfc   : > { %p1665_p4 = por %p1664_p3, %p1663_p2 }
  0xfe   : > { %p1666_p5 = pnand %p1665_p4, %p1659_p1 }
 0x100   : > { %1669 = shalt.err (!%p1666_p5)  }
 0x101   : > { %289 = dma.hbm_to_vmem [thread:$0]  %s876_s19, 32, %s287_s21, [#allocation2 + $0x5], %s2428_s3, %s2428_s3, %s2429_s4 }
 0x102   : > { %s294_s28 = scalar_lea.vmem %s2496_s24, 38 [#allocation3]  ;;  %s888_s5 = scalar_lea.hbm %s2493_s22, 304 }
 0x103   : > { %s296_s29 = sshll.u32 %s294_s28, 4  ;;  %s304_s11 = scalar_lea.vmem %s2496_s24, 39 [#allocation3]  ;;  %s297_s29 = int_to_ptr.vmem [resolvable:$true] %s296_s29 }
 0x104   : > { %s306_s12 = sshll.u32 %s304_s11, 4  ;;  %s1681_s13 = scalar_lea.vmem %s297_s29, 32  ;;  %s307_s12 = int_to_ptr.vmem [resolvable:$true] %s306_s12 }
 0x105   : > { %p1682_p8 = scmp.ne.s32.totalorder %s297_s29, %s1681_s13  ;;  %p1686_p9 = scmp.lt.s32.totalorder %s297_s29, %s2504_s30 }
 0x106   : > { %p1687_p11 = scmp.lt.s32.totalorder %s2507_s2, %s1681_s13 }
 0x108   : > { %p1688_p12 = por %p1687_p11, %p1686_p9 }
 0x10a   : > { %p1689_p13 = pnand %p1688_p12, %p1682_p8 }
 0x10c   : > { %1692 = shalt.err (!%p1689_p13)  }
 0x10d   : > { %299 = dma.hbm_to_vmem [thread:$0]  %s882_s26, 32, %s297_s29, [#allocation2 + $0x6], %s2428_s3, %s2428_s3, %s2429_s4 }
 0x10e   : > { %s894_s19 = scalar_lea.hbm %s2493_s22, 1088  ;;  %s1704_s20 = scalar_lea.vmem %s307_s12, 32 }
 0x10f   : > { %p1705_p0 = scmp.ne.s32.totalorder %s307_s12, %s1704_s20  ;;  %p1709_p1 = scmp.lt.s32.totalorder %s307_s12, %s2504_s30 }
 0x110   : > { %p1710_p2 = scmp.lt.s32.totalorder %s2507_s2, %s1704_s20 }
 0x112   : > { %p1711_p3 = por %p1710_p2, %p1709_p1 }
 0x114   : > { %p1712_p4 = pnand %p1711_p3, %p1705_p0 }
 0x116   : > { %1715 = shalt.err (!%p1712_p4)  }
 0x117   : > { %309 = dma.hbm_to_vmem [thread:$0]  %s888_s5, 32, %s307_s12, [#allocation2 + $0x7], %s2428_s3, %s2428_s3, %s2429_s4 }
 0x118   : > { %s314_s21 = scalar_lea.vmem %s2496_s24, 48 [#allocation3]  ;;  %s900_s23 = scalar_lea.hbm %s2493_s22, 352 }
 0x119   : > { %s316_s26 = sshll.u32 %s314_s21, 4  ;;  %s324_s27 = scalar_lea.vmem %s2496_s24, 49 [#allocation3]  ;;  %s317_s26 = int_to_ptr.vmem [resolvable:$true] %s316_s26 }
 0x11a   : > { %s326_s28 = sshll.u32 %s324_s27, 4  ;;  %s1727_s29 = scalar_lea.vmem %s317_s26, 32  ;;  %s327_s28 = int_to_ptr.vmem [resolvable:$true] %s326_s28 }
 0x11b   : > { %p1728_p5 = scmp.ne.s32.totalorder %s317_s26, %s1727_s29  ;;  %p1732_p8 = scmp.lt.s32.totalorder %s317_s26, %s2504_s30 }
 0x11c   : > { %p1733_p9 = scmp.lt.s32.totalorder %s2507_s2, %s1727_s29 }
 0x11e   : > { %p1734_p11 = por %p1733_p9, %p1732_p8 }
 0x120   : > { %p1735_p12 = pnand %p1734_p11, %p1728_p5 }
 0x122   : > { %1738 = shalt.err (!%p1735_p12)  }
 0x123   : > { %319 = dma.hbm_to_vmem [thread:$0]  %s894_s19, 32, %s317_s26, [#allocation2], %s2428_s3, %s2428_s3, %s2429_s4 }
 0x124   : > { %s906_s5 = scalar_lea.hbm %s2493_s22, 1136  ;;  %s1750_s11 = scalar_lea.vmem %s327_s28, 32 }
 0x125   : > { %p1751_p13 = scmp.ne.s32.totalorder %s327_s28, %s1750_s11  ;;  %p1755_p0 = scmp.lt.s32.totalorder %s327_s28, %s2504_s30 }
 0x126   : > { %p1756_p1 = scmp.lt.s32.totalorder %s2507_s2, %s1750_s11 }
 0x128   : > { %p1757_p2 = por %p1756_p1, %p1755_p0 }
 0x12a   : > { %p1758_p3 = pnand %p1757_p2, %p1751_p13 }
 0x12c   : > { %1761 = shalt.err (!%p1758_p3)  }
 0x12d   : > { %329 = dma.hbm_to_vmem [thread:$0]  %s900_s23, 32, %s327_s28, [#allocation2 + $0x1], %s2428_s3, %s2428_s3, %s2429_s4 }
 0x12e   : > { %s334_s12 = scalar_lea.vmem %s2496_s24, 50 [#allocation3]  ;;  %s912_s13 = scalar_lea.hbm %s2493_s22, 528 }
 0x12f   : > { %s336_s19 = sshll.u32 %s334_s12, 4  ;;  %s344_s20 = scalar_lea.vmem %s2496_s24, 51 [#allocation3]  ;;  %s337_s19 = int_to_ptr.vmem [resolvable:$true] %s336_s19 }
 0x130   : > { %s346_s21 = sshll.u32 %s344_s20, 4  ;;  %s1773_s26 = scalar_lea.vmem %s337_s19, 32  ;;  %s347_s21 = int_to_ptr.vmem [resolvable:$true] %s346_s21 }
 0x131   : > { %p1774_p4 = scmp.ne.s32.totalorder %s337_s19, %s1773_s26  ;;  %p1778_p5 = scmp.lt.s32.totalorder %s337_s19, %s2504_s30 }
 0x132   : > { %p1779_p8 = scmp.lt.s32.totalorder %s2507_s2, %s1773_s26 }
 0x134   : > { %p1780_p9 = por %p1779_p8, %p1778_p5 }
 0x136   : > { %p1781_p11 = pnand %p1780_p9, %p1774_p4 }
 0x138   : > { %1784 = shalt.err (!%p1781_p11)  }
 0x139   : > { %339 = dma.hbm_to_vmem [thread:$0]  %s906_s5, 32, %s337_s19, [#allocation2 + $0x2], %s2428_s3, %s2428_s3, %s2429_s4 }
 0x13a   : > { %s918_s23 = scalar_lea.hbm %s2493_s22, 1312  ;;  %s1796_s27 = scalar_lea.vmem %s347_s21, 32 }
 0x13b   : > { %p1797_p12 = scmp.ne.s32.totalorder %s347_s21, %s1796_s27  ;;  %p1801_p13 = scmp.lt.s32.totalorder %s347_s21, %s2504_s30 }
 0x13c   : > { %p1802_p0 = scmp.lt.s32.totalorder %s2507_s2, %s1796_s27 }
 0x13e   : > { %p1803_p1 = por %p1802_p0, %p1801_p13 }
 0x140   : > { %p1804_p2 = pnand %p1803_p1, %p1797_p12 }
 0x142   : > { %1807 = shalt.err (!%p1804_p2)  }
 0x143   : > { %349 = dma.hbm_to_vmem [thread:$0]  %s912_s13, 32, %s347_s21, [#allocation2 + $0x3], %s2428_s3, %s2428_s3, %s2429_s4 }
 0x144   : > { %s354_s28 = scalar_lea.vmem %s2496_s24, 52 [#allocation3]  ;;  %s924_s29 = scalar_lea.hbm %s2493_s22, 576 }
 0x145   : > { %s356_s5 = sshll.u32 %s354_s28, 4  ;;  %s364_s11 = scalar_lea.vmem %s2496_s24, 53 [#allocation3]  ;;  %s357_s5 = int_to_ptr.vmem [resolvable:$true] %s356_s5 }
 0x146   : > { %s366_s12 = sshll.u32 %s364_s11, 4  ;;  %s1819_s19 = scalar_lea.vmem %s357_s5, 32  ;;  %s367_s12 = int_to_ptr.vmem [resolvable:$true] %s366_s12 }
 0x147   : > { %p1820_p3 = scmp.ne.s32.totalorder %s357_s5, %s1819_s19  ;;  %p1824_p4 = scmp.lt.s32.totalorder %s357_s5, %s2504_s30 }
 0x148   : > { %p1825_p5 = scmp.lt.s32.totalorder %s2507_s2, %s1819_s19 }
 0x14a   : > { %p1826_p8 = por %p1825_p5, %p1824_p4 }
 0x14c   : > { %p1827_p9 = pnand %p1826_p8, %p1820_p3 }
 0x14e   : > { %1830 = shalt.err (!%p1827_p9)  }
 0x14f   : > { %359 = dma.hbm_to_vmem [thread:$0]  %s918_s23, 32, %s357_s5, [#allocation2 + $0x4], %s2428_s3, %s2428_s3, %s2429_s4 }
 0x150   : > { %s930_s13 = scalar_lea.hbm %s2493_s22, 1360  ;;  %s1842_s20 = scalar_lea.vmem %s367_s12, 32 }
 0x151   : > { %p1843_p11 = scmp.ne.s32.totalorder %s367_s12, %s1842_s20  ;;  %p1847_p12 = scmp.lt.s32.totalorder %s367_s12, %s2504_s30 }
 0x152   : > { %p1848_p13 = scmp.lt.s32.totalorder %s2507_s2, %s1842_s20 }
 0x154   : > { %p1849_p0 = por %p1848_p13, %p1847_p12 }
 0x156   : > { %p1850_p1 = pnand %p1849_p0, %p1843_p11 }
 0x158   : > { %1853 = shalt.err (!%p1850_p1)  }
 0x159   : > { %369 = dma.hbm_to_vmem [thread:$0]  %s924_s29, 32, %s367_s12, [#allocation2 + $0x5], %s2428_s3, %s2428_s3, %s2429_s4 }
 0x15a   : > { %s374_s21 = scalar_lea.vmem %s2496_s24, 54 [#allocation3]  ;;  %s936_s26 = scalar_lea.hbm %s2493_s22, 624 }
 0x15b   : > { %s376_s23 = sshll.u32 %s374_s21, 4  ;;  %s384_s27 = scalar_lea.vmem %s2496_s24, 55 [#allocation3]  ;;  %s377_s23 = int_to_ptr.vmem [resolvable:$true] %s376_s23 }
 0x15c   : > { %s386_s28 = sshll.u32 %s384_s27, 4  ;;  %s1865_s5 = scalar_lea.vmem %s377_s23, 32  ;;  %s387_s28 = int_to_ptr.vmem [resolvable:$true] %s386_s28 }
 0x15d   : > { %p1866_p2 = scmp.ne.s32.totalorder %s377_s23, %s1865_s5  ;;  %p1870_p3 = scmp.lt.s32.totalorder %s377_s23, %s2504_s30 }
 0x15e   : > { %p1871_p4 = scmp.lt.s32.totalorder %s2507_s2, %s1865_s5 }
 0x160   : > { %p1872_p5 = por %p1871_p4, %p1870_p3 }
 0x162   : > { %p1873_p8 = pnand %p1872_p5, %p1866_p2 }
 0x164   : > { %1876 = shalt.err (!%p1873_p8)  }
 0x165   : > { %379 = dma.hbm_to_vmem [thread:$0]  %s930_s13, 32, %s377_s23, [#allocation2 + $0x6], %s2428_s3, %s2428_s3, %s2429_s4 }
 0x166   : > { %s942_s29 = scalar_lea.hbm %s2493_s22, 16  ;;  %s1888_s11 = scalar_lea.vmem %s387_s28, 32 }
 0x167   : > { %p1889_p9 = scmp.ne.s32.totalorder %s387_s28, %s1888_s11  ;;  %p1893_p11 = scmp.lt.s32.totalorder %s387_s28, %s2504_s30 }
 0x168   : > { %p1894_p12 = scmp.lt.s32.totalorder %s2507_s2, %s1888_s11 }
 0x16a   : > { %p1895_p13 = por %p1894_p12, %p1893_p11 }
 0x16c   : > { %p1896_p0 = pnand %p1895_p13, %p1889_p9 }
 0x16e   : > { %1899 = shalt.err (!%p1896_p0)  }
 0x16f   : > { %389 = dma.hbm_to_vmem [thread:$0]  %s936_s26, 32, %s387_s28, [#allocation2 + $0x7], %s2428_s3, %s2428_s3, %s2429_s4 }
 0x170   : > { %s394_s12 = scalar_lea.vmem %s2496_s24, 64 [#allocation3]  ;;  %s948_s19 = scalar_lea.hbm %s2493_s22, 800 }
 0x171   : > { %s396_s13 = sshll.u32 %s394_s12, 4  ;;  %s404_s20 = scalar_lea.vmem %s2496_s24, 65 [#allocation3]  ;;  %s397_s13 = int_to_ptr.vmem [resolvable:$true] %s396_s13 }
 0x172   : > { %s406_s21 = sshll.u32 %s404_s20, 4  ;;  %s1911_s23 = scalar_lea.vmem %s397_s13, 32  ;;  %s407_s21 = int_to_ptr.vmem [resolvable:$true] %s406_s21 }
 0x173   : > { %p1912_p1 = scmp.ne.s32.totalorder %s397_s13, %s1911_s23  ;;  %p1916_p2 = scmp.lt.s32.totalorder %s397_s13, %s2504_s30 }
 0x174   : > { %p1917_p3 = scmp.lt.s32.totalorder %s2507_s2, %s1911_s23 }
 0x176   : > { %p1918_p4 = por %p1917_p3, %p1916_p2 }
 0x178   : > { %p1919_p5 = pnand %p1918_p4, %p1912_p1 }
 0x17a   : > { %1922 = shalt.err (!%p1919_p5)  }
 0x17b   : > { %399 = dma.hbm_to_vmem [thread:$0]  %s942_s29, 32, %s397_s13, [#allocation2], %s2428_s3, %s2428_s3, %s2429_s4 }
 0x17c   : > { %s954_s26 = scalar_lea.hbm %s2493_s22, 64  ;;  %s1934_s27 = scalar_lea.vmem %s407_s21, 32 }
 0x17d   : > { %p1935_p8 = scmp.ne.s32.totalorder %s407_s21, %s1934_s27  ;;  %p1939_p9 = scmp.lt.s32.totalorder %s407_s21, %s2504_s30 }
 0x17e   : > { %p1940_p11 = scmp.lt.s32.totalorder %s2507_s2, %s1934_s27 }
 0x180   : > { %p1941_p12 = por %p1940_p11, %p1939_p9 }
 0x182   : > { %p1942_p13 = pnand %p1941_p12, %p1935_p8 }
 0x184   : > { %1945 = shalt.err (!%p1942_p13)  }
 0x185   : > { %409 = dma.hbm_to_vmem [thread:$0]  %s948_s19, 32, %s407_s21, [#allocation2 + $0x1], %s2428_s3, %s2428_s3, %s2429_s4 }
 0x186   : > { %s414_s28 = scalar_lea.vmem %s2496_s24, 66 [#allocation3]  ;;  %s960_s5 = scalar_lea.hbm %s2493_s22, 848 }
 0x187   : > { %s416_s29 = sshll.u32 %s414_s28, 4  ;;  %s424_s11 = scalar_lea.vmem %s2496_s24, 67 [#allocation3]  ;;  %s417_s29 = int_to_ptr.vmem [resolvable:$true] %s416_s29 }
 0x188   : > { %s426_s12 = sshll.u32 %s424_s11, 4  ;;  %s1957_s13 = scalar_lea.vmem %s417_s29, 32  ;;  %s427_s12 = int_to_ptr.vmem [resolvable:$true] %s426_s12 }
 0x189   : > { %p1958_p0 = scmp.ne.s32.totalorder %s417_s29, %s1957_s13  ;;  %p1962_p1 = scmp.lt.s32.totalorder %s417_s29, %s2504_s30 }
 0x18a   : > { %p1963_p2 = scmp.lt.s32.totalorder %s2507_s2, %s1957_s13 }
 0x18c   : > { %p1964_p3 = por %p1963_p2, %p1962_p1 }
 0x18e   : > { %p1965_p4 = pnand %p1964_p3, %p1958_p0 }
 0x190   : > { %1968 = shalt.err (!%p1965_p4)  }
 0x191   : > { %419 = dma.hbm_to_vmem [thread:$0]  %s954_s26, 32, %s417_s29, [#allocation2 + $0x2], %s2428_s3, %s2428_s3, %s2429_s4 }
 0x192   : > { %s966_s19 = scalar_lea.hbm %s2493_s22, 112  ;;  %s1980_s20 = scalar_lea.vmem %s427_s12, 32 }
 0x193   : > { %p1981_p5 = scmp.ne.s32.totalorder %s427_s12, %s1980_s20  ;;  %p1985_p8 = scmp.lt.s32.totalorder %s427_s12, %s2504_s30 }
 0x194   : > { %p1986_p9 = scmp.lt.s32.totalorder %s2507_s2, %s1980_s20 }
 0x196   : > { %p1987_p11 = por %p1986_p9, %p1985_p8 }
 0x198   : > { %p1988_p12 = pnand %p1987_p11, %p1981_p5 }
 0x19a   : > { %1991 = shalt.err (!%p1988_p12)  }
 0x19b   : > { %429 = dma.hbm_to_vmem [thread:$0]  %s960_s5, 32, %s427_s12, [#allocation2 + $0x3], %s2428_s3, %s2428_s3, %s2429_s4 }
 0x19c   : > { %s434_s21 = scalar_lea.vmem %s2496_s24, 68 [#allocation3]  ;;  %s972_s23 = scalar_lea.hbm %s2493_s22, 1024 }
 0x19d   : > { %s436_s26 = sshll.u32 %s434_s21, 4  ;;  %s444_s27 = scalar_lea.vmem %s2496_s24, 69 [#allocation3]  ;;  %s437_s26 = int_to_ptr.vmem [resolvable:$true] %s436_s26 }
 0x19e   : > { %s446_s28 = sshll.u32 %s444_s27, 4  ;;  %s2003_s29 = scalar_lea.vmem %s437_s26, 32  ;;  %s447_s28 = int_to_ptr.vmem [resolvable:$true] %s446_s28 }
 0x19f   : > { %p2004_p13 = scmp.ne.s32.totalorder %s437_s26, %s2003_s29  ;;  %p2008_p0 = scmp.lt.s32.totalorder %s437_s26, %s2504_s30 }
 0x1a0   : > { %p2009_p1 = scmp.lt.s32.totalorder %s2507_s2, %s2003_s29 }
 0x1a2   : > { %p2010_p2 = por %p2009_p1, %p2008_p0 }
 0x1a4   : > { %p2011_p3 = pnand %p2010_p2, %p2004_p13 }
 0x1a6   : > { %2014 = shalt.err (!%p2011_p3)  }
 0x1a7   : > { %439 = dma.hbm_to_vmem [thread:$0]  %s966_s19, 32, %s437_s26, [#allocation2 + $0x4], %s2428_s3, %s2428_s3, %s2429_s4 }
 0x1a8   : > { %s978_s5 = scalar_lea.hbm %s2493_s22, 288  ;;  %s2026_s11 = scalar_lea.vmem %s447_s28, 32 }
 0x1a9   : > { %p2027_p4 = scmp.ne.s32.totalorder %s447_s28, %s2026_s11  ;;  %p2031_p5 = scmp.lt.s32.totalorder %s447_s28, %s2504_s30 }
 0x1aa   : > { %p2032_p8 = scmp.lt.s32.totalorder %s2507_s2, %s2026_s11 }
 0x1ac   : > { %p2033_p9 = por %p2032_p8, %p2031_p5 }
 0x1ae   : > { %p2034_p11 = pnand %p2033_p9, %p2027_p4 }
 0x1b0   : > { %2037 = shalt.err (!%p2034_p11)  }
 0x1b1   : > { %449 = dma.hbm_to_vmem [thread:$0]  %s972_s23, 32, %s447_s28, [#allocation2 + $0x5], %s2428_s3, %s2428_s3, %s2429_s4 }
 0x1b2   : > { %s454_s12 = scalar_lea.vmem %s2496_s24, 70 [#allocation3]  ;;  %s984_s13 = scalar_lea.hbm %s2493_s22, 1072 }
 0x1b3   : > { %s456_s19 = sshll.u32 %s454_s12, 4  ;;  %s464_s20 = scalar_lea.vmem %s2496_s24, 71 [#allocation3]  ;;  %s457_s19 = int_to_ptr.vmem [resolvable:$true] %s456_s19 }
 0x1b4   : > { %s466_s21 = sshll.u32 %s464_s20, 4  ;;  %s2049_s26 = scalar_lea.vmem %s457_s19, 32  ;;  %s467_s21 = int_to_ptr.vmem [resolvable:$true] %s466_s21 }
 0x1b5   : > { %p2050_p12 = scmp.ne.s32.totalorder %s457_s19, %s2049_s26  ;;  %p2054_p13 = scmp.lt.s32.totalorder %s457_s19, %s2504_s30 }
 0x1b6   : > { %p2055_p0 = scmp.lt.s32.totalorder %s2507_s2, %s2049_s26 }
 0x1b8   : > { %p2056_p1 = por %p2055_p0, %p2054_p13 }
 0x1ba   : > { %p2057_p2 = pnand %p2056_p1, %p2050_p12 }
 0x1bc   : > { %2060 = shalt.err (!%p2057_p2)  }
 0x1bd   : > { %459 = dma.hbm_to_vmem [thread:$0]  %s978_s5, 32, %s457_s19, [#allocation2 + $0x6], %s2428_s3, %s2428_s3, %s2429_s4 }
 0x1be   : > { %s990_s23 = scalar_lea.hbm %s2493_s22, 336  ;;  %s2072_s27 = scalar_lea.vmem %s467_s21, 32 }
 0x1bf   : > { %p2073_p3 = scmp.ne.s32.totalorder %s467_s21, %s2072_s27  ;;  %p2077_p4 = scmp.lt.s32.totalorder %s467_s21, %s2504_s30 }
 0x1c0   : > { %p2078_p5 = scmp.lt.s32.totalorder %s2507_s2, %s2072_s27 }
 0x1c2   : > { %p2079_p8 = por %p2078_p5, %p2077_p4 }
 0x1c4   : > { %p2080_p9 = pnand %p2079_p8, %p2073_p3 }
 0x1c6   : > { %2083 = shalt.err (!%p2080_p9)  }
 0x1c7   : > { %469 = dma.hbm_to_vmem [thread:$0]  %s984_s13, 32, %s467_s21, [#allocation2 + $0x7], %s2428_s3, %s2428_s3, %s2429_s4 }
 0x1c8   : > { %s474_s28 = scalar_lea.vmem %s2496_s24, 80 [#allocation3]  ;;  %s996_s29 = scalar_lea.hbm %s2493_s22, 1120 }
 0x1c9   : > { %s476_s5 = sshll.u32 %s474_s28, 4  ;;  %s484_s11 = scalar_lea.vmem %s2496_s24, 81 [#allocation3]  ;;  %s477_s5 = int_to_ptr.vmem [resolvable:$true] %s476_s5 }
 0x1ca   : > { %s486_s12 = sshll.u32 %s484_s11, 4  ;;  %s2095_s19 = scalar_lea.vmem %s477_s5, 32  ;;  %s487_s12 = int_to_ptr.vmem [resolvable:$true] %s486_s12 }
 0x1cb   : > { %p2096_p11 = scmp.ne.s32.totalorder %s477_s5, %s2095_s19  ;;  %p2100_p12 = scmp.lt.s32.totalorder %s477_s5, %s2504_s30 }
 0x1cc   : > { %p2101_p13 = scmp.lt.s32.totalorder %s2507_s2, %s2095_s19 }
 0x1ce   : > { %p2102_p0 = por %p2101_p13, %p2100_p12 }
 0x1d0   : > { %p2103_p1 = pnand %p2102_p0, %p2096_p11 }
 0x1d2   : > { %2106 = shalt.err (!%p2103_p1)  }
 0x1d3   : > { %479 = dma.hbm_to_vmem [thread:$0]  %s990_s23, 32, %s477_s5, [#allocation2], %s2428_s3, %s2428_s3, %s2429_s4 }
 0x1d4   : > { %s1002_s13 = scalar_lea.hbm %s2493_s22, 512  ;;  %s2118_s20 = scalar_lea.vmem %s487_s12, 32 }
 0x1d5   : > { %p2119_p2 = scmp.ne.s32.totalorder %s487_s12, %s2118_s20  ;;  %p2123_p3 = scmp.lt.s32.totalorder %s487_s12, %s2504_s30 }
 0x1d6   : > { %p2124_p4 = scmp.lt.s32.totalorder %s2507_s2, %s2118_s20 }
 0x1d8   : > { %p2125_p5 = por %p2124_p4, %p2123_p3 }
 0x1da   : > { %p2126_p8 = pnand %p2125_p5, %p2119_p2 }
 0x1dc   : > { %2129 = shalt.err (!%p2126_p8)  }
 0x1dd   : > { %489 = dma.hbm_to_vmem [thread:$0]  %s996_s29, 32, %s487_s12, [#allocation2 + $0x1], %s2428_s3, %s2428_s3, %s2429_s4 }
 0x1de   : > { %s494_s21 = scalar_lea.vmem %s2496_s24, 82 [#allocation3]  ;;  %s1008_s26 = scalar_lea.hbm %s2493_s22, 1296 }
 0x1df   : > { %s496_s23 = sshll.u32 %s494_s21, 4  ;;  %s504_s27 = scalar_lea.vmem %s2496_s24, 83 [#allocation3]  ;;  %s497_s23 = int_to_ptr.vmem [resolvable:$true] %s496_s23 }
 0x1e0   : > { %s506_s28 = sshll.u32 %s504_s27, 4  ;;  %s2141_s5 = scalar_lea.vmem %s497_s23, 32  ;;  %s507_s28 = int_to_ptr.vmem [resolvable:$true] %s506_s28 }
 0x1e1   : > { %p2142_p9 = scmp.ne.s32.totalorder %s497_s23, %s2141_s5  ;;  %p2146_p11 = scmp.lt.s32.totalorder %s497_s23, %s2504_s30 }
 0x1e2   : > { %p2147_p12 = scmp.lt.s32.totalorder %s2507_s2, %s2141_s5 }
 0x1e4   : > { %p2148_p13 = por %p2147_p12, %p2146_p11 }
 0x1e6   : > { %p2149_p0 = pnand %p2148_p13, %p2142_p9 }
 0x1e8   : > { %2152 = shalt.err (!%p2149_p0)  }
 0x1e9   : > { %499 = dma.hbm_to_vmem [thread:$0]  %s1002_s13, 32, %s497_s23, [#allocation2 + $0x2], %s2428_s3, %s2428_s3, %s2429_s4 }
 0x1ea   : > { %s1014_s29 = scalar_lea.hbm %s2493_s22, 560  ;;  %s2164_s11 = scalar_lea.vmem %s507_s28, 32 }
 0x1eb   : > { %p2165_p1 = scmp.ne.s32.totalorder %s507_s28, %s2164_s11  ;;  %p2169_p2 = scmp.lt.s32.totalorder %s507_s28, %s2504_s30 }
 0x1ec   : > { %p2170_p3 = scmp.lt.s32.totalorder %s2507_s2, %s2164_s11 }
 0x1ee   : > { %p2171_p4 = por %p2170_p3, %p2169_p2 }
 0x1f0   : > { %p2172_p5 = pnand %p2171_p4, %p2165_p1 }
 0x1f2   : > { %2175 = shalt.err (!%p2172_p5)  }
 0x1f3   : > { %509 = dma.hbm_to_vmem [thread:$0]  %s1008_s26, 32, %s507_s28, [#allocation2 + $0x3], %s2428_s3, %s2428_s3, %s2429_s4 }
 0x1f4   : > { %s514_s12 = scalar_lea.vmem %s2496_s24, 84 [#allocation3]  ;;  %s1020_s19 = scalar_lea.hbm %s2493_s22, 1344 }
 0x1f5   : > { %s516_s13 = sshll.u32 %s514_s12, 4  ;;  %s524_s20 = scalar_lea.vmem %s2496_s24, 85 [#allocation3]  ;;  %s517_s13 = int_to_ptr.vmem [resolvable:$true] %s516_s13 }
 0x1f6   : > { %s526_s21 = sshll.u32 %s524_s20, 4  ;;  %s2187_s23 = scalar_lea.vmem %s517_s13, 32  ;;  %s527_s21 = int_to_ptr.vmem [resolvable:$true] %s526_s21 }
 0x1f7   : > { %p2188_p8 = scmp.ne.s32.totalorder %s517_s13, %s2187_s23  ;;  %p2192_p9 = scmp.lt.s32.totalorder %s517_s13, %s2504_s30 }
 0x1f8   : > { %p2193_p11 = scmp.lt.s32.totalorder %s2507_s2, %s2187_s23 }
 0x1fa   : > { %p2194_p12 = por %p2193_p11, %p2192_p9 }
 0x1fc   : > { %p2195_p13 = pnand %p2194_p12, %p2188_p8 }
 0x1fe   : > { %2198 = shalt.err (!%p2195_p13)  }
 0x1ff   : > { %519 = dma.hbm_to_vmem [thread:$0]  %s1014_s29, 32, %s517_s13, [#allocation2 + $0x4], %s2428_s3, %s2428_s3, %s2429_s4 }
 0x200   : > { %s1026_s26 = scalar_lea.hbm %s2493_s22, 608  ;;  %s2210_s27 = scalar_lea.vmem %s527_s21, 32 }
 0x201   : > { %p2211_p0 = scmp.ne.s32.totalorder %s527_s21, %s2210_s27  ;;  %p2215_p1 = scmp.lt.s32.totalorder %s527_s21, %s2504_s30 }
 0x202   : > { %p2216_p2 = scmp.lt.s32.totalorder %s2507_s2, %s2210_s27 }
 0x204   : > { %p2217_p3 = por %p2216_p2, %p2215_p1 }
 0x206   : > { %p2218_p4 = pnand %p2217_p3, %p2211_p0 }
 0x208   : > { %2221 = shalt.err (!%p2218_p4)  }
 0x209   : > { %529 = dma.hbm_to_vmem [thread:$0]  %s1020_s19, 32, %s527_s21, [#allocation2 + $0x5], %s2428_s3, %s2428_s3, %s2429_s4 }
 0x20a   : > { %s534_s28 = scalar_lea.vmem %s2496_s24, 86 [#allocation3]  ;;  %s1032_s5 = scalar_lea.hbm %s2493_s22, 1392 }
 0x20b   : > { %s536_s29 = sshll.u32 %s534_s28, 4  ;;  %s544_s11 = scalar_lea.vmem %s2496_s24, 87 [#allocation3]  ;;  %s537_s29 = int_to_ptr.vmem [resolvable:$true] %s536_s29 }
 0x20c   : > { %s546_s12 = sshll.u32 %s544_s11, 4  ;;  %s2233_s13 = scalar_lea.vmem %s537_s29, 32  ;;  %s547_s12 = int_to_ptr.vmem [resolvable:$true] %s546_s12 }
 0x20d   : > { %p2234_p5 = scmp.ne.s32.totalorder %s537_s29, %s2233_s13  ;;  %p2238_p8 = scmp.lt.s32.totalorder %s537_s29, %s2504_s30 }
 0x20e   : > { %p2239_p9 = scmp.lt.s32.totalorder %s2507_s2, %s2233_s13 }
 0x210   : > { %p2240_p11 = por %p2239_p9, %p2238_p8 }
 0x212   : > { %p2241_p12 = pnand %p2240_p11, %p2234_p5 }
 0x214   : > { %2244 = shalt.err (!%p2241_p12)  }
 0x215   : > { %539 = dma.hbm_to_vmem [thread:$0]  %s1026_s26, 32, %s537_s29, [#allocation2 + $0x6], %s2428_s3, %s2428_s3, %s2429_s4 }
 0x216   : > { %s2256_s19 = scalar_lea.vmem %s547_s12, 32  ;;  %p2261_p0 = scmp.lt.s32.totalorder %s547_s12, %s2504_s30 }
 0x217   : > { %p2257_p13 = scmp.ne.s32.totalorder %s547_s12, %s2256_s19  ;;  %p2262_p1 = scmp.lt.s32.totalorder %s2507_s2, %s2256_s19 }
 0x219   : > { %p2263_p2 = por %p2262_p1, %p2261_p0 }
 0x21b   : > { %p2264_p3 = pnand %p2263_p2, %p2257_p13 }
 0x21d   : > { %2267 = shalt.err (!%p2264_p3)  }
 0x21e   : > { %549 = dma.hbm_to_vmem [thread:$0]  %s1032_s5, 32, %s547_s12, [#allocation2 + $0x7], %s2428_s3, %s2428_s3, %s2429_s4 }
 0x21f   : > { %2311 = dma.done.wait [#allocation2], 32 }
 0x220   : > { %2312 = vsyncadd [#allocation2], 4294967264 }
 0x221   : > { %2313 = dma.done.wait [#allocation2 + $0x1], 32 }
 0x222   : > { %2314 = vsyncadd [#allocation2 + $0x1], 4294967264 }
 0x223   : > { %2315 = dma.done.wait [#allocation2 + $0x2], 32 }
 0x224   : > { %2316 = vsyncadd [#allocation2 + $0x2], 4294967264 }
 0x225   : > { %2317 = dma.done.wait [#allocation2 + $0x3], 32 }
 0x226   : > { %2318 = vsyncadd [#allocation2 + $0x3], 4294967264 }
 0x227   : > { %2319 = dma.done.wait [#allocation2 + $0x4], 32 }
 0x228   : > { %2320 = vsyncadd [#allocation2 + $0x4], 4294967264 }
 0x229   : > { %2321 = dma.done.wait [#allocation2 + $0x5], 32 }
 0x22a   : > { %2322 = vsyncadd [#allocation2 + $0x5], 4294967264 }
 0x22b   : > { %2323 = dma.done.wait [#allocation2 + $0x6], 32 }
 0x22c   : > { %2324 = vsyncadd [#allocation2 + $0x6], 4294967264 }
 0x22d   : > { %2325 = dma.done.wait [#allocation2 + $0x7], 32 }
 0x22e   : > { %2326 = vsyncadd [#allocation2 + $0x7], 4294967264 }
 0x22f   : > { %2327 = dma.done.wait [#allocation2], 32 }
 0x230   : > { %2328 = vsyncadd [#allocation2], 4294967264 }
 0x231   : > { %2329 = dma.done.wait [#allocation2 + $0x1], 32 }
 0x232   : > { %2330 = vsyncadd [#allocation2 + $0x1], 4294967264 }
 0x233   : > { %2331 = dma.done.wait [#allocation2 + $0x2], 32 }
 0x234   : > { %2332 = vsyncadd [#allocation2 + $0x2], 4294967264 }
 0x235   : > { %2333 = dma.done.wait [#allocation2 + $0x3], 32 }
 0x236   : > { %2334 = vsyncadd [#allocation2 + $0x3], 4294967264 }
 0x237   : > { %2335 = dma.done.wait [#allocation2 + $0x4], 32 }
 0x238   : > { %2336 = vsyncadd [#allocation2 + $0x4], 4294967264 }
 0x239   : > { %2337 = dma.done.wait [#allocation2 + $0x5], 32 }
 0x23a   : > { %2338 = vsyncadd [#allocation2 + $0x5], 4294967264 }
 0x23b   : > { %2339 = dma.done.wait [#allocation2 + $0x6], 32 }
 0x23c   : > { %2340 = vsyncadd [#allocation2 + $0x6], 4294967264 }
 0x23d   : > { %2341 = dma.done.wait [#allocation2 + $0x7], 32 }
 0x23e   : > { %2342 = vsyncadd [#allocation2 + $0x7], 4294967264 }
 0x23f   : > { %2343 = dma.done.wait [#allocation2], 32 }
 0x240   : > { %2344 = vsyncadd [#allocation2], 4294967264 }
 0x241   : > { %2345 = dma.done.wait [#allocation2 + $0x1], 32 }
 0x242   : > { %2346 = vsyncadd [#allocation2 + $0x1], 4294967264 }
 0x243   : > { %2347 = dma.done.wait [#allocation2 + $0x2], 32 }
 0x244   : > { %2348 = vsyncadd [#allocation2 + $0x2], 4294967264 }
 0x245   : > { %2349 = dma.done.wait [#allocation2 + $0x3], 32 }
 0x246   : > { %2350 = vsyncadd [#allocation2 + $0x3], 4294967264 }
 0x247   : > { %2351 = dma.done.wait [#allocation2 + $0x4], 32 }
 0x248   : > { %2352 = vsyncadd [#allocation2 + $0x4], 4294967264 }
 0x249   : > { %2353 = dma.done.wait [#allocation2 + $0x5], 32 }
 0x24a   : > { %2354 = vsyncadd [#allocation2 + $0x5], 4294967264 }
 0x24b   : > { %2355 = dma.done.wait [#allocation2 + $0x6], 32 }
 0x24c   : > { %2356 = vsyncadd [#allocation2 + $0x6], 4294967264 }
 0x24d   : > { %2357 = dma.done.wait [#allocation2 + $0x7], 32 }
 0x24e   : > { %2358 = vsyncadd [#allocation2 + $0x7], 4294967264 }
 0x24f   : > { %2359 = dma.done.wait [#allocation2], 32 }
 0x250   : > { %2360 = vsyncadd [#allocation2], 4294967264 }
 0x251   : > { %2361 = dma.done.wait [#allocation2 + $0x1], 32 }
 0x252   : > { %2362 = vsyncadd [#allocation2 + $0x1], 4294967264 }
 0x253   : > { %2363 = dma.done.wait [#allocation2 + $0x2], 32 }
 0x254   : > { %2364 = vsyncadd [#allocation2 + $0x2], 4294967264 }
 0x255   : > { %2365 = dma.done.wait [#allocation2 + $0x3], 32 }
 0x256   : > { %2366 = vsyncadd [#allocation2 + $0x3], 4294967264 }
 0x257   : > { %2367 = dma.done.wait [#allocation2 + $0x4], 32 }
 0x258   : > { %2368 = vsyncadd [#allocation2 + $0x4], 4294967264 }
 0x259   : > { %2369 = dma.done.wait [#allocation2 + $0x5], 32 }
 0x25a   : > { %2370 = vsyncadd [#allocation2 + $0x5], 4294967264 }
 0x25b   : > { %2371 = dma.done.wait [#allocation2 + $0x6], 32 }
 0x25c   : > { %2372 = vsyncadd [#allocation2 + $0x6], 4294967264 }
 0x25d   : > { %2373 = dma.done.wait [#allocation2 + $0x7], 32 }
 0x25e   : > { %2374 = vsyncadd [#allocation2 + $0x7], 4294967264 }
 0x25f   : > { %2375 = dma.done.wait [#allocation2], 32 }
 0x260   : > { %2376 = vsyncadd [#allocation2], 4294967264 }
 0x261   : > { %2377 = dma.done.wait [#allocation2 + $0x1], 32 }
 0x262   : > { %2378 = vsyncadd [#allocation2 + $0x1], 4294967264 }
 0x263   : > { %2379 = dma.done.wait [#allocation2 + $0x2], 32 }
 0x264   : > { %2380 = vsyncadd [#allocation2 + $0x2], 4294967264 }
 0x265   : > { %2381 = dma.done.wait [#allocation2 + $0x3], 32 }
 0x266   : > { %2382 = vsyncadd [#allocation2 + $0x3], 4294967264 }
 0x267   : > { %2383 = dma.done.wait [#allocation2 + $0x4], 32 }
 0x268   : > { %2384 = vsyncadd [#allocation2 + $0x4], 4294967264 }
 0x269   : > { %2385 = dma.done.wait [#allocation2 + $0x5], 32 }
 0x26a   : > { %2386 = vsyncadd [#allocation2 + $0x5], 4294967264 }
 0x26b   : > { %2387 = dma.done.wait [#allocation2 + $0x6], 32 }
 0x26c   : > { %2388 = vsyncadd [#allocation2 + $0x6], 4294967264 }
 0x26d   : > { %2389 = dma.done.wait [#allocation2 + $0x7], 32 }
 0x26e   : > { %2390 = vsyncadd [#allocation2 + $0x7], 4294967264 }
 0x26f   : > { %2391 = dma.done.wait [#allocation2], 32 }
 0x270   : > { %2392 = vsyncadd [#allocation2], 4294967264 }
 0x271   : > { %2393 = dma.done.wait [#allocation2 + $0x1], 32 }
 0x272   : > { %2394 = vsyncadd [#allocation2 + $0x1], 4294967264 }
 0x273   : > { %2395 = dma.done.wait [#allocation2 + $0x2], 32 }
 0x274   : > { %2396 = vsyncadd [#allocation2 + $0x2], 4294967264 }
 0x275   : > { %2397 = dma.done.wait [#allocation2 + $0x3], 32 }
 0x276   : > { %2398 = vsyncadd [#allocation2 + $0x3], 4294967264 }
 0x277   : > { %2399 = dma.done.wait [#allocation2 + $0x4], 32 }
 0x278   : > { %2400 = vsyncadd [#allocation2 + $0x4], 4294967264 }
 0x279   : > { %2401 = dma.done.wait [#allocation2 + $0x5], 32 }
 0x27a   : > { %2402 = vsyncadd [#allocation2 + $0x5], 4294967264 }
 0x27b   : > { %2403 = dma.done.wait [#allocation2 + $0x6], 32 }
 0x27c   : > { %2404 = vsyncadd [#allocation2 + $0x6], 4294967264 }
 0x27d   : > { %2405 = dma.done.wait [#allocation2 + $0x7], 32 }
 0x27e   : > { %2406 = vsyncadd [#allocation2 + $0x7], 4294967264  ;;  %s663_s3 = scalar_lea.hbm %s2884_s1, %s1120_s18  ;;  %s649_s4 = scalar_lea.sflag [#allocation4], %s56_s17 }
 0x27f   : > { %s2269_s20 = scalar_lea.vmem %s2500_s25, 1536 }
 0x280   : > { %p2270_p4 = scmp.ne.s32.totalorder %s2500_s25, %s2269_s20  ;;  %p2277_p9 = scmp.lt.s32.totalorder %s2507_s2, %s2269_s20 }
 0x282   : > { %p2271_p5 = pnand %p2270_p4, %p2479_p7  ;;  %p2278_p11 = por %p2277_p9, %p1181_p10 }
 0x284   : > { %p2272_p8 = pneg %p2271_p5 }
 0x286   : > { %p2279_p12 = pnand %p2278_p11, %p2272_p8 }
 0x288   : > { %2282 = shalt.err (!%p2279_p12)
}
 0x289   : > { %s2430_s8 = smov 256   ;;  %s2431_s21 = smov 16  }
 0x28a   : > { %1123 = dma.vmem_to_hbm [thread:$0]  (%p2479_p7), %s2500_s25, 1536, %s663_s3, %s649_s4, %s2430_s8, %s2430_s8, %s2431_s21  }
 0x28b PF: > { %p1129_p13 = scmp.ge.s32.totalorder %s2425_s9, 1  ;;  %s679_s17 = sand.u32 1, %s2413_s6  }
 0x28c   : > { %s680_s18 = scalar_lea.sflag [#allocation4], %s679_s17 }
 0x28d   : > { %p1126_p0 = pnand %p1129_p13, %p2472_p6 }
 0x28f   : > { %p1127_p1 = pneg %p1126_p0 }
 0x291   : > { %2408 = dma.done.wait (%p1127_p1), %s680_s18, 1536  }
 0x292   : > { %2410 = vsyncadd (%p1127_p1), %s680_s18, 4294965760  ;;  %s14_s9 = sadd.s32 1, %s2425_s9   ;;  %s2887_s6 = smov %s2417_s7 }
 0x293   : > { %p11_p10 = scmp.ge.s32.totalorder %s14_s9, 3   ;;  %s2888_s7 = smov %s2477_s15 }
 0x294   : > { %s2889_s8 = smov %s2891_s10 }
 0x295   :  { %13 = sbr.rel (!%p11_p10) target bundleno = 3 (0x3), region = 153 }
 0x29a   :  { %685 = vsyncpa [#allocation4], 1 }
 0x29b   :  { %687 = vsyncpa [#allocation4 + $0x1], 1 }
 0x29c   :  { %688 = vsyncmov [#allocation2] }
 0x29f   :  { %s689_s14 = vpop.sfrf %688 }
 0x2a0   :  { %p1112_p6 = scmp.ne.s32.totalorder %s689_s14, 0 }
 0x2a2   :  { %693 = shalt.err (%p1112_p6)  }
 0x2a3   :  { %695 = vsyncmov [#allocation2 + $0x1] }
 0x2a6   :  { %s696_s16 = vpop.sfrf %695 }
 0x2a7   :  { %p1113_p7 = scmp.ne.s32.totalorder %s696_s16, 0 }
 0x2a9   :  { %700 = shalt.err (%p1113_p7)  }
 0x2aa   :  { %702 = vsyncmov [#allocation2 + $0x2] }
 0x2ad   :  { %s703_s25 = vpop.sfrf %702 }
 0x2ae   :  { %p1114_p2 = scmp.ne.s32.totalorder %s703_s25, 0 }
 0x2b0   :  { %707 = shalt.err (%p1114_p2)  }
 0x2b1   :  { %709 = vsyncmov [#allocation2 + $0x3] }
 0x2b4   :  { %s710_s15 = vpop.sfrf %709 }
 0x2b5   :  { %p1115_p3 = scmp.ne.s32.totalorder %s710_s15, 0 }
 0x2b7   :  { %714 = shalt.err (%p1115_p3)  }
 0x2b8   :  { %716 = vsyncmov [#allocation2 + $0x4] }
 0x2bb   :  { %s717_s9 = vpop.sfrf %716 }
 0x2bc   :  { %p1116_p4 = scmp.ne.s32.totalorder %s717_s9, 0 }
 0x2be   :  { %721 = shalt.err (%p1116_p4)  }
 0x2bf   :  { %723 = vsyncmov [#allocation2 + $0x5] }
 0x2c2   :  { %s724_s0 = vpop.sfrf %723 }
 0x2c3   :  { %p1117_p5 = scmp.ne.s32.totalorder %s724_s0, 0 }
 0x2c5   :  { %728 = shalt.err (%p1117_p5)  }
 0x2c6   :  { %730 = vsyncmov [#allocation2 + $0x6] }
 0x2c9   :  { %s731_s1 = vpop.sfrf %730 }
 0x2ca   :  { %p1118_p8 = scmp.ne.s32.totalorder %s731_s1, 0 }
 0x2cc   :  { %735 = shalt.err (%p1118_p8)  }
 0x2cd   :  { %737 = vsyncmov [#allocation2 + $0x7] }
 0x2d0   :  { %s738_s6 = vpop.sfrf %737 }
 0x2d1   :  { %p1119_p9 = scmp.ne.s32.totalorder %s738_s6, 0 }
 0x2d3   :  { %742 = shalt.err (%p1119_p9)  }

</bundles_post_ra>
